<compile_context>
chip_gen: v7x
topology: tpu7x:2x2x1
jax: 0.10.0
libtpu: 0.0.40
codegen_flags: <defaults>
</compile_context>

<pallas_src>
import numpy as np
import jax
import jax.numpy as jnp
from jax.experimental import pallas as pl
from jax.experimental.pallas import tpu as pltpu

# ---- configuration (small shapes consistent with the module) ----
B = 4            # batch
Z_DIM = 32       # latent dim
SEQ_LEN = 16     # H: GRU input_size == hidden_size
SEQ_WIDTH = 8    # T: GRU time steps (batch_first sequence length)
NUM_LAYERS = 4

H = SEQ_LEN
T = SEQ_WIDTH
OUT_DIM = SEQ_LEN * SEQ_WIDTH   # Linear output features (= 128, lane-dense)


def decoder_kernel(z_ref, wfc_ref, bfc_ref, wih_ref, whh_ref, bgi_ref, bhn_ref, out_ref):
    # ---- Linear(z_dim, T*H): (B, Z) @ (Z, 128) + b -> lane-dense (B, 128) ----
    x = jnp.dot(z_ref[...], wfc_ref[...],
                preferred_element_type=jnp.float32) + bfc_ref[...]
    # TODO(synk): nn.Dropout(0.2) is stochastic only in train mode; treated as identity (eval).

    # Reshape1DTo2D((seq_width, seq_len)): (B, T*H) -> T slices of (B, H), held in vregs
    seq = [x[:, t * H:(t + 1) * H] for t in range(T)]

    # ---- 4-layer GRU (batch_first), PyTorch gate order r, z, n ----
    for l in range(NUM_LAYERS):
        w_ih = wih_ref[l]          # (H, 3H), gate-packed columns [r | z | n]
        w_hh = whh_ref[l]          # (H, 3H)
        b_gi = bgi_ref[l]          # (1, 3H): r,z parts = b_ih + b_hh ; n part = b_ih_n
        b_hn = bhn_ref[l]          # (1, H):  b_hh_n (must stay inside r * gh_n)

        # Hoisted input-to-hidden: all T timesteps in ONE matmul (T*B, H) @ (H, 3H)
        seq_flat = jnp.concatenate(seq, axis=0)                            # (T*B, H)
        gi_all = jnp.dot(seq_flat, w_ih,
                         preferred_element_type=jnp.float32) + b_gi        # (T*B, 3H)

        h = jnp.zeros((B, H), jnp.float32)
        new_seq = []
        for t in range(T):
            gi = gi_all[t * B:(t + 1) * B, :]                              # (B, 3H)
            # only the hidden-to-hidden matmul stays on the serial path
            gh = jnp.dot(h, w_hh, preferred_element_type=jnp.float32)      # (B, 3H)
            r = jax.nn.sigmoid(gi[:, :H] + gh[:, :H])
            zg = jax.nn.sigmoid(gi[:, H:2 * H] + gh[:, H:2 * H])
            n = jnp.tanh(gi[:, 2 * H:] + r * (gh[:, 2 * H:] + b_hn))
            h = (1.0 - zg) * n + zg * h
            new_seq.append(h)
        seq = new_seq

    # ---- ExtractLSTMOutput + Sigmoid: one lane-dense (B, T*H) = (4, 128) store ----
    out_ref[...] = jax.nn.sigmoid(jnp.concatenate(seq, axis=1))


@jax.jit
def decoder_forward(z, kparams):
    wfc_t, bfc, wih_p, whh_p, bgi, bhn = kparams
    vmem = pl.BlockSpec(memory_space=pltpu.MemorySpace.VMEM)
    out_flat = pl.pallas_call(
        decoder_kernel,
        out_shape=jax.ShapeDtypeStruct((B, T * H), jnp.float32),   # lane-dense output slab
        in_specs=[vmem] * 7,
        out_specs=vmem,
    )(z, wfc_t, bfc, wih_p, whh_p, bgi, bhn)
    # row b of out_flat == torch GRU output[b] (T, H) flattened; torch then does a
    # flat reshape output.reshape(-1, seq_len, seq_width) -- NOT a transpose.
    return out_flat.reshape(B, SEQ_LEN, SEQ_WIDTH)


def init_params(key):
    """Deterministic parameters in PyTorch shapes, plus kernel-friendly packed forms."""
    ks = jax.random.split(key, 6)
    lim_fc = 1.0 / np.sqrt(Z_DIM)
    wfc = jax.random.uniform(ks[0], (OUT_DIM, Z_DIM), jnp.float32, -lim_fc, lim_fc)
    bfc = jax.random.uniform(ks[1], (OUT_DIM,), jnp.float32, -lim_fc, lim_fc)
    lim_g = 1.0 / np.sqrt(H)
    # (layer, gate[r,z,n], out=H, in=H) mirrors torch's (3H, in) weight split into gates
    wih = jax.random.uniform(ks[2], (NUM_LAYERS, 3, H, H), jnp.float32, -lim_g, lim_g)
    whh = jax.random.uniform(ks[3], (NUM_LAYERS, 3, H, H), jnp.float32, -lim_g, lim_g)
    bih = jax.random.uniform(ks[4], (NUM_LAYERS, 3, H), jnp.float32, -lim_g, lim_g)
    bhh = jax.random.uniform(ks[5], (NUM_LAYERS, 3, H), jnp.float32, -lim_g, lim_g)

    # kernel forms: pre-transposed / gate-packed weights, pre-folded biases
    #   wih_p[l, i, g*H+o] = wih[l, g, o, i]   (so x @ wih_p == x @ W_ih.T, columns [r|z|n])
    wih_p = jnp.transpose(wih, (0, 3, 1, 2)).reshape(NUM_LAYERS, H, 3 * H)
    whh_p = jnp.transpose(whh, (0, 3, 1, 2)).reshape(NUM_LAYERS, H, 3 * H)
    #   gi-slab bias: r,z gates get b_ih+b_hh folded; n gate gets b_ih only
    bgi = jnp.concatenate(
        [bih[:, 0] + bhh[:, 0], bih[:, 1] + bhh[:, 1], bih[:, 2]],
        axis=-1).reshape(NUM_LAYERS, 1, 3 * H)
    #   b_hh_n stays separate (it sits inside r * (gh_n + b_hn))
    bhn = bhh[:, 2].reshape(NUM_LAYERS, 1, H)

    kparams = (
        wfc.T,                              # (Z, T*H)
        bfc.reshape(1, OUT_DIM),            # (1, T*H)
        wih_p,                              # (L, H, 3H)
        whh_p,                              # (L, H, 3H)
        bgi,                                # (L, 1, 3H)
        bhn,                                # (L, 1, H)
    )
    raw = (wfc, bfc, wih, whh, bih, bhh)
    return kparams, raw


def reference_forward(z, raw):
    """Pure-JAX replica of the PyTorch Decoder.forward (eval mode)."""
    wfc, bfc, wih, whh, bih, bhh = raw
    x = z @ wfc.T + bfc                      # Linear
    seq = x.reshape(B, T, H)                 # view(-1, seq_width, seq_len)
    for l in range(NUM_LAYERS):
        h = jnp.zeros((B, H), jnp.float32)
        outs = []
        w_i = wih[l].reshape(3 * H, H)
        w_h = whh[l].reshape(3 * H, H)
        b_i = bih[l].reshape(3 * H)
        b_h = bhh[l].reshape(3 * H)
        for t in range(T):
            gi = seq[:, t] @ w_i.T + b_i
            gh = h @ w_h.T + b_h
            r = jax.nn.sigmoid(gi[:, :H] + gh[:, :H])
            zg = jax.nn.sigmoid(gi[:, H:2 * H] + gh[:, H:2 * H])
            n = jnp.tanh(gi[:, 2 * H:] + r * gh[:, 2 * H:])
            h = (1.0 - zg) * n + zg * h
            outs.append(h)
        seq = jnp.stack(outs, axis=1)
    out = jax.nn.sigmoid(seq)
    return out.reshape(B, SEQ_LEN, SEQ_WIDTH)


if __name__ == "__main__":
    key = jax.random.PRNGKey(0)
    kz, kp = jax.random.split(key)
    z = jax.random.normal(kz, (B, Z_DIM), jnp.float32)
    kparams, raw = init_params(kp)

    out = decoder_forward(z, kparams)
    out = jax.block_until_ready(out)

    ref = reference_forward(z, raw)
    np.testing.assert_allclose(np.asarray(out), np.asarray(ref), rtol=1e-5, atol=1e-5)
    assert out.shape == (B, SEQ_LEN, SEQ_WIDTH)
    print("KERNEL_OK")
</pallas_src>

<mosaic_0001>
module attributes {stable_mosaic.version = 11 : i64} {
  func.func @decoder_kernel(%arg0: memref<4x32xf32, #tpu.memory_space<vmem>>, %arg1: memref<32x128xf32, #tpu.memory_space<vmem>>, %arg2: memref<1x128xf32, #tpu.memory_space<vmem>>, %arg3: memref<4x16x48xf32, #tpu.memory_space<vmem>>, %arg4: memref<4x16x48xf32, #tpu.memory_space<vmem>>, %arg5: memref<4x1x48xf32, #tpu.memory_space<vmem>>, %arg6: memref<4x1x16xf32, #tpu.memory_space<vmem>>, %arg7: memref<4x128xf32, #tpu.memory_space<vmem>>) attributes {dimension_semantics = [], scalar_prefetch = 0 : i64, scratch_operands = 0 : i64, tpu.core_type = #tpu.core_type<tc>} {
    %c0 = arith.constant 0 : index
    %c0_0 = arith.constant 0 : index
    %0 = vector.load %arg0[%c0, %c0_0] : memref<4x32xf32, #tpu.memory_space<vmem>>, vector<4x32xf32>
    %c0_1 = arith.constant 0 : index
    %c0_2 = arith.constant 0 : index
    %1 = vector.load %arg1[%c0_1, %c0_2] : memref<32x128xf32, #tpu.memory_space<vmem>>, vector<32x128xf32>
    %cst = arith.constant dense<0.000000e+00> : vector<4x128xf32>
    %2 = tpu.matmul %0, %1, %cst {dimension_numbers = #tpu.dot_dimension_numbers<[1], [0], [0], [1], [0, 0, 1, 1], [], []>} : vector<4x32xf32>, vector<32x128xf32>, vector<4x128xf32> -> vector<4x128xf32>
    %c0_3 = arith.constant 0 : index
    %c0_4 = arith.constant 0 : index
    %3 = vector.load %arg2[%c0_3, %c0_4] : memref<1x128xf32, #tpu.memory_space<vmem>>, vector<1x128xf32>
    %4 = vector.broadcast %3 : vector<1x128xf32> to vector<4x128xf32>
    %5 = arith.addf %2, %4 : vector<4x128xf32>
    %6 = vector.extract_strided_slice %5 {offsets = [0, 0], sizes = [4, 16], strides = [1, 1]} : vector<4x128xf32> to vector<4x16xf32>
    %7 = vector.extract_strided_slice %5 {offsets = [0, 16], sizes = [4, 16], strides = [1, 1]} : vector<4x128xf32> to vector<4x16xf32>
    %8 = vector.extract_strided_slice %5 {offsets = [0, 32], sizes = [4, 16], strides = [1, 1]} : vector<4x128xf32> to vector<4x16xf32>
    %9 = vector.extract_strided_slice %5 {offsets = [0, 48], sizes = [4, 16], strides = [1, 1]} : vector<4x128xf32> to vector<4x16xf32>
    %10 = vector.extract_strided_slice %5 {offsets = [0, 64], sizes = [4, 16], strides = [1, 1]} : vector<4x128xf32> to vector<4x16xf32>
    %11 = vector.extract_strided_slice %5 {offsets = [0, 80], sizes = [4, 16], strides = [1, 1]} : vector<4x128xf32> to vector<4x16xf32>
    %12 = vector.extract_strided_slice %5 {offsets = [0, 96], sizes = [4, 16], strides = [1, 1]} : vector<4x128xf32> to vector<4x16xf32>
    %13 = vector.extract_strided_slice %5 {offsets = [0, 112], sizes = [4, 16], strides = [1, 1]} : vector<4x128xf32> to vector<4x16xf32>
    %c0_5 = arith.constant 0 : index
    %c0_6 = arith.constant 0 : index
    %c0_7 = arith.constant 0 : index
    %14 = vector.load %arg3[%c0_5, %c0_6, %c0_7] : memref<4x16x48xf32, #tpu.memory_space<vmem>>, vector<1x16x48xf32>
    %15 = vector.shape_cast %14 : vector<1x16x48xf32> to vector<16x48xf32>
    %c0_8 = arith.constant 0 : index
    %c0_9 = arith.constant 0 : index
    %c0_10 = arith.constant 0 : index
    %16 = vector.load %arg4[%c0_8, %c0_9, %c0_10] : memref<4x16x48xf32, #tpu.memory_space<vmem>>, vector<1x16x48xf32>
    %17 = vector.shape_cast %16 : vector<1x16x48xf32> to vector<16x48xf32>
    %c0_11 = arith.constant 0 : index
    %c0_12 = arith.constant 0 : index
    %c0_13 = arith.constant 0 : index
    %18 = vector.load %arg5[%c0_11, %c0_12, %c0_13] : memref<4x1x48xf32, #tpu.memory_space<vmem>>, vector<1x1x48xf32>
    %19 = vector.shape_cast %18 : vector<1x1x48xf32> to vector<1x48xf32>
    %c0_14 = arith.constant 0 : index
    %c0_15 = arith.constant 0 : index
    %c0_16 = arith.constant 0 : index
    %20 = vector.load %arg6[%c0_14, %c0_15, %c0_16] : memref<4x1x16xf32, #tpu.memory_space<vmem>>, vector<1x1x16xf32>
    %21 = vector.shape_cast %20 : vector<1x1x16xf32> to vector<1x16xf32>
    %22 = tpu.concatenate %6, %7, %8, %9, %10, %11, %12, %13 in 0 : vector<4x16xf32>, vector<4x16xf32>, vector<4x16xf32>, vector<4x16xf32>, vector<4x16xf32>, vector<4x16xf32>, vector<4x16xf32>, vector<4x16xf32> -> vector<32x16xf32>
    %cst_17 = arith.constant dense<0.000000e+00> : vector<32x48xf32>
    %23 = tpu.matmul %22, %15, %cst_17 {dimension_numbers = #tpu.dot_dimension_numbers<[1], [0], [0], [1], [0, 0, 1, 1], [], []>} : vector<32x16xf32>, vector<16x48xf32>, vector<32x48xf32> -> vector<32x48xf32>
    %24 = vector.broadcast %19 : vector<1x48xf32> to vector<32x48xf32>
    %25 = arith.addf %23, %24 : vector<32x48xf32>
    %cst_18 = arith.constant 0.000000e+00 : f32
    %26 = vector.broadcast %cst_18 : f32 to vector<4x16xf32>
    %27 = vector.extract_strided_slice %25 {offsets = [0, 0], sizes = [4, 48], strides = [1, 1]} : vector<32x48xf32> to vector<4x48xf32>
    %cst_19 = arith.constant dense<0.000000e+00> : vector<4x48xf32>
    %28 = tpu.matmul %26, %17, %cst_19 {dimension_numbers = #tpu.dot_dimension_numbers<[1], [0], [0], [1], [0, 0, 1, 1], [], []>} : vector<4x16xf32>, vector<16x48xf32>, vector<4x48xf32> -> vector<4x48xf32>
    %29 = vector.extract_strided_slice %27 {offsets = [0, 0], sizes = [4, 16], strides = [1, 1]} : vector<4x48xf32> to vector<4x16xf32>
    %30 = vector.extract_strided_slice %28 {offsets = [0, 0], sizes = [4, 16], strides = [1, 1]} : vector<4x48xf32> to vector<4x16xf32>
    %31 = arith.addf %29, %30 : vector<4x16xf32>
    %32 = arith.negf %31 : vector<4x16xf32>
    %33 = math.exp %32 : vector<4x16xf32>
    %cst_20 = arith.constant 1.000000e+00 : f32
    %34 = vector.broadcast %cst_20 : f32 to vector<4x16xf32>
    %35 = arith.addf %34, %33 : vector<4x16xf32>
    %36 = arith.divf %34, %35 : vector<4x16xf32>
    %37 = vector.extract_strided_slice %27 {offsets = [0, 16], sizes = [4, 16], strides = [1, 1]} : vector<4x48xf32> to vector<4x16xf32>
    %38 = vector.extract_strided_slice %28 {offsets = [0, 16], sizes = [4, 16], strides = [1, 1]} : vector<4x48xf32> to vector<4x16xf32>
    %39 = arith.addf %37, %38 : vector<4x16xf32>
    %40 = arith.negf %39 : vector<4x16xf32>
    %41 = math.exp %40 : vector<4x16xf32>
    %cst_21 = arith.constant 1.000000e+00 : f32
    %42 = vector.broadcast %cst_21 : f32 to vector<4x16xf32>
    %43 = arith.addf %42, %41 : vector<4x16xf32>
    %44 = arith.divf %42, %43 : vector<4x16xf32>
    %45 = vector.extract_strided_slice %27 {offsets = [0, 32], sizes = [4, 16], strides = [1, 1]} : vector<4x48xf32> to vector<4x16xf32>
    %46 = vector.extract_strided_slice %28 {offsets = [0, 32], sizes = [4, 16], strides = [1, 1]} : vector<4x48xf32> to vector<4x16xf32>
    %47 = vector.broadcast %21 : vector<1x16xf32> to vector<4x16xf32>
    %48 = arith.addf %46, %47 : vector<4x16xf32>
    %49 = arith.mulf %36, %48 : vector<4x16xf32>
    %50 = arith.addf %45, %49 : vector<4x16xf32>
    %51 = math.tanh %50 : vector<4x16xf32>
    %cst_22 = arith.constant 1.000000e+00 : f32
    %52 = vector.broadcast %cst_22 : f32 to vector<4x16xf32>
    %53 = arith.subf %52, %44 : vector<4x16xf32>
    %54 = arith.mulf %53, %51 : vector<4x16xf32>
    %55 = arith.mulf %44, %26 : vector<4x16xf32>
    %56 = arith.addf %54, %55 : vector<4x16xf32>
    %57 = vector.extract_strided_slice %25 {offsets = [4, 0], sizes = [4, 48], strides = [1, 1]} : vector<32x48xf32> to vector<4x48xf32>
    %cst_23 = arith.constant dense<0.000000e+00> : vector<4x48xf32>
    %58 = tpu.matmul %56, %17, %cst_23 {dimension_numbers = #tpu.dot_dimension_numbers<[1], [0], [0], [1], [0, 0, 1, 1], [], []>} : vector<4x16xf32>, vector<16x48xf32>, vector<4x48xf32> -> vector<4x48xf32>
    %59 = vector.extract_strided_slice %57 {offsets = [0, 0], sizes = [4, 16], strides = [1, 1]} : vector<4x48xf32> to vector<4x16xf32>
    %60 = vector.extract_strided_slice %58 {offsets = [0, 0], sizes = [4, 16], strides = [1, 1]} : vector<4x48xf32> to vector<4x16xf32>
    %61 = arith.addf %59, %60 : vector<4x16xf32>
    %62 = arith.negf %61 : vector<4x16xf32>
    %63 = math.exp %62 : vector<4x16xf32>
    %cst_24 = arith.constant 1.000000e+00 : f32
    %64 = vector.broadcast %cst_24 : f32 to vector<4x16xf32>
    %65 = arith.addf %64, %63 : vector<4x16xf32>
    %66 = arith.divf %64, %65 : vector<4x16xf32>
    %67 = vector.extract_strided_slice %57 {offsets = [0, 16], sizes = [4, 16], strides = [1, 1]} : vector<4x48xf32> to vector<4x16xf32>
    %68 = vector.extract_strided_slice %58 {offsets = [0, 16], sizes = [4, 16], strides = [1, 1]} : vector<4x48xf32> to vector<4x16xf32>
    %69 = arith.addf %67, %68 : vector<4x16xf32>
    %70 = arith.negf %69 : vector<4x16xf32>
    %71 = math.exp %70 : vector<4x16xf32>
    %cst_25 = arith.constant 1.000000e+00 : f32
    %72 = vector.broadcast %cst_25 : f32 to vector<4x16xf32>
    %73 = arith.addf %72, %71 : vector<4x16xf32>
    %74 = arith.divf %72, %73 : vector<4x16xf32>
    %75 = vector.extract_strided_slice %57 {offsets = [0, 32], sizes = [4, 16], strides = [1, 1]} : vector<4x48xf32> to vector<4x16xf32>
    %76 = vector.extract_strided_slice %58 {offsets = [0, 32], sizes = [4, 16], strides = [1, 1]} : vector<4x48xf32> to vector<4x16xf32>
    %77 = vector.broadcast %21 : vector<1x16xf32> to vector<4x16xf32>
    %78 = arith.addf %76, %77 : vector<4x16xf32>
    %79 = arith.mulf %66, %78 : vector<4x16xf32>
    %80 = arith.addf %75, %79 : vector<4x16xf32>
    %81 = math.tanh %80 : vector<4x16xf32>
    %cst_26 = arith.constant 1.000000e+00 : f32
    %82 = vector.broadcast %cst_26 : f32 to vector<4x16xf32>
    %83 = arith.subf %82, %74 : vector<4x16xf32>
    %84 = arith.mulf %83, %81 : vector<4x16xf32>
    %85 = arith.mulf %74, %56 : vector<4x16xf32>
    %86 = arith.addf %84, %85 : vector<4x16xf32>
    %87 = vector.extract_strided_slice %25 {offsets = [8, 0], sizes = [4, 48], strides = [1, 1]} : vector<32x48xf32> to vector<4x48xf32>
    %cst_27 = arith.constant dense<0.000000e+00> : vector<4x48xf32>
    %88 = tpu.matmul %86, %17, %cst_27 {dimension_numbers = #tpu.dot_dimension_numbers<[1], [0], [0], [1], [0, 0, 1, 1], [], []>} : vector<4x16xf32>, vector<16x48xf32>, vector<4x48xf32> -> vector<4x48xf32>
    %89 = vector.extract_strided_slice %87 {offsets = [0, 0], sizes = [4, 16], strides = [1, 1]} : vector<4x48xf32> to vector<4x16xf32>
    %90 = vector.extract_strided_slice %88 {offsets = [0, 0], sizes = [4, 16], strides = [1, 1]} : vector<4x48xf32> to vector<4x16xf32>
    %91 = arith.addf %89, %90 : vector<4x16xf32>
    %92 = arith.negf %91 : vector<4x16xf32>
    %93 = math.exp %92 : vector<4x16xf32>
    %cst_28 = arith.constant 1.000000e+00 : f32
    %94 = vector.broadcast %cst_28 : f32 to vector<4x16xf32>
    %95 = arith.addf %94, %93 : vector<4x16xf32>
    %96 = arith.divf %94, %95 : vector<4x16xf32>
    %97 = vector.extract_strided_slice %87 {offsets = [0, 16], sizes = [4, 16], strides = [1, 1]} : vector<4x48xf32> to vector<4x16xf32>
    %98 = vector.extract_strided_slice %88 {offsets = [0, 16], sizes = [4, 16], strides = [1, 1]} : vector<4x48xf32> to vector<4x16xf32>
    %99 = arith.addf %97, %98 : vector<4x16xf32>
    %100 = arith.negf %99 : vector<4x16xf32>
    %101 = math.exp %100 : vector<4x16xf32>
    %cst_29 = arith.constant 1.000000e+00 : f32
    %102 = vector.broadcast %cst_29 : f32 to vector<4x16xf32>
    %103 = arith.addf %102, %101 : vector<4x16xf32>
    %104 = arith.divf %102, %103 : vector<4x16xf32>
    %105 = vector.extract_strided_slice %87 {offsets = [0, 32], sizes = [4, 16], strides = [1, 1]} : vector<4x48xf32> to vector<4x16xf32>
    %106 = vector.extract_strided_slice %88 {offsets = [0, 32], sizes = [4, 16], strides = [1, 1]} : vector<4x48xf32> to vector<4x16xf32>
    %107 = vector.broadcast %21 : vector<1x16xf32> to vector<4x16xf32>
    %108 = arith.addf %106, %107 : vector<4x16xf32>
    %109 = arith.mulf %96, %108 : vector<4x16xf32>
    %110 = arith.addf %105, %109 : vector<4x16xf32>
    %111 = math.tanh %110 : vector<4x16xf32>
    %cst_30 = arith.constant 1.000000e+00 : f32
    %112 = vector.broadcast %cst_30 : f32 to vector<4x16xf32>
    %113 = arith.subf %112, %104 : vector<4x16xf32>
    %114 = arith.mulf %113, %111 : vector<4x16xf32>
    %115 = arith.mulf %104, %86 : vector<4x16xf32>
    %116 = arith.addf %114, %115 : vector<4x16xf32>
    %117 = vector.extract_strided_slice %25 {offsets = [12, 0], sizes = [4, 48], strides = [1, 1]} : vector<32x48xf32> to vector<4x48xf32>
    %cst_31 = arith.constant dense<0.000000e+00> : vector<4x48xf32>
    %118 = tpu.matmul %116, %17, %cst_31 {dimension_numbers = #tpu.dot_dimension_numbers<[1], [0], [0], [1], [0, 0, 1, 1], [], []>} : vector<4x16xf32>, vector<16x48xf32>, vector<4x48xf32> -> vector<4x48xf32>
    %119 = vector.extract_strided_slice %117 {offsets = [0, 0], sizes = [4, 16], strides = [1, 1]} : vector<4x48xf32> to vector<4x16xf32>
    %120 = vector.extract_strided_slice %118 {offsets = [0, 0], sizes = [4, 16], strides = [1, 1]} : vector<4x48xf32> to vector<4x16xf32>
    %121 = arith.addf %119, %120 : vector<4x16xf32>
    %122 = arith.negf %121 : vector<4x16xf32>
    %123 = math.exp %122 : vector<4x16xf32>
    %cst_32 = arith.constant 1.000000e+00 : f32
    %124 = vector.broadcast %cst_32 : f32 to vector<4x16xf32>
    %125 = arith.addf %124, %123 : vector<4x16xf32>
    %126 = arith.divf %124, %125 : vector<4x16xf32>
    %127 = vector.extract_strided_slice %117 {offsets = [0, 16], sizes = [4, 16], strides = [1, 1]} : vector<4x48xf32> to vector<4x16xf32>
    %128 = vector.extract_strided_slice %118 {offsets = [0, 16], sizes = [4, 16], strides = [1, 1]} : vector<4x48xf32> to vector<4x16xf32>
    %129 = arith.addf %127, %128 : vector<4x16xf32>
    %130 = arith.negf %129 : vector<4x16xf32>
    %131 = math.exp %130 : vector<4x16xf32>
    %cst_33 = arith.constant 1.000000e+00 : f32
    %132 = vector.broadcast %cst_33 : f32 to vector<4x16xf32>
    %133 = arith.addf %132, %131 : vector<4x16xf32>
    %134 = arith.divf %132, %133 : vector<4x16xf32>
    %135 = vector.extract_strided_slice %117 {offsets = [0, 32], sizes = [4, 16], strides = [1, 1]} : vector<4x48xf32> to vector<4x16xf32>
    %136 = vector.extract_strided_slice %118 {offsets = [0, 32], sizes = [4, 16], strides = [1, 1]} : vector<4x48xf32> to vector<4x16xf32>
    %137 = vector.broadcast %21 : vector<1x16xf32> to vector<4x16xf32>
    %138 = arith.addf %136, %137 : vector<4x16xf32>
    %139 = arith.mulf %126, %138 : vector<4x16xf32>
    %140 = arith.addf %135, %139 : vector<4x16xf32>
    %141 = math.tanh %140 : vector<4x16xf32>
    %cst_34 = arith.constant 1.000000e+00 : f32
    %142 = vector.broadcast %cst_34 : f32 to vector<4x16xf32>
    %143 = arith.subf %142, %134 : vector<4x16xf32>
    %144 = arith.mulf %143, %141 : vector<4x16xf32>
    %145 = arith.mulf %134, %116 : vector<4x16xf32>
    %146 = arith.addf %144, %145 : vector<4x16xf32>
    %147 = vector.extract_strided_slice %25 {offsets = [16, 0], sizes = [4, 48], strides = [1, 1]} : vector<32x48xf32> to vector<4x48xf32>
    %cst_35 = arith.constant dense<0.000000e+00> : vector<4x48xf32>
    %148 = tpu.matmul %146, %17, %cst_35 {dimension_numbers = #tpu.dot_dimension_numbers<[1], [0], [0], [1], [0, 0, 1, 1], [], []>} : vector<4x16xf32>, vector<16x48xf32>, vector<4x48xf32> -> vector<4x48xf32>
    %149 = vector.extract_strided_slice %147 {offsets = [0, 0], sizes = [4, 16], strides = [1, 1]} : vector<4x48xf32> to vector<4x16xf32>
    %150 = vector.extract_strided_slice %148 {offsets = [0, 0], sizes = [4, 16], strides = [1, 1]} : vector<4x48xf32> to vector<4x16xf32>
    %151 = arith.addf %149, %150 : vector<4x16xf32>
    %152 = arith.negf %151 : vector<4x16xf32>
    %153 = math.exp %152 : vector<4x16xf32>
    %cst_36 = arith.constant 1.000000e+00 : f32
    %154 = vector.broadcast %cst_36 : f32 to vector<4x16xf32>
    %155 = arith.addf %154, %153 : vector<4x16xf32>
    %156 = arith.divf %154, %155 : vector<4x16xf32>
    %157 = vector.extract_strided_slice %147 {offsets = [0, 16], sizes = [4, 16], strides = [1, 1]} : vector<4x48xf32> to vector<4x16xf32>
    %158 = vector.extract_strided_slice %148 {offsets = [0, 16], sizes = [4, 16], strides = [1, 1]} : vector<4x48xf32> to vector<4x16xf32>
    %159 = arith.addf %157, %158 : vector<4x16xf32>
    %160 = arith.negf %159 : vector<4x16xf32>
    %161 = math.exp %160 : vector<4x16xf32>
    %cst_37 = arith.constant 1.000000e+00 : f32
    %162 = vector.broadcast %cst_37 : f32 to vector<4x16xf32>
    %163 = arith.addf %162, %161 : vector<4x16xf32>
    %164 = arith.divf %162, %163 : vector<4x16xf32>
    %165 = vector.extract_strided_slice %147 {offsets = [0, 32], sizes = [4, 16], strides = [1, 1]} : vector<4x48xf32> to vector<4x16xf32>
    %166 = vector.extract_strided_slice %148 {offsets = [0, 32], sizes = [4, 16], strides = [1, 1]} : vector<4x48xf32> to vector<4x16xf32>
    %167 = vector.broadcast %21 : vector<1x16xf32> to vector<4x16xf32>
    %168 = arith.addf %166, %167 : vector<4x16xf32>
    %169 = arith.mulf %156, %168 : vector<4x16xf32>
    %170 = arith.addf %165, %169 : vector<4x16xf32>
    %171 = math.tanh %170 : vector<4x16xf32>
    %cst_38 = arith.constant 1.000000e+00 : f32
    %172 = vector.broadcast %cst_38 : f32 to vector<4x16xf32>
    %173 = arith.subf %172, %164 : vector<4x16xf32>
    %174 = arith.mulf %173, %171 : vector<4x16xf32>
    %175 = arith.mulf %164, %146 : vector<4x16xf32>
    %176 = arith.addf %174, %175 : vector<4x16xf32>
    %177 = vector.extract_strided_slice %25 {offsets = [20, 0], sizes = [4, 48], strides = [1, 1]} : vector<32x48xf32> to vector<4x48xf32>
    %cst_39 = arith.constant dense<0.000000e+00> : vector<4x48xf32>
    %178 = tpu.matmul %176, %17, %cst_39 {dimension_numbers = #tpu.dot_dimension_numbers<[1], [0], [0], [1], [0, 0, 1, 1], [], []>} : vector<4x16xf32>, vector<16x48xf32>, vector<4x48xf32> -> vector<4x48xf32>
    %179 = vector.extract_strided_slice %177 {offsets = [0, 0], sizes = [4, 16], strides = [1, 1]} : vector<4x48xf32> to vector<4x16xf32>
    %180 = vector.extract_strided_slice %178 {offsets = [0, 0], sizes = [4, 16], strides = [1, 1]} : vector<4x48xf32> to vector<4x16xf32>
    %181 = arith.addf %179, %180 : vector<4x16xf32>
    %182 = arith.negf %181 : vector<4x16xf32>
    %183 = math.exp %182 : vector<4x16xf32>
    %cst_40 = arith.constant 1.000000e+00 : f32
    %184 = vector.broadcast %cst_40 : f32 to vector<4x16xf32>
    %185 = arith.addf %184, %183 : vector<4x16xf32>
    %186 = arith.divf %184, %185 : vector<4x16xf32>
    %187 = vector.extract_strided_slice %177 {offsets = [0, 16], sizes = [4, 16], strides = [1, 1]} : vector<4x48xf32> to vector<4x16xf32>
    %188 = vector.extract_strided_slice %178 {offsets = [0, 16], sizes = [4, 16], strides = [1, 1]} : vector<4x48xf32> to vector<4x16xf32>
    %189 = arith.addf %187, %188 : vector<4x16xf32>
    %190 = arith.negf %189 : vector<4x16xf32>
    %191 = math.exp %190 : vector<4x16xf32>
    %cst_41 = arith.constant 1.000000e+00 : f32
    %192 = vector.broadcast %cst_41 : f32 to vector<4x16xf32>
    %193 = arith.addf %192, %191 : vector<4x16xf32>
    %194 = arith.divf %192, %193 : vector<4x16xf32>
    %195 = vector.extract_strided_slice %177 {offsets = [0, 32], sizes = [4, 16], strides = [1, 1]} : vector<4x48xf32> to vector<4x16xf32>
    %196 = vector.extract_strided_slice %178 {offsets = [0, 32], sizes = [4, 16], strides = [1, 1]} : vector<4x48xf32> to vector<4x16xf32>
    %197 = vector.broadcast %21 : vector<1x16xf32> to vector<4x16xf32>
    %198 = arith.addf %196, %197 : vector<4x16xf32>
    %199 = arith.mulf %186, %198 : vector<4x16xf32>
    %200 = arith.addf %195, %199 : vector<4x16xf32>
    %201 = math.tanh %200 : vector<4x16xf32>
    %cst_42 = arith.constant 1.000000e+00 : f32
    %202 = vector.broadcast %cst_42 : f32 to vector<4x16xf32>
    %203 = arith.subf %202, %194 : vector<4x16xf32>
    %204 = arith.mulf %203, %201 : vector<4x16xf32>
    %205 = arith.mulf %194, %176 : vector<4x16xf32>
    %206 = arith.addf %204, %205 : vector<4x16xf32>
    %207 = vector.extract_strided_slice %25 {offsets = [24, 0], sizes = [4, 48], strides = [1, 1]} : vector<32x48xf32> to vector<4x48xf32>
    %cst_43 = arith.constant dense<0.000000e+00> : vector<4x48xf32>
    %208 = tpu.matmul %206, %17, %cst_43 {dimension_numbers = #tpu.dot_dimension_numbers<[1], [0], [0], [1], [0, 0, 1, 1], [], []>} : vector<4x16xf32>, vector<16x48xf32>, vector<4x48xf32> -> vector<4x48xf32>
    %209 = vector.extract_strided_slice %207 {offsets = [0, 0], sizes = [4, 16], strides = [1, 1]} : vector<4x48xf32> to vector<4x16xf32>
    %210 = vector.extract_strided_slice %208 {offsets = [0, 0], sizes = [4, 16], strides = [1, 1]} : vector<4x48xf32> to vector<4x16xf32>
    %211 = arith.addf %209, %210 : vector<4x16xf32>
    %212 = arith.negf %211 : vector<4x16xf32>
    %213 = math.exp %212 : vector<4x16xf32>
    %cst_44 = arith.constant 1.000000e+00 : f32
    %214 = vector.broadcast %cst_44 : f32 to vector<4x16xf32>
    %215 = arith.addf %214, %213 : vector<4x16xf32>
    %216 = arith.divf %214, %215 : vector<4x16xf32>
    %217 = vector.extract_strided_slice %207 {offsets = [0, 16], sizes = [4, 16], strides = [1, 1]} : vector<4x48xf32> to vector<4x16xf32>
    %218 = vector.extract_strided_slice %208 {offsets = [0, 16], sizes = [4, 16], strides = [1, 1]} : vector<4x48xf32> to vector<4x16xf32>
    %219 = arith.addf %217, %218 : vector<4x16xf32>
    %220 = arith.negf %219 : vector<4x16xf32>
    %221 = math.exp %220 : vector<4x16xf32>
    %cst_45 = arith.constant 1.000000e+00 : f32
    %222 = vector.broadcast %cst_45 : f32 to vector<4x16xf32>
    %223 = arith.addf %222, %221 : vector<4x16xf32>
    %224 = arith.divf %222, %223 : vector<4x16xf32>
    %225 = vector.extract_strided_slice %207 {offsets = [0, 32], sizes = [4, 16], strides = [1, 1]} : vector<4x48xf32> to vector<4x16xf32>
    %226 = vector.extract_strided_slice %208 {offsets = [0, 32], sizes = [4, 16], strides = [1, 1]} : vector<4x48xf32> to vector<4x16xf32>
    %227 = vector.broadcast %21 : vector<1x16xf32> to vector<4x16xf32>
    %228 = arith.addf %226, %227 : vector<4x16xf32>
    %229 = arith.mulf %216, %228 : vector<4x16xf32>
    %230 = arith.addf %225, %229 : vector<4x16xf32>
    %231 = math.tanh %230 : vector<4x16xf32>
    %cst_46 = arith.constant 1.000000e+00 : f32
    %232 = vector.broadcast %cst_46 : f32 to vector<4x16xf32>
    %233 = arith.subf %232, %224 : vector<4x16xf32>
    %234 = arith.mulf %233, %231 : vector<4x16xf32>
    %235 = arith.mulf %224, %206 : vector<4x16xf32>
    %236 = arith.addf %234, %235 : vector<4x16xf32>
    %237 = vector.extract_strided_slice %25 {offsets = [28, 0], sizes = [4, 48], strides = [1, 1]} : vector<32x48xf32> to vector<4x48xf32>
    %cst_47 = arith.constant dense<0.000000e+00> : vector<4x48xf32>
    %238 = tpu.matmul %236, %17, %cst_47 {dimension_numbers = #tpu.dot_dimension_numbers<[1], [0], [0], [1], [0, 0, 1, 1], [], []>} : vector<4x16xf32>, vector<16x48xf32>, vector<4x48xf32> -> vector<4x48xf32>
    %239 = vector.extract_strided_slice %237 {offsets = [0, 0], sizes = [4, 16], strides = [1, 1]} : vector<4x48xf32> to vector<4x16xf32>
    %240 = vector.extract_strided_slice %238 {offsets = [0, 0], sizes = [4, 16], strides = [1, 1]} : vector<4x48xf32> to vector<4x16xf32>
    %241 = arith.addf %239, %240 : vector<4x16xf32>
    %242 = arith.negf %241 : vector<4x16xf32>
    %243 = math.exp %242 : vector<4x16xf32>
    %cst_48 = arith.constant 1.000000e+00 : f32
    %244 = vector.broadcast %cst_48 : f32 to vector<4x16xf32>
    %245 = arith.addf %244, %243 : vector<4x16xf32>
    %246 = arith.divf %244, %245 : vector<4x16xf32>
    %247 = vector.extract_strided_slice %237 {offsets = [0, 16], sizes = [4, 16], strides = [1, 1]} : vector<4x48xf32> to vector<4x16xf32>
    %248 = vector.extract_strided_slice %238 {offsets = [0, 16], sizes = [4, 16], strides = [1, 1]} : vector<4x48xf32> to vector<4x16xf32>
    %249 = arith.addf %247, %248 : vector<4x16xf32>
    %250 = arith.negf %249 : vector<4x16xf32>
    %251 = math.exp %250 : vector<4x16xf32>
    %cst_49 = arith.constant 1.000000e+00 : f32
    %252 = vector.broadcast %cst_49 : f32 to vector<4x16xf32>
    %253 = arith.addf %252, %251 : vector<4x16xf32>
    %254 = arith.divf %252, %253 : vector<4x16xf32>
    %255 = vector.extract_strided_slice %237 {offsets = [0, 32], sizes = [4, 16], strides = [1, 1]} : vector<4x48xf32> to vector<4x16xf32>
    %256 = vector.extract_strided_slice %238 {offsets = [0, 32], sizes = [4, 16], strides = [1, 1]} : vector<4x48xf32> to vector<4x16xf32>
    %257 = vector.broadcast %21 : vector<1x16xf32> to vector<4x16xf32>
    %258 = arith.addf %256, %257 : vector<4x16xf32>
    %259 = arith.mulf %246, %258 : vector<4x16xf32>
    %260 = arith.addf %255, %259 : vector<4x16xf32>
    %261 = math.tanh %260 : vector<4x16xf32>
    %cst_50 = arith.constant 1.000000e+00 : f32
    %262 = vector.broadcast %cst_50 : f32 to vector<4x16xf32>
    %263 = arith.subf %262, %254 : vector<4x16xf32>
    %264 = arith.mulf %263, %261 : vector<4x16xf32>
    %265 = arith.mulf %254, %236 : vector<4x16xf32>
    %266 = arith.addf %264, %265 : vector<4x16xf32>
    %c1 = arith.constant 1 : index
    %c0_51 = arith.constant 0 : index
    %c0_52 = arith.constant 0 : index
    %267 = vector.load %arg3[%c1, %c0_51, %c0_52] : memref<4x16x48xf32, #tpu.memory_space<vmem>>, vector<1x16x48xf32>
    %268 = vector.shape_cast %267 : vector<1x16x48xf32> to vector<16x48xf32>
    %c1_53 = arith.constant 1 : index
    %c0_54 = arith.constant 0 : index
    %c0_55 = arith.constant 0 : index
    %269 = vector.load %arg4[%c1_53, %c0_54, %c0_55] : memref<4x16x48xf32, #tpu.memory_space<vmem>>, vector<1x16x48xf32>
    %270 = vector.shape_cast %269 : vector<1x16x48xf32> to vector<16x48xf32>
    %c1_56 = arith.constant 1 : index
    %c0_57 = arith.constant 0 : index
    %c0_58 = arith.constant 0 : index
    %271 = vector.load %arg5[%c1_56, %c0_57, %c0_58] : memref<4x1x48xf32, #tpu.memory_space<vmem>>, vector<1x1x48xf32>
    %272 = vector.shape_cast %271 : vector<1x1x48xf32> to vector<1x48xf32>
    %c1_59 = arith.constant 1 : index
    %c0_60 = arith.constant 0 : index
    %c0_61 = arith.constant 0 : index
    %273 = vector.load %arg6[%c1_59, %c0_60, %c0_61] : memref<4x1x16xf32, #tpu.memory_space<vmem>>, vector<1x1x16xf32>
    %274 = vector.shape_cast %273 : vector<1x1x16xf32> to vector<1x16xf32>
    %275 = tpu.concatenate %56, %86, %116, %146, %176, %206, %236, %266 in 0 : vector<4x16xf32>, vector<4x16xf32>, vector<4x16xf32>, vector<4x16xf32>, vector<4x16xf32>, vector<4x16xf32>, vector<4x16xf32>, vector<4x16xf32> -> vector<32x16xf32>
    %cst_62 = arith.constant dense<0.000000e+00> : vector<32x48xf32>
    %276 = tpu.matmul %275, %268, %cst_62 {dimension_numbers = #tpu.dot_dimension_numbers<[1], [0], [0], [1], [0, 0, 1, 1], [], []>} : vector<32x16xf32>, vector<16x48xf32>, vector<32x48xf32> -> vector<32x48xf32>
    %277 = vector.broadcast %272 : vector<1x48xf32> to vector<32x48xf32>
    %278 = arith.addf %276, %277 : vector<32x48xf32>
    %cst_63 = arith.constant 0.000000e+00 : f32
    %279 = vector.broadcast %cst_63 : f32 to vector<4x16xf32>
    %280 = vector.extract_strided_slice %278 {offsets = [0, 0], sizes = [4, 48], strides = [1, 1]} : vector<32x48xf32> to vector<4x48xf32>
    %cst_64 = arith.constant dense<0.000000e+00> : vector<4x48xf32>
    %281 = tpu.matmul %279, %270, %cst_64 {dimension_numbers = #tpu.dot_dimension_numbers<[1], [0], [0], [1], [0, 0, 1, 1], [], []>} : vector<4x16xf32>, vector<16x48xf32>, vector<4x48xf32> -> vector<4x48xf32>
    %282 = vector.extract_strided_slice %280 {offsets = [0, 0], sizes = [4, 16], strides = [1, 1]} : vector<4x48xf32> to vector<4x16xf32>
    %283 = vector.extract_strided_slice %281 {offsets = [0, 0], sizes = [4, 16], strides = [1, 1]} : vector<4x48xf32> to vector<4x16xf32>
    %284 = arith.addf %282, %283 : vector<4x16xf32>
    %285 = arith.negf %284 : vector<4x16xf32>
    %286 = math.exp %285 : vector<4x16xf32>
    %cst_65 = arith.constant 1.000000e+00 : f32
    %287 = vector.broadcast %cst_65 : f32 to vector<4x16xf32>
    %288 = arith.addf %287, %286 : vector<4x16xf32>
    %289 = arith.divf %287, %288 : vector<4x16xf32>
    %290 = vector.extract_strided_slice %280 {offsets = [0, 16], sizes = [4, 16], strides = [1, 1]} : vector<4x48xf32> to vector<4x16xf32>
    %291 = vector.extract_strided_slice %281 {offsets = [0, 16], sizes = [4, 16], strides = [1, 1]} : vector<4x48xf32> to vector<4x16xf32>
    %292 = arith.addf %290, %291 : vector<4x16xf32>
    %293 = arith.negf %292 : vector<4x16xf32>
    %294 = math.exp %293 : vector<4x16xf32>
    %cst_66 = arith.constant 1.000000e+00 : f32
    %295 = vector.broadcast %cst_66 : f32 to vector<4x16xf32>
    %296 = arith.addf %295, %294 : vector<4x16xf32>
    %297 = arith.divf %295, %296 : vector<4x16xf32>
    %298 = vector.extract_strided_slice %280 {offsets = [0, 32], sizes = [4, 16], strides = [1, 1]} : vector<4x48xf32> to vector<4x16xf32>
    %299 = vector.extract_strided_slice %281 {offsets = [0, 32], sizes = [4, 16], strides = [1, 1]} : vector<4x48xf32> to vector<4x16xf32>
    %300 = vector.broadcast %274 : vector<1x16xf32> to vector<4x16xf32>
    %301 = arith.addf %299, %300 : vector<4x16xf32>
    %302 = arith.mulf %289, %301 : vector<4x16xf32>
    %303 = arith.addf %298, %302 : vector<4x16xf32>
    %304 = math.tanh %303 : vector<4x16xf32>
    %cst_67 = arith.constant 1.000000e+00 : f32
    %305 = vector.broadcast %cst_67 : f32 to vector<4x16xf32>
    %306 = arith.subf %305, %297 : vector<4x16xf32>
    %307 = arith.mulf %306, %304 : vector<4x16xf32>
    %308 = arith.mulf %297, %279 : vector<4x16xf32>
    %309 = arith.addf %307, %308 : vector<4x16xf32>
    %310 = vector.extract_strided_slice %278 {offsets = [4, 0], sizes = [4, 48], strides = [1, 1]} : vector<32x48xf32> to vector<4x48xf32>
    %cst_68 = arith.constant dense<0.000000e+00> : vector<4x48xf32>
    %311 = tpu.matmul %309, %270, %cst_68 {dimension_numbers = #tpu.dot_dimension_numbers<[1], [0], [0], [1], [0, 0, 1, 1], [], []>} : vector<4x16xf32>, vector<16x48xf32>, vector<4x48xf32> -> vector<4x48xf32>
    %312 = vector.extract_strided_slice %310 {offsets = [0, 0], sizes = [4, 16], strides = [1, 1]} : vector<4x48xf32> to vector<4x16xf32>
    %313 = vector.extract_strided_slice %311 {offsets = [0, 0], sizes = [4, 16], strides = [1, 1]} : vector<4x48xf32> to vector<4x16xf32>
    %314 = arith.addf %312, %313 : vector<4x16xf32>
    %315 = arith.negf %314 : vector<4x16xf32>
    %316 = math.exp %315 : vector<4x16xf32>
    %cst_69 = arith.constant 1.000000e+00 : f32
    %317 = vector.broadcast %cst_69 : f32 to vector<4x16xf32>
    %318 = arith.addf %317, %316 : vector<4x16xf32>
    %319 = arith.divf %317, %318 : vector<4x16xf32>
    %320 = vector.extract_strided_slice %310 {offsets = [0, 16], sizes = [4, 16], strides = [1, 1]} : vector<4x48xf32> to vector<4x16xf32>
    %321 = vector.extract_strided_slice %311 {offsets = [0, 16], sizes = [4, 16], strides = [1, 1]} : vector<4x48xf32> to vector<4x16xf32>
    %322 = arith.addf %320, %321 : vector<4x16xf32>
    %323 = arith.negf %322 : vector<4x16xf32>
    %324 = math.exp %323 : vector<4x16xf32>
    %cst_70 = arith.constant 1.000000e+00 : f32
    %325 = vector.broadcast %cst_70 : f32 to vector<4x16xf32>
    %326 = arith.addf %325, %324 : vector<4x16xf32>
    %327 = arith.divf %325, %326 : vector<4x16xf32>
    %328 = vector.extract_strided_slice %310 {offsets = [0, 32], sizes = [4, 16], strides = [1, 1]} : vector<4x48xf32> to vector<4x16xf32>
    %329 = vector.extract_strided_slice %311 {offsets = [0, 32], sizes = [4, 16], strides = [1, 1]} : vector<4x48xf32> to vector<4x16xf32>
    %330 = vector.broadcast %274 : vector<1x16xf32> to vector<4x16xf32>
    %331 = arith.addf %329, %330 : vector<4x16xf32>
    %332 = arith.mulf %319, %331 : vector<4x16xf32>
    %333 = arith.addf %328, %332 : vector<4x16xf32>
    %334 = math.tanh %333 : vector<4x16xf32>
    %cst_71 = arith.constant 1.000000e+00 : f32
    %335 = vector.broadcast %cst_71 : f32 to vector<4x16xf32>
    %336 = arith.subf %335, %327 : vector<4x16xf32>
    %337 = arith.mulf %336, %334 : vector<4x16xf32>
    %338 = arith.mulf %327, %309 : vector<4x16xf32>
    %339 = arith.addf %337, %338 : vector<4x16xf32>
    %340 = vector.extract_strided_slice %278 {offsets = [8, 0], sizes = [4, 48], strides = [1, 1]} : vector<32x48xf32> to vector<4x48xf32>
    %cst_72 = arith.constant dense<0.000000e+00> : vector<4x48xf32>
    %341 = tpu.matmul %339, %270, %cst_72 {dimension_numbers = #tpu.dot_dimension_numbers<[1], [0], [0], [1], [0, 0, 1, 1], [], []>} : vector<4x16xf32>, vector<16x48xf32>, vector<4x48xf32> -> vector<4x48xf32>
    %342 = vector.extract_strided_slice %340 {offsets = [0, 0], sizes = [4, 16], strides = [1, 1]} : vector<4x48xf32> to vector<4x16xf32>
    %343 = vector.extract_strided_slice %341 {offsets = [0, 0], sizes = [4, 16], strides = [1, 1]} : vector<4x48xf32> to vector<4x16xf32>
    %344 = arith.addf %342, %343 : vector<4x16xf32>
    %345 = arith.negf %344 : vector<4x16xf32>
    %346 = math.exp %345 : vector<4x16xf32>
    %cst_73 = arith.constant 1.000000e+00 : f32
    %347 = vector.broadcast %cst_73 : f32 to vector<4x16xf32>
    %348 = arith.addf %347, %346 : vector<4x16xf32>
    %349 = arith.divf %347, %348 : vector<4x16xf32>
    %350 = vector.extract_strided_slice %340 {offsets = [0, 16], sizes = [4, 16], strides = [1, 1]} : vector<4x48xf32> to vector<4x16xf32>
    %351 = vector.extract_strided_slice %341 {offsets = [0, 16], sizes = [4, 16], strides = [1, 1]} : vector<4x48xf32> to vector<4x16xf32>
    %352 = arith.addf %350, %351 : vector<4x16xf32>
    %353 = arith.negf %352 : vector<4x16xf32>
    %354 = math.exp %353 : vector<4x16xf32>
    %cst_74 = arith.constant 1.000000e+00 : f32
    %355 = vector.broadcast %cst_74 : f32 to vector<4x16xf32>
    %356 = arith.addf %355, %354 : vector<4x16xf32>
    %357 = arith.divf %355, %356 : vector<4x16xf32>
    %358 = vector.extract_strided_slice %340 {offsets = [0, 32], sizes = [4, 16], strides = [1, 1]} : vector<4x48xf32> to vector<4x16xf32>
    %359 = vector.extract_strided_slice %341 {offsets = [0, 32], sizes = [4, 16], strides = [1, 1]} : vector<4x48xf32> to vector<4x16xf32>
    %360 = vector.broadcast %274 : vector<1x16xf32> to vector<4x16xf32>
    %361 = arith.addf %359, %360 : vector<4x16xf32>
    %362 = arith.mulf %349, %361 : vector<4x16xf32>
    %363 = arith.addf %358, %362 : vector<4x16xf32>
    %364 = math.tanh %363 : vector<4x16xf32>
    %cst_75 = arith.constant 1.000000e+00 : f32
    %365 = vector.broadcast %cst_75 : f32 to vector<4x16xf32>
    %366 = arith.subf %365, %357 : vector<4x16xf32>
    %367 = arith.mulf %366, %364 : vector<4x16xf32>
    %368 = arith.mulf %357, %339 : vector<4x16xf32>
    %369 = arith.addf %367, %368 : vector<4x16xf32>
    %370 = vector.extract_strided_slice %278 {offsets = [12, 0], sizes = [4, 48], strides = [1, 1]} : vector<32x48xf32> to vector<4x48xf32>
    %cst_76 = arith.constant dense<0.000000e+00> : vector<4x48xf32>
    %371 = tpu.matmul %369, %270, %cst_76 {dimension_numbers = #tpu.dot_dimension_numbers<[1], [0], [0], [1], [0, 0, 1, 1], [], []>} : vector<4x16xf32>, vector<16x48xf32>, vector<4x48xf32> -> vector<4x48xf32>
    %372 = vector.extract_strided_slice %370 {offsets = [0, 0], sizes = [4, 16], strides = [1, 1]} : vector<4x48xf32> to vector<4x16xf32>
    %373 = vector.extract_strided_slice %371 {offsets = [0, 0], sizes = [4, 16], strides = [1, 1]} : vector<4x48xf32> to vector<4x16xf32>
    %374 = arith.addf %372, %373 : vector<4x16xf32>
    %375 = arith.negf %374 : vector<4x16xf32>
    %376 = math.exp %375 : vector<4x16xf32>
    %cst_77 = arith.constant 1.000000e+00 : f32
    %377 = vector.broadcast %cst_77 : f32 to vector<4x16xf32>
    %378 = arith.addf %377, %376 : vector<4x16xf32>
    %379 = arith.divf %377, %378 : vector<4x16xf32>
    %380 = vector.extract_strided_slice %370 {offsets = [0, 16], sizes = [4, 16], strides = [1, 1]} : vector<4x48xf32> to vector<4x16xf32>
    %381 = vector.extract_strided_slice %371 {offsets = [0, 16], sizes = [4, 16], strides = [1, 1]} : vector<4x48xf32> to vector<4x16xf32>
    %382 = arith.addf %380, %381 : vector<4x16xf32>
    %383 = arith.negf %382 : vector<4x16xf32>
    %384 = math.exp %383 : vector<4x16xf32>
    %cst_78 = arith.constant 1.000000e+00 : f32
    %385 = vector.broadcast %cst_78 : f32 to vector<4x16xf32>
    %386 = arith.addf %385, %384 : vector<4x16xf32>
    %387 = arith.divf %385, %386 : vector<4x16xf32>
    %388 = vector.extract_strided_slice %370 {offsets = [0, 32], sizes = [4, 16], strides = [1, 1]} : vector<4x48xf32> to vector<4x16xf32>
    %389 = vector.extract_strided_slice %371 {offsets = [0, 32], sizes = [4, 16], strides = [1, 1]} : vector<4x48xf32> to vector<4x16xf32>
    %390 = vector.broadcast %274 : vector<1x16xf32> to vector<4x16xf32>
    %391 = arith.addf %389, %390 : vector<4x16xf32>
    %392 = arith.mulf %379, %391 : vector<4x16xf32>
    %393 = arith.addf %388, %392 : vector<4x16xf32>
    %394 = math.tanh %393 : vector<4x16xf32>
    %cst_79 = arith.constant 1.000000e+00 : f32
    %395 = vector.broadcast %cst_79 : f32 to vector<4x16xf32>
    %396 = arith.subf %395, %387 : vector<4x16xf32>
    %397 = arith.mulf %396, %394 : vector<4x16xf32>
    %398 = arith.mulf %387, %369 : vector<4x16xf32>
    %399 = arith.addf %397, %398 : vector<4x16xf32>
    %400 = vector.extract_strided_slice %278 {offsets = [16, 0], sizes = [4, 48], strides = [1, 1]} : vector<32x48xf32> to vector<4x48xf32>
    %cst_80 = arith.constant dense<0.000000e+00> : vector<4x48xf32>
    %401 = tpu.matmul %399, %270, %cst_80 {dimension_numbers = #tpu.dot_dimension_numbers<[1], [0], [0], [1], [0, 0, 1, 1], [], []>} : vector<4x16xf32>, vector<16x48xf32>, vector<4x48xf32> -> vector<4x48xf32>
    %402 = vector.extract_strided_slice %400 {offsets = [0, 0], sizes = [4, 16], strides = [1, 1]} : vector<4x48xf32> to vector<4x16xf32>
    %403 = vector.extract_strided_slice %401 {offsets = [0, 0], sizes = [4, 16], strides = [1, 1]} : vector<4x48xf32> to vector<4x16xf32>
    %404 = arith.addf %402, %403 : vector<4x16xf32>
    %405 = arith.negf %404 : vector<4x16xf32>
    %406 = math.exp %405 : vector<4x16xf32>
    %cst_81 = arith.constant 1.000000e+00 : f32
    %407 = vector.broadcast %cst_81 : f32 to vector<4x16xf32>
    %408 = arith.addf %407, %406 : vector<4x16xf32>
    %409 = arith.divf %407, %408 : vector<4x16xf32>
    %410 = vector.extract_strided_slice %400 {offsets = [0, 16], sizes = [4, 16], strides = [1, 1]} : vector<4x48xf32> to vector<4x16xf32>
    %411 = vector.extract_strided_slice %401 {offsets = [0, 16], sizes = [4, 16], strides = [1, 1]} : vector<4x48xf32> to vector<4x16xf32>
    %412 = arith.addf %410, %411 : vector<4x16xf32>
    %413 = arith.negf %412 : vector<4x16xf32>
    %414 = math.exp %413 : vector<4x16xf32>
    %cst_82 = arith.constant 1.000000e+00 : f32
    %415 = vector.broadcast %cst_82 : f32 to vector<4x16xf32>
    %416 = arith.addf %415, %414 : vector<4x16xf32>
    %417 = arith.divf %415, %416 : vector<4x16xf32>
    %418 = vector.extract_strided_slice %400 {offsets = [0, 32], sizes = [4, 16], strides = [1, 1]} : vector<4x48xf32> to vector<4x16xf32>
    %419 = vector.extract_strided_slice %401 {offsets = [0, 32], sizes = [4, 16], strides = [1, 1]} : vector<4x48xf32> to vector<4x16xf32>
    %420 = vector.broadcast %274 : vector<1x16xf32> to vector<4x16xf32>
    %421 = arith.addf %419, %420 : vector<4x16xf32>
    %422 = arith.mulf %409, %421 : vector<4x16xf32>
    %423 = arith.addf %418, %422 : vector<4x16xf32>
    %424 = math.tanh %423 : vector<4x16xf32>
    %cst_83 = arith.constant 1.000000e+00 : f32
    %425 = vector.broadcast %cst_83 : f32 to vector<4x16xf32>
    %426 = arith.subf %425, %417 : vector<4x16xf32>
    %427 = arith.mulf %426, %424 : vector<4x16xf32>
    %428 = arith.mulf %417, %399 : vector<4x16xf32>
    %429 = arith.addf %427, %428 : vector<4x16xf32>
    %430 = vector.extract_strided_slice %278 {offsets = [20, 0], sizes = [4, 48], strides = [1, 1]} : vector<32x48xf32> to vector<4x48xf32>
    %cst_84 = arith.constant dense<0.000000e+00> : vector<4x48xf32>
    %431 = tpu.matmul %429, %270, %cst_84 {dimension_numbers = #tpu.dot_dimension_numbers<[1], [0], [0], [1], [0, 0, 1, 1], [], []>} : vector<4x16xf32>, vector<16x48xf32>, vector<4x48xf32> -> vector<4x48xf32>
    %432 = vector.extract_strided_slice %430 {offsets = [0, 0], sizes = [4, 16], strides = [1, 1]} : vector<4x48xf32> to vector<4x16xf32>
    %433 = vector.extract_strided_slice %431 {offsets = [0, 0], sizes = [4, 16], strides = [1, 1]} : vector<4x48xf32> to vector<4x16xf32>
    %434 = arith.addf %432, %433 : vector<4x16xf32>
    %435 = arith.negf %434 : vector<4x16xf32>
    %436 = math.exp %435 : vector<4x16xf32>
    %cst_85 = arith.constant 1.000000e+00 : f32
    %437 = vector.broadcast %cst_85 : f32 to vector<4x16xf32>
    %438 = arith.addf %437, %436 : vector<4x16xf32>
    %439 = arith.divf %437, %438 : vector<4x16xf32>
    %440 = vector.extract_strided_slice %430 {offsets = [0, 16], sizes = [4, 16], strides = [1, 1]} : vector<4x48xf32> to vector<4x16xf32>
    %441 = vector.extract_strided_slice %431 {offsets = [0, 16], sizes = [4, 16], strides = [1, 1]} : vector<4x48xf32> to vector<4x16xf32>
    %442 = arith.addf %440, %441 : vector<4x16xf32>
    %443 = arith.negf %442 : vector<4x16xf32>
    %444 = math.exp %443 : vector<4x16xf32>
    %cst_86 = arith.constant 1.000000e+00 : f32
    %445 = vector.broadcast %cst_86 : f32 to vector<4x16xf32>
    %446 = arith.addf %445, %444 : vector<4x16xf32>
    %447 = arith.divf %445, %446 : vector<4x16xf32>
    %448 = vector.extract_strided_slice %430 {offsets = [0, 32], sizes = [4, 16], strides = [1, 1]} : vector<4x48xf32> to vector<4x16xf32>
    %449 = vector.extract_strided_slice %431 {offsets = [0, 32], sizes = [4, 16], strides = [1, 1]} : vector<4x48xf32> to vector<4x16xf32>
    %450 = vector.broadcast %274 : vector<1x16xf32> to vector<4x16xf32>
    %451 = arith.addf %449, %450 : vector<4x16xf32>
    %452 = arith.mulf %439, %451 : vector<4x16xf32>
    %453 = arith.addf %448, %452 : vector<4x16xf32>
    %454 = math.tanh %453 : vector<4x16xf32>
    %cst_87 = arith.constant 1.000000e+00 : f32
    %455 = vector.broadcast %cst_87 : f32 to vector<4x16xf32>
    %456 = arith.subf %455, %447 : vector<4x16xf32>
    %457 = arith.mulf %456, %454 : vector<4x16xf32>
    %458 = arith.mulf %447, %429 : vector<4x16xf32>
    %459 = arith.addf %457, %458 : vector<4x16xf32>
    %460 = vector.extract_strided_slice %278 {offsets = [24, 0], sizes = [4, 48], strides = [1, 1]} : vector<32x48xf32> to vector<4x48xf32>
    %cst_88 = arith.constant dense<0.000000e+00> : vector<4x48xf32>
    %461 = tpu.matmul %459, %270, %cst_88 {dimension_numbers = #tpu.dot_dimension_numbers<[1], [0], [0], [1], [0, 0, 1, 1], [], []>} : vector<4x16xf32>, vector<16x48xf32>, vector<4x48xf32> -> vector<4x48xf32>
    %462 = vector.extract_strided_slice %460 {offsets = [0, 0], sizes = [4, 16], strides = [1, 1]} : vector<4x48xf32> to vector<4x16xf32>
    %463 = vector.extract_strided_slice %461 {offsets = [0, 0], sizes = [4, 16], strides = [1, 1]} : vector<4x48xf32> to vector<4x16xf32>
    %464 = arith.addf %462, %463 : vector<4x16xf32>
    %465 = arith.negf %464 : vector<4x16xf32>
    %466 = math.exp %465 : vector<4x16xf32>
    %cst_89 = arith.constant 1.000000e+00 : f32
    %467 = vector.broadcast %cst_89 : f32 to vector<4x16xf32>
    %468 = arith.addf %467, %466 : vector<4x16xf32>
    %469 = arith.divf %467, %468 : vector<4x16xf32>
    %470 = vector.extract_strided_slice %460 {offsets = [0, 16], sizes = [4, 16], strides = [1, 1]} : vector<4x48xf32> to vector<4x16xf32>
    %471 = vector.extract_strided_slice %461 {offsets = [0, 16], sizes = [4, 16], strides = [1, 1]} : vector<4x48xf32> to vector<4x16xf32>
    %472 = arith.addf %470, %471 : vector<4x16xf32>
    %473 = arith.negf %472 : vector<4x16xf32>
    %474 = math.exp %473 : vector<4x16xf32>
    %cst_90 = arith.constant 1.000000e+00 : f32
    %475 = vector.broadcast %cst_90 : f32 to vector<4x16xf32>
    %476 = arith.addf %475, %474 : vector<4x16xf32>
    %477 = arith.divf %475, %476 : vector<4x16xf32>
    %478 = vector.extract_strided_slice %460 {offsets = [0, 32], sizes = [4, 16], strides = [1, 1]} : vector<4x48xf32> to vector<4x16xf32>
    %479 = vector.extract_strided_slice %461 {offsets = [0, 32], sizes = [4, 16], strides = [1, 1]} : vector<4x48xf32> to vector<4x16xf32>
    %480 = vector.broadcast %274 : vector<1x16xf32> to vector<4x16xf32>
    %481 = arith.addf %479, %480 : vector<4x16xf32>
    %482 = arith.mulf %469, %481 : vector<4x16xf32>
    %483 = arith.addf %478, %482 : vector<4x16xf32>
    %484 = math.tanh %483 : vector<4x16xf32>
    %cst_91 = arith.constant 1.000000e+00 : f32
    %485 = vector.broadcast %cst_91 : f32 to vector<4x16xf32>
    %486 = arith.subf %485, %477 : vector<4x16xf32>
    %487 = arith.mulf %486, %484 : vector<4x16xf32>
    %488 = arith.mulf %477, %459 : vector<4x16xf32>
    %489 = arith.addf %487, %488 : vector<4x16xf32>
    %490 = vector.extract_strided_slice %278 {offsets = [28, 0], sizes = [4, 48], strides = [1, 1]} : vector<32x48xf32> to vector<4x48xf32>
    %cst_92 = arith.constant dense<0.000000e+00> : vector<4x48xf32>
    %491 = tpu.matmul %489, %270, %cst_92 {dimension_numbers = #tpu.dot_dimension_numbers<[1], [0], [0], [1], [0, 0, 1, 1], [], []>} : vector<4x16xf32>, vector<16x48xf32>, vector<4x48xf32> -> vector<4x48xf32>
    %492 = vector.extract_strided_slice %490 {offsets = [0, 0], sizes = [4, 16], strides = [1, 1]} : vector<4x48xf32> to vector<4x16xf32>
    %493 = vector.extract_strided_slice %491 {offsets = [0, 0], sizes = [4, 16], strides = [1, 1]} : vector<4x48xf32> to vector<4x16xf32>
    %494 = arith.addf %492, %493 : vector<4x16xf32>
    %495 = arith.negf %494 : vector<4x16xf32>
    %496 = math.exp %495 : vector<4x16xf32>
    %cst_93 = arith.constant 1.000000e+00 : f32
    %497 = vector.broadcast %cst_93 : f32 to vector<4x16xf32>
    %498 = arith.addf %497, %496 : vector<4x16xf32>
    %499 = arith.divf %497, %498 : vector<4x16xf32>
    %500 = vector.extract_strided_slice %490 {offsets = [0, 16], sizes = [4, 16], strides = [1, 1]} : vector<4x48xf32> to vector<4x16xf32>
    %501 = vector.extract_strided_slice %491 {offsets = [0, 16], sizes = [4, 16], strides = [1, 1]} : vector<4x48xf32> to vector<4x16xf32>
    %502 = arith.addf %500, %501 : vector<4x16xf32>
    %503 = arith.negf %502 : vector<4x16xf32>
    %504 = math.exp %503 : vector<4x16xf32>
    %cst_94 = arith.constant 1.000000e+00 : f32
    %505 = vector.broadcast %cst_94 : f32 to vector<4x16xf32>
    %506 = arith.addf %505, %504 : vector<4x16xf32>
    %507 = arith.divf %505, %506 : vector<4x16xf32>
    %508 = vector.extract_strided_slice %490 {offsets = [0, 32], sizes = [4, 16], strides = [1, 1]} : vector<4x48xf32> to vector<4x16xf32>
    %509 = vector.extract_strided_slice %491 {offsets = [0, 32], sizes = [4, 16], strides = [1, 1]} : vector<4x48xf32> to vector<4x16xf32>
    %510 = vector.broadcast %274 : vector<1x16xf32> to vector<4x16xf32>
    %511 = arith.addf %509, %510 : vector<4x16xf32>
    %512 = arith.mulf %499, %511 : vector<4x16xf32>
    %513 = arith.addf %508, %512 : vector<4x16xf32>
    %514 = math.tanh %513 : vector<4x16xf32>
    %cst_95 = arith.constant 1.000000e+00 : f32
    %515 = vector.broadcast %cst_95 : f32 to vector<4x16xf32>
    %516 = arith.subf %515, %507 : vector<4x16xf32>
    %517 = arith.mulf %516, %514 : vector<4x16xf32>
    %518 = arith.mulf %507, %489 : vector<4x16xf32>
    %519 = arith.addf %517, %518 : vector<4x16xf32>
    %c2 = arith.constant 2 : index
    %c0_96 = arith.constant 0 : index
    %c0_97 = arith.constant 0 : index
    %520 = vector.load %arg3[%c2, %c0_96, %c0_97] : memref<4x16x48xf32, #tpu.memory_space<vmem>>, vector<1x16x48xf32>
    %521 = vector.shape_cast %520 : vector<1x16x48xf32> to vector<16x48xf32>
    %c2_98 = arith.constant 2 : index
    %c0_99 = arith.constant 0 : index
    %c0_100 = arith.constant 0 : index
    %522 = vector.load %arg4[%c2_98, %c0_99, %c0_100] : memref<4x16x48xf32, #tpu.memory_space<vmem>>, vector<1x16x48xf32>
    %523 = vector.shape_cast %522 : vector<1x16x48xf32> to vector<16x48xf32>
    %c2_101 = arith.constant 2 : index
    %c0_102 = arith.constant 0 : index
    %c0_103 = arith.constant 0 : index
    %524 = vector.load %arg5[%c2_101, %c0_102, %c0_103] : memref<4x1x48xf32, #tpu.memory_space<vmem>>, vector<1x1x48xf32>
    %525 = vector.shape_cast %524 : vector<1x1x48xf32> to vector<1x48xf32>
    %c2_104 = arith.constant 2 : index
    %c0_105 = arith.constant 0 : index
    %c0_106 = arith.constant 0 : index
    %526 = vector.load %arg6[%c2_104, %c0_105, %c0_106] : memref<4x1x16xf32, #tpu.memory_space<vmem>>, vector<1x1x16xf32>
    %527 = vector.shape_cast %526 : vector<1x1x16xf32> to vector<1x16xf32>
    %528 = tpu.concatenate %309, %339, %369, %399, %429, %459, %489, %519 in 0 : vector<4x16xf32>, vector<4x16xf32>, vector<4x16xf32>, vector<4x16xf32>, vector<4x16xf32>, vector<4x16xf32>, vector<4x16xf32>, vector<4x16xf32> -> vector<32x16xf32>
    %cst_107 = arith.constant dense<0.000000e+00> : vector<32x48xf32>
    %529 = tpu.matmul %528, %521, %cst_107 {dimension_numbers = #tpu.dot_dimension_numbers<[1], [0], [0], [1], [0, 0, 1, 1], [], []>} : vector<32x16xf32>, vector<16x48xf32>, vector<32x48xf32> -> vector<32x48xf32>
    %530 = vector.broadcast %525 : vector<1x48xf32> to vector<32x48xf32>
    %531 = arith.addf %529, %530 : vector<32x48xf32>
    %cst_108 = arith.constant 0.000000e+00 : f32
    %532 = vector.broadcast %cst_108 : f32 to vector<4x16xf32>
    %533 = vector.extract_strided_slice %531 {offsets = [0, 0], sizes = [4, 48], strides = [1, 1]} : vector<32x48xf32> to vector<4x48xf32>
    %cst_109 = arith.constant dense<0.000000e+00> : vector<4x48xf32>
    %534 = tpu.matmul %532, %523, %cst_109 {dimension_numbers = #tpu.dot_dimension_numbers<[1], [0], [0], [1], [0, 0, 1, 1], [], []>} : vector<4x16xf32>, vector<16x48xf32>, vector<4x48xf32> -> vector<4x48xf32>
    %535 = vector.extract_strided_slice %533 {offsets = [0, 0], sizes = [4, 16], strides = [1, 1]} : vector<4x48xf32> to vector<4x16xf32>
    %536 = vector.extract_strided_slice %534 {offsets = [0, 0], sizes = [4, 16], strides = [1, 1]} : vector<4x48xf32> to vector<4x16xf32>
    %537 = arith.addf %535, %536 : vector<4x16xf32>
    %538 = arith.negf %537 : vector<4x16xf32>
    %539 = math.exp %538 : vector<4x16xf32>
    %cst_110 = arith.constant 1.000000e+00 : f32
    %540 = vector.broadcast %cst_110 : f32 to vector<4x16xf32>
    %541 = arith.addf %540, %539 : vector<4x16xf32>
    %542 = arith.divf %540, %541 : vector<4x16xf32>
    %543 = vector.extract_strided_slice %533 {offsets = [0, 16], sizes = [4, 16], strides = [1, 1]} : vector<4x48xf32> to vector<4x16xf32>
    %544 = vector.extract_strided_slice %534 {offsets = [0, 16], sizes = [4, 16], strides = [1, 1]} : vector<4x48xf32> to vector<4x16xf32>
    %545 = arith.addf %543, %544 : vector<4x16xf32>
    %546 = arith.negf %545 : vector<4x16xf32>
    %547 = math.exp %546 : vector<4x16xf32>
    %cst_111 = arith.constant 1.000000e+00 : f32
    %548 = vector.broadcast %cst_111 : f32 to vector<4x16xf32>
    %549 = arith.addf %548, %547 : vector<4x16xf32>
    %550 = arith.divf %548, %549 : vector<4x16xf32>
    %551 = vector.extract_strided_slice %533 {offsets = [0, 32], sizes = [4, 16], strides = [1, 1]} : vector<4x48xf32> to vector<4x16xf32>
    %552 = vector.extract_strided_slice %534 {offsets = [0, 32], sizes = [4, 16], strides = [1, 1]} : vector<4x48xf32> to vector<4x16xf32>
    %553 = vector.broadcast %527 : vector<1x16xf32> to vector<4x16xf32>
    %554 = arith.addf %552, %553 : vector<4x16xf32>
    %555 = arith.mulf %542, %554 : vector<4x16xf32>
    %556 = arith.addf %551, %555 : vector<4x16xf32>
    %557 = math.tanh %556 : vector<4x16xf32>
    %cst_112 = arith.constant 1.000000e+00 : f32
    %558 = vector.broadcast %cst_112 : f32 to vector<4x16xf32>
    %559 = arith.subf %558, %550 : vector<4x16xf32>
    %560 = arith.mulf %559, %557 : vector<4x16xf32>
    %561 = arith.mulf %550, %532 : vector<4x16xf32>
    %562 = arith.addf %560, %561 : vector<4x16xf32>
    %563 = vector.extract_strided_slice %531 {offsets = [4, 0], sizes = [4, 48], strides = [1, 1]} : vector<32x48xf32> to vector<4x48xf32>
    %cst_113 = arith.constant dense<0.000000e+00> : vector<4x48xf32>
    %564 = tpu.matmul %562, %523, %cst_113 {dimension_numbers = #tpu.dot_dimension_numbers<[1], [0], [0], [1], [0, 0, 1, 1], [], []>} : vector<4x16xf32>, vector<16x48xf32>, vector<4x48xf32> -> vector<4x48xf32>
    %565 = vector.extract_strided_slice %563 {offsets = [0, 0], sizes = [4, 16], strides = [1, 1]} : vector<4x48xf32> to vector<4x16xf32>
    %566 = vector.extract_strided_slice %564 {offsets = [0, 0], sizes = [4, 16], strides = [1, 1]} : vector<4x48xf32> to vector<4x16xf32>
    %567 = arith.addf %565, %566 : vector<4x16xf32>
    %568 = arith.negf %567 : vector<4x16xf32>
    %569 = math.exp %568 : vector<4x16xf32>
    %cst_114 = arith.constant 1.000000e+00 : f32
    %570 = vector.broadcast %cst_114 : f32 to vector<4x16xf32>
    %571 = arith.addf %570, %569 : vector<4x16xf32>
    %572 = arith.divf %570, %571 : vector<4x16xf32>
    %573 = vector.extract_strided_slice %563 {offsets = [0, 16], sizes = [4, 16], strides = [1, 1]} : vector<4x48xf32> to vector<4x16xf32>
    %574 = vector.extract_strided_slice %564 {offsets = [0, 16], sizes = [4, 16], strides = [1, 1]} : vector<4x48xf32> to vector<4x16xf32>
    %575 = arith.addf %573, %574 : vector<4x16xf32>
    %576 = arith.negf %575 : vector<4x16xf32>
    %577 = math.exp %576 : vector<4x16xf32>
    %cst_115 = arith.constant 1.000000e+00 : f32
    %578 = vector.broadcast %cst_115 : f32 to vector<4x16xf32>
    %579 = arith.addf %578, %577 : vector<4x16xf32>
    %580 = arith.divf %578, %579 : vector<4x16xf32>
    %581 = vector.extract_strided_slice %563 {offsets = [0, 32], sizes = [4, 16], strides = [1, 1]} : vector<4x48xf32> to vector<4x16xf32>
    %582 = vector.extract_strided_slice %564 {offsets = [0, 32], sizes = [4, 16], strides = [1, 1]} : vector<4x48xf32> to vector<4x16xf32>
    %583 = vector.broadcast %527 : vector<1x16xf32> to vector<4x16xf32>
    %584 = arith.addf %582, %583 : vector<4x16xf32>
    %585 = arith.mulf %572, %584 : vector<4x16xf32>
    %586 = arith.addf %581, %585 : vector<4x16xf32>
    %587 = math.tanh %586 : vector<4x16xf32>
    %cst_116 = arith.constant 1.000000e+00 : f32
    %588 = vector.broadcast %cst_116 : f32 to vector<4x16xf32>
    %589 = arith.subf %588, %580 : vector<4x16xf32>
    %590 = arith.mulf %589, %587 : vector<4x16xf32>
    %591 = arith.mulf %580, %562 : vector<4x16xf32>
    %592 = arith.addf %590, %591 : vector<4x16xf32>
    %593 = vector.extract_strided_slice %531 {offsets = [8, 0], sizes = [4, 48], strides = [1, 1]} : vector<32x48xf32> to vector<4x48xf32>
    %cst_117 = arith.constant dense<0.000000e+00> : vector<4x48xf32>
    %594 = tpu.matmul %592, %523, %cst_117 {dimension_numbers = #tpu.dot_dimension_numbers<[1], [0], [0], [1], [0, 0, 1, 1], [], []>} : vector<4x16xf32>, vector<16x48xf32>, vector<4x48xf32> -> vector<4x48xf32>
    %595 = vector.extract_strided_slice %593 {offsets = [0, 0], sizes = [4, 16], strides = [1, 1]} : vector<4x48xf32> to vector<4x16xf32>
    %596 = vector.extract_strided_slice %594 {offsets = [0, 0], sizes = [4, 16], strides = [1, 1]} : vector<4x48xf32> to vector<4x16xf32>
    %597 = arith.addf %595, %596 : vector<4x16xf32>
    %598 = arith.negf %597 : vector<4x16xf32>
    %599 = math.exp %598 : vector<4x16xf32>
    %cst_118 = arith.constant 1.000000e+00 : f32
    %600 = vector.broadcast %cst_118 : f32 to vector<4x16xf32>
    %601 = arith.addf %600, %599 : vector<4x16xf32>
    %602 = arith.divf %600, %601 : vector<4x16xf32>
    %603 = vector.extract_strided_slice %593 {offsets = [0, 16], sizes = [4, 16], strides = [1, 1]} : vector<4x48xf32> to vector<4x16xf32>
    %604 = vector.extract_strided_slice %594 {offsets = [0, 16], sizes = [4, 16], strides = [1, 1]} : vector<4x48xf32> to vector<4x16xf32>
    %605 = arith.addf %603, %604 : vector<4x16xf32>
    %606 = arith.negf %605 : vector<4x16xf32>
    %607 = math.exp %606 : vector<4x16xf32>
    %cst_119 = arith.constant 1.000000e+00 : f32
    %608 = vector.broadcast %cst_119 : f32 to vector<4x16xf32>
    %609 = arith.addf %608, %607 : vector<4x16xf32>
    %610 = arith.divf %608, %609 : vector<4x16xf32>
    %611 = vector.extract_strided_slice %593 {offsets = [0, 32], sizes = [4, 16], strides = [1, 1]} : vector<4x48xf32> to vector<4x16xf32>
    %612 = vector.extract_strided_slice %594 {offsets = [0, 32], sizes = [4, 16], strides = [1, 1]} : vector<4x48xf32> to vector<4x16xf32>
    %613 = vector.broadcast %527 : vector<1x16xf32> to vector<4x16xf32>
    %614 = arith.addf %612, %613 : vector<4x16xf32>
    %615 = arith.mulf %602, %614 : vector<4x16xf32>
    %616 = arith.addf %611, %615 : vector<4x16xf32>
    %617 = math.tanh %616 : vector<4x16xf32>
    %cst_120 = arith.constant 1.000000e+00 : f32
    %618 = vector.broadcast %cst_120 : f32 to vector<4x16xf32>
    %619 = arith.subf %618, %610 : vector<4x16xf32>
    %620 = arith.mulf %619, %617 : vector<4x16xf32>
    %621 = arith.mulf %610, %592 : vector<4x16xf32>
    %622 = arith.addf %620, %621 : vector<4x16xf32>
    %623 = vector.extract_strided_slice %531 {offsets = [12, 0], sizes = [4, 48], strides = [1, 1]} : vector<32x48xf32> to vector<4x48xf32>
    %cst_121 = arith.constant dense<0.000000e+00> : vector<4x48xf32>
    %624 = tpu.matmul %622, %523, %cst_121 {dimension_numbers = #tpu.dot_dimension_numbers<[1], [0], [0], [1], [0, 0, 1, 1], [], []>} : vector<4x16xf32>, vector<16x48xf32>, vector<4x48xf32> -> vector<4x48xf32>
    %625 = vector.extract_strided_slice %623 {offsets = [0, 0], sizes = [4, 16], strides = [1, 1]} : vector<4x48xf32> to vector<4x16xf32>
    %626 = vector.extract_strided_slice %624 {offsets = [0, 0], sizes = [4, 16], strides = [1, 1]} : vector<4x48xf32> to vector<4x16xf32>
    %627 = arith.addf %625, %626 : vector<4x16xf32>
    %628 = arith.negf %627 : vector<4x16xf32>
    %629 = math.exp %628 : vector<4x16xf32>
    %cst_122 = arith.constant 1.000000e+00 : f32
    %630 = vector.broadcast %cst_122 : f32 to vector<4x16xf32>
    %631 = arith.addf %630, %629 : vector<4x16xf32>
    %632 = arith.divf %630, %631 : vector<4x16xf32>
    %633 = vector.extract_strided_slice %623 {offsets = [0, 16], sizes = [4, 16], strides = [1, 1]} : vector<4x48xf32> to vector<4x16xf32>
    %634 = vector.extract_strided_slice %624 {offsets = [0, 16], sizes = [4, 16], strides = [1, 1]} : vector<4x48xf32> to vector<4x16xf32>
    %635 = arith.addf %633, %634 : vector<4x16xf32>
    %636 = arith.negf %635 : vector<4x16xf32>
    %637 = math.exp %636 : vector<4x16xf32>
    %cst_123 = arith.constant 1.000000e+00 : f32
    %638 = vector.broadcast %cst_123 : f32 to vector<4x16xf32>
    %639 = arith.addf %638, %637 : vector<4x16xf32>
    %640 = arith.divf %638, %639 : vector<4x16xf32>
    %641 = vector.extract_strided_slice %623 {offsets = [0, 32], sizes = [4, 16], strides = [1, 1]} : vector<4x48xf32> to vector<4x16xf32>
    %642 = vector.extract_strided_slice %624 {offsets = [0, 32], sizes = [4, 16], strides = [1, 1]} : vector<4x48xf32> to vector<4x16xf32>
    %643 = vector.broadcast %527 : vector<1x16xf32> to vector<4x16xf32>
    %644 = arith.addf %642, %643 : vector<4x16xf32>
    %645 = arith.mulf %632, %644 : vector<4x16xf32>
    %646 = arith.addf %641, %645 : vector<4x16xf32>
    %647 = math.tanh %646 : vector<4x16xf32>
    %cst_124 = arith.constant 1.000000e+00 : f32
    %648 = vector.broadcast %cst_124 : f32 to vector<4x16xf32>
    %649 = arith.subf %648, %640 : vector<4x16xf32>
    %650 = arith.mulf %649, %647 : vector<4x16xf32>
    %651 = arith.mulf %640, %622 : vector<4x16xf32>
    %652 = arith.addf %650, %651 : vector<4x16xf32>
    %653 = vector.extract_strided_slice %531 {offsets = [16, 0], sizes = [4, 48], strides = [1, 1]} : vector<32x48xf32> to vector<4x48xf32>
    %cst_125 = arith.constant dense<0.000000e+00> : vector<4x48xf32>
    %654 = tpu.matmul %652, %523, %cst_125 {dimension_numbers = #tpu.dot_dimension_numbers<[1], [0], [0], [1], [0, 0, 1, 1], [], []>} : vector<4x16xf32>, vector<16x48xf32>, vector<4x48xf32> -> vector<4x48xf32>
    %655 = vector.extract_strided_slice %653 {offsets = [0, 0], sizes = [4, 16], strides = [1, 1]} : vector<4x48xf32> to vector<4x16xf32>
    %656 = vector.extract_strided_slice %654 {offsets = [0, 0], sizes = [4, 16], strides = [1, 1]} : vector<4x48xf32> to vector<4x16xf32>
    %657 = arith.addf %655, %656 : vector<4x16xf32>
    %658 = arith.negf %657 : vector<4x16xf32>
    %659 = math.exp %658 : vector<4x16xf32>
    %cst_126 = arith.constant 1.000000e+00 : f32
    %660 = vector.broadcast %cst_126 : f32 to vector<4x16xf32>
    %661 = arith.addf %660, %659 : vector<4x16xf32>
    %662 = arith.divf %660, %661 : vector<4x16xf32>
    %663 = vector.extract_strided_slice %653 {offsets = [0, 16], sizes = [4, 16], strides = [1, 1]} : vector<4x48xf32> to vector<4x16xf32>
    %664 = vector.extract_strided_slice %654 {offsets = [0, 16], sizes = [4, 16], strides = [1, 1]} : vector<4x48xf32> to vector<4x16xf32>
    %665 = arith.addf %663, %664 : vector<4x16xf32>
    %666 = arith.negf %665 : vector<4x16xf32>
    %667 = math.exp %666 : vector<4x16xf32>
    %cst_127 = arith.constant 1.000000e+00 : f32
    %668 = vector.broadcast %cst_127 : f32 to vector<4x16xf32>
    %669 = arith.addf %668, %667 : vector<4x16xf32>
    %670 = arith.divf %668, %669 : vector<4x16xf32>
    %671 = vector.extract_strided_slice %653 {offsets = [0, 32], sizes = [4, 16], strides = [1, 1]} : vector<4x48xf32> to vector<4x16xf32>
    %672 = vector.extract_strided_slice %654 {offsets = [0, 32], sizes = [4, 16], strides = [1, 1]} : vector<4x48xf32> to vector<4x16xf32>
    %673 = vector.broadcast %527 : vector<1x16xf32> to vector<4x16xf32>
    %674 = arith.addf %672, %673 : vector<4x16xf32>
    %675 = arith.mulf %662, %674 : vector<4x16xf32>
    %676 = arith.addf %671, %675 : vector<4x16xf32>
    %677 = math.tanh %676 : vector<4x16xf32>
    %cst_128 = arith.constant 1.000000e+00 : f32
    %678 = vector.broadcast %cst_128 : f32 to vector<4x16xf32>
    %679 = arith.subf %678, %670 : vector<4x16xf32>
    %680 = arith.mulf %679, %677 : vector<4x16xf32>
    %681 = arith.mulf %670, %652 : vector<4x16xf32>
    %682 = arith.addf %680, %681 : vector<4x16xf32>
    %683 = vector.extract_strided_slice %531 {offsets = [20, 0], sizes = [4, 48], strides = [1, 1]} : vector<32x48xf32> to vector<4x48xf32>
    %cst_129 = arith.constant dense<0.000000e+00> : vector<4x48xf32>
    %684 = tpu.matmul %682, %523, %cst_129 {dimension_numbers = #tpu.dot_dimension_numbers<[1], [0], [0], [1], [0, 0, 1, 1], [], []>} : vector<4x16xf32>, vector<16x48xf32>, vector<4x48xf32> -> vector<4x48xf32>
    %685 = vector.extract_strided_slice %683 {offsets = [0, 0], sizes = [4, 16], strides = [1, 1]} : vector<4x48xf32> to vector<4x16xf32>
    %686 = vector.extract_strided_slice %684 {offsets = [0, 0], sizes = [4, 16], strides = [1, 1]} : vector<4x48xf32> to vector<4x16xf32>
    %687 = arith.addf %685, %686 : vector<4x16xf32>
    %688 = arith.negf %687 : vector<4x16xf32>
    %689 = math.exp %688 : vector<4x16xf32>
    %cst_130 = arith.constant 1.000000e+00 : f32
    %690 = vector.broadcast %cst_130 : f32 to vector<4x16xf32>
    %691 = arith.addf %690, %689 : vector<4x16xf32>
    %692 = arith.divf %690, %691 : vector<4x16xf32>
    %693 = vector.extract_strided_slice %683 {offsets = [0, 16], sizes = [4, 16], strides = [1, 1]} : vector<4x48xf32> to vector<4x16xf32>
    %694 = vector.extract_strided_slice %684 {offsets = [0, 16], sizes = [4, 16], strides = [1, 1]} : vector<4x48xf32> to vector<4x16xf32>
    %695 = arith.addf %693, %694 : vector<4x16xf32>
    %696 = arith.negf %695 : vector<4x16xf32>
    %697 = math.exp %696 : vector<4x16xf32>
    %cst_131 = arith.constant 1.000000e+00 : f32
    %698 = vector.broadcast %cst_131 : f32 to vector<4x16xf32>
    %699 = arith.addf %698, %697 : vector<4x16xf32>
    %700 = arith.divf %698, %699 : vector<4x16xf32>
    %701 = vector.extract_strided_slice %683 {offsets = [0, 32], sizes = [4, 16], strides = [1, 1]} : vector<4x48xf32> to vector<4x16xf32>
    %702 = vector.extract_strided_slice %684 {offsets = [0, 32], sizes = [4, 16], strides = [1, 1]} : vector<4x48xf32> to vector<4x16xf32>
    %703 = vector.broadcast %527 : vector<1x16xf32> to vector<4x16xf32>
    %704 = arith.addf %702, %703 : vector<4x16xf32>
    %705 = arith.mulf %692, %704 : vector<4x16xf32>
    %706 = arith.addf %701, %705 : vector<4x16xf32>
    %707 = math.tanh %706 : vector<4x16xf32>
    %cst_132 = arith.constant 1.000000e+00 : f32
    %708 = vector.broadcast %cst_132 : f32 to vector<4x16xf32>
    %709 = arith.subf %708, %700 : vector<4x16xf32>
    %710 = arith.mulf %709, %707 : vector<4x16xf32>
    %711 = arith.mulf %700, %682 : vector<4x16xf32>
    %712 = arith.addf %710, %711 : vector<4x16xf32>
    %713 = vector.extract_strided_slice %531 {offsets = [24, 0], sizes = [4, 48], strides = [1, 1]} : vector<32x48xf32> to vector<4x48xf32>
    %cst_133 = arith.constant dense<0.000000e+00> : vector<4x48xf32>
    %714 = tpu.matmul %712, %523, %cst_133 {dimension_numbers = #tpu.dot_dimension_numbers<[1], [0], [0], [1], [0, 0, 1, 1], [], []>} : vector<4x16xf32>, vector<16x48xf32>, vector<4x48xf32> -> vector<4x48xf32>
    %715 = vector.extract_strided_slice %713 {offsets = [0, 0], sizes = [4, 16], strides = [1, 1]} : vector<4x48xf32> to vector<4x16xf32>
    %716 = vector.extract_strided_slice %714 {offsets = [0, 0], sizes = [4, 16], strides = [1, 1]} : vector<4x48xf32> to vector<4x16xf32>
    %717 = arith.addf %715, %716 : vector<4x16xf32>
    %718 = arith.negf %717 : vector<4x16xf32>
    %719 = math.exp %718 : vector<4x16xf32>
    %cst_134 = arith.constant 1.000000e+00 : f32
    %720 = vector.broadcast %cst_134 : f32 to vector<4x16xf32>
    %721 = arith.addf %720, %719 : vector<4x16xf32>
    %722 = arith.divf %720, %721 : vector<4x16xf32>
    %723 = vector.extract_strided_slice %713 {offsets = [0, 16], sizes = [4, 16], strides = [1, 1]} : vector<4x48xf32> to vector<4x16xf32>
    %724 = vector.extract_strided_slice %714 {offsets = [0, 16], sizes = [4, 16], strides = [1, 1]} : vector<4x48xf32> to vector<4x16xf32>
    %725 = arith.addf %723, %724 : vector<4x16xf32>
    %726 = arith.negf %725 : vector<4x16xf32>
    %727 = math.exp %726 : vector<4x16xf32>
    %cst_135 = arith.constant 1.000000e+00 : f32
    %728 = vector.broadcast %cst_135 : f32 to vector<4x16xf32>
    %729 = arith.addf %728, %727 : vector<4x16xf32>
    %730 = arith.divf %728, %729 : vector<4x16xf32>
    %731 = vector.extract_strided_slice %713 {offsets = [0, 32], sizes = [4, 16], strides = [1, 1]} : vector<4x48xf32> to vector<4x16xf32>
    %732 = vector.extract_strided_slice %714 {offsets = [0, 32], sizes = [4, 16], strides = [1, 1]} : vector<4x48xf32> to vector<4x16xf32>
    %733 = vector.broadcast %527 : vector<1x16xf32> to vector<4x16xf32>
    %734 = arith.addf %732, %733 : vector<4x16xf32>
    %735 = arith.mulf %722, %734 : vector<4x16xf32>
    %736 = arith.addf %731, %735 : vector<4x16xf32>
    %737 = math.tanh %736 : vector<4x16xf32>
    %cst_136 = arith.constant 1.000000e+00 : f32
    %738 = vector.broadcast %cst_136 : f32 to vector<4x16xf32>
    %739 = arith.subf %738, %730 : vector<4x16xf32>
    %740 = arith.mulf %739, %737 : vector<4x16xf32>
    %741 = arith.mulf %730, %712 : vector<4x16xf32>
    %742 = arith.addf %740, %741 : vector<4x16xf32>
    %743 = vector.extract_strided_slice %531 {offsets = [28, 0], sizes = [4, 48], strides = [1, 1]} : vector<32x48xf32> to vector<4x48xf32>
    %cst_137 = arith.constant dense<0.000000e+00> : vector<4x48xf32>
    %744 = tpu.matmul %742, %523, %cst_137 {dimension_numbers = #tpu.dot_dimension_numbers<[1], [0], [0], [1], [0, 0, 1, 1], [], []>} : vector<4x16xf32>, vector<16x48xf32>, vector<4x48xf32> -> vector<4x48xf32>
    %745 = vector.extract_strided_slice %743 {offsets = [0, 0], sizes = [4, 16], strides = [1, 1]} : vector<4x48xf32> to vector<4x16xf32>
    %746 = vector.extract_strided_slice %744 {offsets = [0, 0], sizes = [4, 16], strides = [1, 1]} : vector<4x48xf32> to vector<4x16xf32>
    %747 = arith.addf %745, %746 : vector<4x16xf32>
    %748 = arith.negf %747 : vector<4x16xf32>
    %749 = math.exp %748 : vector<4x16xf32>
    %cst_138 = arith.constant 1.000000e+00 : f32
    %750 = vector.broadcast %cst_138 : f32 to vector<4x16xf32>
    %751 = arith.addf %750, %749 : vector<4x16xf32>
    %752 = arith.divf %750, %751 : vector<4x16xf32>
    %753 = vector.extract_strided_slice %743 {offsets = [0, 16], sizes = [4, 16], strides = [1, 1]} : vector<4x48xf32> to vector<4x16xf32>
    %754 = vector.extract_strided_slice %744 {offsets = [0, 16], sizes = [4, 16], strides = [1, 1]} : vector<4x48xf32> to vector<4x16xf32>
    %755 = arith.addf %753, %754 : vector<4x16xf32>
    %756 = arith.negf %755 : vector<4x16xf32>
    %757 = math.exp %756 : vector<4x16xf32>
    %cst_139 = arith.constant 1.000000e+00 : f32
    %758 = vector.broadcast %cst_139 : f32 to vector<4x16xf32>
    %759 = arith.addf %758, %757 : vector<4x16xf32>
    %760 = arith.divf %758, %759 : vector<4x16xf32>
    %761 = vector.extract_strided_slice %743 {offsets = [0, 32], sizes = [4, 16], strides = [1, 1]} : vector<4x48xf32> to vector<4x16xf32>
    %762 = vector.extract_strided_slice %744 {offsets = [0, 32], sizes = [4, 16], strides = [1, 1]} : vector<4x48xf32> to vector<4x16xf32>
    %763 = vector.broadcast %527 : vector<1x16xf32> to vector<4x16xf32>
    %764 = arith.addf %762, %763 : vector<4x16xf32>
    %765 = arith.mulf %752, %764 : vector<4x16xf32>
    %766 = arith.addf %761, %765 : vector<4x16xf32>
    %767 = math.tanh %766 : vector<4x16xf32>
    %cst_140 = arith.constant 1.000000e+00 : f32
    %768 = vector.broadcast %cst_140 : f32 to vector<4x16xf32>
    %769 = arith.subf %768, %760 : vector<4x16xf32>
    %770 = arith.mulf %769, %767 : vector<4x16xf32>
    %771 = arith.mulf %760, %742 : vector<4x16xf32>
    %772 = arith.addf %770, %771 : vector<4x16xf32>
    %c3 = arith.constant 3 : index
    %c0_141 = arith.constant 0 : index
    %c0_142 = arith.constant 0 : index
    %773 = vector.load %arg3[%c3, %c0_141, %c0_142] : memref<4x16x48xf32, #tpu.memory_space<vmem>>, vector<1x16x48xf32>
    %774 = vector.shape_cast %773 : vector<1x16x48xf32> to vector<16x48xf32>
    %c3_143 = arith.constant 3 : index
    %c0_144 = arith.constant 0 : index
    %c0_145 = arith.constant 0 : index
    %775 = vector.load %arg4[%c3_143, %c0_144, %c0_145] : memref<4x16x48xf32, #tpu.memory_space<vmem>>, vector<1x16x48xf32>
    %776 = vector.shape_cast %775 : vector<1x16x48xf32> to vector<16x48xf32>
    %c3_146 = arith.constant 3 : index
    %c0_147 = arith.constant 0 : index
    %c0_148 = arith.constant 0 : index
    %777 = vector.load %arg5[%c3_146, %c0_147, %c0_148] : memref<4x1x48xf32, #tpu.memory_space<vmem>>, vector<1x1x48xf32>
    %778 = vector.shape_cast %777 : vector<1x1x48xf32> to vector<1x48xf32>
    %c3_149 = arith.constant 3 : index
    %c0_150 = arith.constant 0 : index
    %c0_151 = arith.constant 0 : index
    %779 = vector.load %arg6[%c3_149, %c0_150, %c0_151] : memref<4x1x16xf32, #tpu.memory_space<vmem>>, vector<1x1x16xf32>
    %780 = vector.shape_cast %779 : vector<1x1x16xf32> to vector<1x16xf32>
    %781 = tpu.concatenate %562, %592, %622, %652, %682, %712, %742, %772 in 0 : vector<4x16xf32>, vector<4x16xf32>, vector<4x16xf32>, vector<4x16xf32>, vector<4x16xf32>, vector<4x16xf32>, vector<4x16xf32>, vector<4x16xf32> -> vector<32x16xf32>
    %cst_152 = arith.constant dense<0.000000e+00> : vector<32x48xf32>
    %782 = tpu.matmul %781, %774, %cst_152 {dimension_numbers = #tpu.dot_dimension_numbers<[1], [0], [0], [1], [0, 0, 1, 1], [], []>} : vector<32x16xf32>, vector<16x48xf32>, vector<32x48xf32> -> vector<32x48xf32>
    %783 = vector.broadcast %778 : vector<1x48xf32> to vector<32x48xf32>
    %784 = arith.addf %782, %783 : vector<32x48xf32>
    %cst_153 = arith.constant 0.000000e+00 : f32
    %785 = vector.broadcast %cst_153 : f32 to vector<4x16xf32>
    %786 = vector.extract_strided_slice %784 {offsets = [0, 0], sizes = [4, 48], strides = [1, 1]} : vector<32x48xf32> to vector<4x48xf32>
    %cst_154 = arith.constant dense<0.000000e+00> : vector<4x48xf32>
    %787 = tpu.matmul %785, %776, %cst_154 {dimension_numbers = #tpu.dot_dimension_numbers<[1], [0], [0], [1], [0, 0, 1, 1], [], []>} : vector<4x16xf32>, vector<16x48xf32>, vector<4x48xf32> -> vector<4x48xf32>
    %788 = vector.extract_strided_slice %786 {offsets = [0, 0], sizes = [4, 16], strides = [1, 1]} : vector<4x48xf32> to vector<4x16xf32>
    %789 = vector.extract_strided_slice %787 {offsets = [0, 0], sizes = [4, 16], strides = [1, 1]} : vector<4x48xf32> to vector<4x16xf32>
    %790 = arith.addf %788, %789 : vector<4x16xf32>
    %791 = arith.negf %790 : vector<4x16xf32>
    %792 = math.exp %791 : vector<4x16xf32>
    %cst_155 = arith.constant 1.000000e+00 : f32
    %793 = vector.broadcast %cst_155 : f32 to vector<4x16xf32>
    %794 = arith.addf %793, %792 : vector<4x16xf32>
    %795 = arith.divf %793, %794 : vector<4x16xf32>
    %796 = vector.extract_strided_slice %786 {offsets = [0, 16], sizes = [4, 16], strides = [1, 1]} : vector<4x48xf32> to vector<4x16xf32>
    %797 = vector.extract_strided_slice %787 {offsets = [0, 16], sizes = [4, 16], strides = [1, 1]} : vector<4x48xf32> to vector<4x16xf32>
    %798 = arith.addf %796, %797 : vector<4x16xf32>
    %799 = arith.negf %798 : vector<4x16xf32>
    %800 = math.exp %799 : vector<4x16xf32>
    %cst_156 = arith.constant 1.000000e+00 : f32
    %801 = vector.broadcast %cst_156 : f32 to vector<4x16xf32>
    %802 = arith.addf %801, %800 : vector<4x16xf32>
    %803 = arith.divf %801, %802 : vector<4x16xf32>
    %804 = vector.extract_strided_slice %786 {offsets = [0, 32], sizes = [4, 16], strides = [1, 1]} : vector<4x48xf32> to vector<4x16xf32>
    %805 = vector.extract_strided_slice %787 {offsets = [0, 32], sizes = [4, 16], strides = [1, 1]} : vector<4x48xf32> to vector<4x16xf32>
    %806 = vector.broadcast %780 : vector<1x16xf32> to vector<4x16xf32>
    %807 = arith.addf %805, %806 : vector<4x16xf32>
    %808 = arith.mulf %795, %807 : vector<4x16xf32>
    %809 = arith.addf %804, %808 : vector<4x16xf32>
    %810 = math.tanh %809 : vector<4x16xf32>
    %cst_157 = arith.constant 1.000000e+00 : f32
    %811 = vector.broadcast %cst_157 : f32 to vector<4x16xf32>
    %812 = arith.subf %811, %803 : vector<4x16xf32>
    %813 = arith.mulf %812, %810 : vector<4x16xf32>
    %814 = arith.mulf %803, %785 : vector<4x16xf32>
    %815 = arith.addf %813, %814 : vector<4x16xf32>
    %816 = vector.extract_strided_slice %784 {offsets = [4, 0], sizes = [4, 48], strides = [1, 1]} : vector<32x48xf32> to vector<4x48xf32>
    %cst_158 = arith.constant dense<0.000000e+00> : vector<4x48xf32>
    %817 = tpu.matmul %815, %776, %cst_158 {dimension_numbers = #tpu.dot_dimension_numbers<[1], [0], [0], [1], [0, 0, 1, 1], [], []>} : vector<4x16xf32>, vector<16x48xf32>, vector<4x48xf32> -> vector<4x48xf32>
    %818 = vector.extract_strided_slice %816 {offsets = [0, 0], sizes = [4, 16], strides = [1, 1]} : vector<4x48xf32> to vector<4x16xf32>
    %819 = vector.extract_strided_slice %817 {offsets = [0, 0], sizes = [4, 16], strides = [1, 1]} : vector<4x48xf32> to vector<4x16xf32>
    %820 = arith.addf %818, %819 : vector<4x16xf32>
    %821 = arith.negf %820 : vector<4x16xf32>
    %822 = math.exp %821 : vector<4x16xf32>
    %cst_159 = arith.constant 1.000000e+00 : f32
    %823 = vector.broadcast %cst_159 : f32 to vector<4x16xf32>
    %824 = arith.addf %823, %822 : vector<4x16xf32>
    %825 = arith.divf %823, %824 : vector<4x16xf32>
    %826 = vector.extract_strided_slice %816 {offsets = [0, 16], sizes = [4, 16], strides = [1, 1]} : vector<4x48xf32> to vector<4x16xf32>
    %827 = vector.extract_strided_slice %817 {offsets = [0, 16], sizes = [4, 16], strides = [1, 1]} : vector<4x48xf32> to vector<4x16xf32>
    %828 = arith.addf %826, %827 : vector<4x16xf32>
    %829 = arith.negf %828 : vector<4x16xf32>
    %830 = math.exp %829 : vector<4x16xf32>
    %cst_160 = arith.constant 1.000000e+00 : f32
    %831 = vector.broadcast %cst_160 : f32 to vector<4x16xf32>
    %832 = arith.addf %831, %830 : vector<4x16xf32>
    %833 = arith.divf %831, %832 : vector<4x16xf32>
    %834 = vector.extract_strided_slice %816 {offsets = [0, 32], sizes = [4, 16], strides = [1, 1]} : vector<4x48xf32> to vector<4x16xf32>
    %835 = vector.extract_strided_slice %817 {offsets = [0, 32], sizes = [4, 16], strides = [1, 1]} : vector<4x48xf32> to vector<4x16xf32>
    %836 = vector.broadcast %780 : vector<1x16xf32> to vector<4x16xf32>
    %837 = arith.addf %835, %836 : vector<4x16xf32>
    %838 = arith.mulf %825, %837 : vector<4x16xf32>
    %839 = arith.addf %834, %838 : vector<4x16xf32>
    %840 = math.tanh %839 : vector<4x16xf32>
    %cst_161 = arith.constant 1.000000e+00 : f32
    %841 = vector.broadcast %cst_161 : f32 to vector<4x16xf32>
    %842 = arith.subf %841, %833 : vector<4x16xf32>
    %843 = arith.mulf %842, %840 : vector<4x16xf32>
    %844 = arith.mulf %833, %815 : vector<4x16xf32>
    %845 = arith.addf %843, %844 : vector<4x16xf32>
    %846 = vector.extract_strided_slice %784 {offsets = [8, 0], sizes = [4, 48], strides = [1, 1]} : vector<32x48xf32> to vector<4x48xf32>
    %cst_162 = arith.constant dense<0.000000e+00> : vector<4x48xf32>
    %847 = tpu.matmul %845, %776, %cst_162 {dimension_numbers = #tpu.dot_dimension_numbers<[1], [0], [0], [1], [0, 0, 1, 1], [], []>} : vector<4x16xf32>, vector<16x48xf32>, vector<4x48xf32> -> vector<4x48xf32>
    %848 = vector.extract_strided_slice %846 {offsets = [0, 0], sizes = [4, 16], strides = [1, 1]} : vector<4x48xf32> to vector<4x16xf32>
    %849 = vector.extract_strided_slice %847 {offsets = [0, 0], sizes = [4, 16], strides = [1, 1]} : vector<4x48xf32> to vector<4x16xf32>
    %850 = arith.addf %848, %849 : vector<4x16xf32>
    %851 = arith.negf %850 : vector<4x16xf32>
    %852 = math.exp %851 : vector<4x16xf32>
    %cst_163 = arith.constant 1.000000e+00 : f32
    %853 = vector.broadcast %cst_163 : f32 to vector<4x16xf32>
    %854 = arith.addf %853, %852 : vector<4x16xf32>
    %855 = arith.divf %853, %854 : vector<4x16xf32>
    %856 = vector.extract_strided_slice %846 {offsets = [0, 16], sizes = [4, 16], strides = [1, 1]} : vector<4x48xf32> to vector<4x16xf32>
    %857 = vector.extract_strided_slice %847 {offsets = [0, 16], sizes = [4, 16], strides = [1, 1]} : vector<4x48xf32> to vector<4x16xf32>
    %858 = arith.addf %856, %857 : vector<4x16xf32>
    %859 = arith.negf %858 : vector<4x16xf32>
    %860 = math.exp %859 : vector<4x16xf32>
    %cst_164 = arith.constant 1.000000e+00 : f32
    %861 = vector.broadcast %cst_164 : f32 to vector<4x16xf32>
    %862 = arith.addf %861, %860 : vector<4x16xf32>
    %863 = arith.divf %861, %862 : vector<4x16xf32>
    %864 = vector.extract_strided_slice %846 {offsets = [0, 32], sizes = [4, 16], strides = [1, 1]} : vector<4x48xf32> to vector<4x16xf32>
    %865 = vector.extract_strided_slice %847 {offsets = [0, 32], sizes = [4, 16], strides = [1, 1]} : vector<4x48xf32> to vector<4x16xf32>
    %866 = vector.broadcast %780 : vector<1x16xf32> to vector<4x16xf32>
    %867 = arith.addf %865, %866 : vector<4x16xf32>
    %868 = arith.mulf %855, %867 : vector<4x16xf32>
    %869 = arith.addf %864, %868 : vector<4x16xf32>
    %870 = math.tanh %869 : vector<4x16xf32>
    %cst_165 = arith.constant 1.000000e+00 : f32
    %871 = vector.broadcast %cst_165 : f32 to vector<4x16xf32>
    %872 = arith.subf %871, %863 : vector<4x16xf32>
    %873 = arith.mulf %872, %870 : vector<4x16xf32>
    %874 = arith.mulf %863, %845 : vector<4x16xf32>
    %875 = arith.addf %873, %874 : vector<4x16xf32>
    %876 = vector.extract_strided_slice %784 {offsets = [12, 0], sizes = [4, 48], strides = [1, 1]} : vector<32x48xf32> to vector<4x48xf32>
    %cst_166 = arith.constant dense<0.000000e+00> : vector<4x48xf32>
    %877 = tpu.matmul %875, %776, %cst_166 {dimension_numbers = #tpu.dot_dimension_numbers<[1], [0], [0], [1], [0, 0, 1, 1], [], []>} : vector<4x16xf32>, vector<16x48xf32>, vector<4x48xf32> -> vector<4x48xf32>
    %878 = vector.extract_strided_slice %876 {offsets = [0, 0], sizes = [4, 16], strides = [1, 1]} : vector<4x48xf32> to vector<4x16xf32>
    %879 = vector.extract_strided_slice %877 {offsets = [0, 0], sizes = [4, 16], strides = [1, 1]} : vector<4x48xf32> to vector<4x16xf32>
    %880 = arith.addf %878, %879 : vector<4x16xf32>
    %881 = arith.negf %880 : vector<4x16xf32>
    %882 = math.exp %881 : vector<4x16xf32>
    %cst_167 = arith.constant 1.000000e+00 : f32
    %883 = vector.broadcast %cst_167 : f32 to vector<4x16xf32>
    %884 = arith.addf %883, %882 : vector<4x16xf32>
    %885 = arith.divf %883, %884 : vector<4x16xf32>
    %886 = vector.extract_strided_slice %876 {offsets = [0, 16], sizes = [4, 16], strides = [1, 1]} : vector<4x48xf32> to vector<4x16xf32>
    %887 = vector.extract_strided_slice %877 {offsets = [0, 16], sizes = [4, 16], strides = [1, 1]} : vector<4x48xf32> to vector<4x16xf32>
    %888 = arith.addf %886, %887 : vector<4x16xf32>
    %889 = arith.negf %888 : vector<4x16xf32>
    %890 = math.exp %889 : vector<4x16xf32>
    %cst_168 = arith.constant 1.000000e+00 : f32
    %891 = vector.broadcast %cst_168 : f32 to vector<4x16xf32>
    %892 = arith.addf %891, %890 : vector<4x16xf32>
    %893 = arith.divf %891, %892 : vector<4x16xf32>
    %894 = vector.extract_strided_slice %876 {offsets = [0, 32], sizes = [4, 16], strides = [1, 1]} : vector<4x48xf32> to vector<4x16xf32>
    %895 = vector.extract_strided_slice %877 {offsets = [0, 32], sizes = [4, 16], strides = [1, 1]} : vector<4x48xf32> to vector<4x16xf32>
    %896 = vector.broadcast %780 : vector<1x16xf32> to vector<4x16xf32>
    %897 = arith.addf %895, %896 : vector<4x16xf32>
    %898 = arith.mulf %885, %897 : vector<4x16xf32>
    %899 = arith.addf %894, %898 : vector<4x16xf32>
    %900 = math.tanh %899 : vector<4x16xf32>
    %cst_169 = arith.constant 1.000000e+00 : f32
    %901 = vector.broadcast %cst_169 : f32 to vector<4x16xf32>
    %902 = arith.subf %901, %893 : vector<4x16xf32>
    %903 = arith.mulf %902, %900 : vector<4x16xf32>
    %904 = arith.mulf %893, %875 : vector<4x16xf32>
    %905 = arith.addf %903, %904 : vector<4x16xf32>
    %906 = vector.extract_strided_slice %784 {offsets = [16, 0], sizes = [4, 48], strides = [1, 1]} : vector<32x48xf32> to vector<4x48xf32>
    %cst_170 = arith.constant dense<0.000000e+00> : vector<4x48xf32>
    %907 = tpu.matmul %905, %776, %cst_170 {dimension_numbers = #tpu.dot_dimension_numbers<[1], [0], [0], [1], [0, 0, 1, 1], [], []>} : vector<4x16xf32>, vector<16x48xf32>, vector<4x48xf32> -> vector<4x48xf32>
    %908 = vector.extract_strided_slice %906 {offsets = [0, 0], sizes = [4, 16], strides = [1, 1]} : vector<4x48xf32> to vector<4x16xf32>
    %909 = vector.extract_strided_slice %907 {offsets = [0, 0], sizes = [4, 16], strides = [1, 1]} : vector<4x48xf32> to vector<4x16xf32>
    %910 = arith.addf %908, %909 : vector<4x16xf32>
    %911 = arith.negf %910 : vector<4x16xf32>
    %912 = math.exp %911 : vector<4x16xf32>
    %cst_171 = arith.constant 1.000000e+00 : f32
    %913 = vector.broadcast %cst_171 : f32 to vector<4x16xf32>
    %914 = arith.addf %913, %912 : vector<4x16xf32>
    %915 = arith.divf %913, %914 : vector<4x16xf32>
    %916 = vector.extract_strided_slice %906 {offsets = [0, 16], sizes = [4, 16], strides = [1, 1]} : vector<4x48xf32> to vector<4x16xf32>
    %917 = vector.extract_strided_slice %907 {offsets = [0, 16], sizes = [4, 16], strides = [1, 1]} : vector<4x48xf32> to vector<4x16xf32>
    %918 = arith.addf %916, %917 : vector<4x16xf32>
    %919 = arith.negf %918 : vector<4x16xf32>
    %920 = math.exp %919 : vector<4x16xf32>
    %cst_172 = arith.constant 1.000000e+00 : f32
    %921 = vector.broadcast %cst_172 : f32 to vector<4x16xf32>
    %922 = arith.addf %921, %920 : vector<4x16xf32>
    %923 = arith.divf %921, %922 : vector<4x16xf32>
    %924 = vector.extract_strided_slice %906 {offsets = [0, 32], sizes = [4, 16], strides = [1, 1]} : vector<4x48xf32> to vector<4x16xf32>
    %925 = vector.extract_strided_slice %907 {offsets = [0, 32], sizes = [4, 16], strides = [1, 1]} : vector<4x48xf32> to vector<4x16xf32>
    %926 = vector.broadcast %780 : vector<1x16xf32> to vector<4x16xf32>
    %927 = arith.addf %925, %926 : vector<4x16xf32>
    %928 = arith.mulf %915, %927 : vector<4x16xf32>
    %929 = arith.addf %924, %928 : vector<4x16xf32>
    %930 = math.tanh %929 : vector<4x16xf32>
    %cst_173 = arith.constant 1.000000e+00 : f32
    %931 = vector.broadcast %cst_173 : f32 to vector<4x16xf32>
    %932 = arith.subf %931, %923 : vector<4x16xf32>
    %933 = arith.mulf %932, %930 : vector<4x16xf32>
    %934 = arith.mulf %923, %905 : vector<4x16xf32>
    %935 = arith.addf %933, %934 : vector<4x16xf32>
    %936 = vector.extract_strided_slice %784 {offsets = [20, 0], sizes = [4, 48], strides = [1, 1]} : vector<32x48xf32> to vector<4x48xf32>
    %cst_174 = arith.constant dense<0.000000e+00> : vector<4x48xf32>
    %937 = tpu.matmul %935, %776, %cst_174 {dimension_numbers = #tpu.dot_dimension_numbers<[1], [0], [0], [1], [0, 0, 1, 1], [], []>} : vector<4x16xf32>, vector<16x48xf32>, vector<4x48xf32> -> vector<4x48xf32>
    %938 = vector.extract_strided_slice %936 {offsets = [0, 0], sizes = [4, 16], strides = [1, 1]} : vector<4x48xf32> to vector<4x16xf32>
    %939 = vector.extract_strided_slice %937 {offsets = [0, 0], sizes = [4, 16], strides = [1, 1]} : vector<4x48xf32> to vector<4x16xf32>
    %940 = arith.addf %938, %939 : vector<4x16xf32>
    %941 = arith.negf %940 : vector<4x16xf32>
    %942 = math.exp %941 : vector<4x16xf32>
    %cst_175 = arith.constant 1.000000e+00 : f32
    %943 = vector.broadcast %cst_175 : f32 to vector<4x16xf32>
    %944 = arith.addf %943, %942 : vector<4x16xf32>
    %945 = arith.divf %943, %944 : vector<4x16xf32>
    %946 = vector.extract_strided_slice %936 {offsets = [0, 16], sizes = [4, 16], strides = [1, 1]} : vector<4x48xf32> to vector<4x16xf32>
    %947 = vector.extract_strided_slice %937 {offsets = [0, 16], sizes = [4, 16], strides = [1, 1]} : vector<4x48xf32> to vector<4x16xf32>
    %948 = arith.addf %946, %947 : vector<4x16xf32>
    %949 = arith.negf %948 : vector<4x16xf32>
    %950 = math.exp %949 : vector<4x16xf32>
    %cst_176 = arith.constant 1.000000e+00 : f32
    %951 = vector.broadcast %cst_176 : f32 to vector<4x16xf32>
    %952 = arith.addf %951, %950 : vector<4x16xf32>
    %953 = arith.divf %951, %952 : vector<4x16xf32>
    %954 = vector.extract_strided_slice %936 {offsets = [0, 32], sizes = [4, 16], strides = [1, 1]} : vector<4x48xf32> to vector<4x16xf32>
    %955 = vector.extract_strided_slice %937 {offsets = [0, 32], sizes = [4, 16], strides = [1, 1]} : vector<4x48xf32> to vector<4x16xf32>
    %956 = vector.broadcast %780 : vector<1x16xf32> to vector<4x16xf32>
    %957 = arith.addf %955, %956 : vector<4x16xf32>
    %958 = arith.mulf %945, %957 : vector<4x16xf32>
    %959 = arith.addf %954, %958 : vector<4x16xf32>
    %960 = math.tanh %959 : vector<4x16xf32>
    %cst_177 = arith.constant 1.000000e+00 : f32
    %961 = vector.broadcast %cst_177 : f32 to vector<4x16xf32>
    %962 = arith.subf %961, %953 : vector<4x16xf32>
    %963 = arith.mulf %962, %960 : vector<4x16xf32>
    %964 = arith.mulf %953, %935 : vector<4x16xf32>
    %965 = arith.addf %963, %964 : vector<4x16xf32>
    %966 = vector.extract_strided_slice %784 {offsets = [24, 0], sizes = [4, 48], strides = [1, 1]} : vector<32x48xf32> to vector<4x48xf32>
    %cst_178 = arith.constant dense<0.000000e+00> : vector<4x48xf32>
    %967 = tpu.matmul %965, %776, %cst_178 {dimension_numbers = #tpu.dot_dimension_numbers<[1], [0], [0], [1], [0, 0, 1, 1], [], []>} : vector<4x16xf32>, vector<16x48xf32>, vector<4x48xf32> -> vector<4x48xf32>
    %968 = vector.extract_strided_slice %966 {offsets = [0, 0], sizes = [4, 16], strides = [1, 1]} : vector<4x48xf32> to vector<4x16xf32>
    %969 = vector.extract_strided_slice %967 {offsets = [0, 0], sizes = [4, 16], strides = [1, 1]} : vector<4x48xf32> to vector<4x16xf32>
    %970 = arith.addf %968, %969 : vector<4x16xf32>
    %971 = arith.negf %970 : vector<4x16xf32>
    %972 = math.exp %971 : vector<4x16xf32>
    %cst_179 = arith.constant 1.000000e+00 : f32
    %973 = vector.broadcast %cst_179 : f32 to vector<4x16xf32>
    %974 = arith.addf %973, %972 : vector<4x16xf32>
    %975 = arith.divf %973, %974 : vector<4x16xf32>
    %976 = vector.extract_strided_slice %966 {offsets = [0, 16], sizes = [4, 16], strides = [1, 1]} : vector<4x48xf32> to vector<4x16xf32>
    %977 = vector.extract_strided_slice %967 {offsets = [0, 16], sizes = [4, 16], strides = [1, 1]} : vector<4x48xf32> to vector<4x16xf32>
    %978 = arith.addf %976, %977 : vector<4x16xf32>
    %979 = arith.negf %978 : vector<4x16xf32>
    %980 = math.exp %979 : vector<4x16xf32>
    %cst_180 = arith.constant 1.000000e+00 : f32
    %981 = vector.broadcast %cst_180 : f32 to vector<4x16xf32>
    %982 = arith.addf %981, %980 : vector<4x16xf32>
    %983 = arith.divf %981, %982 : vector<4x16xf32>
    %984 = vector.extract_strided_slice %966 {offsets = [0, 32], sizes = [4, 16], strides = [1, 1]} : vector<4x48xf32> to vector<4x16xf32>
    %985 = vector.extract_strided_slice %967 {offsets = [0, 32], sizes = [4, 16], strides = [1, 1]} : vector<4x48xf32> to vector<4x16xf32>
    %986 = vector.broadcast %780 : vector<1x16xf32> to vector<4x16xf32>
    %987 = arith.addf %985, %986 : vector<4x16xf32>
    %988 = arith.mulf %975, %987 : vector<4x16xf32>
    %989 = arith.addf %984, %988 : vector<4x16xf32>
    %990 = math.tanh %989 : vector<4x16xf32>
    %cst_181 = arith.constant 1.000000e+00 : f32
    %991 = vector.broadcast %cst_181 : f32 to vector<4x16xf32>
    %992 = arith.subf %991, %983 : vector<4x16xf32>
    %993 = arith.mulf %992, %990 : vector<4x16xf32>
    %994 = arith.mulf %983, %965 : vector<4x16xf32>
    %995 = arith.addf %993, %994 : vector<4x16xf32>
    %996 = vector.extract_strided_slice %784 {offsets = [28, 0], sizes = [4, 48], strides = [1, 1]} : vector<32x48xf32> to vector<4x48xf32>
    %cst_182 = arith.constant dense<0.000000e+00> : vector<4x48xf32>
    %997 = tpu.matmul %995, %776, %cst_182 {dimension_numbers = #tpu.dot_dimension_numbers<[1], [0], [0], [1], [0, 0, 1, 1], [], []>} : vector<4x16xf32>, vector<16x48xf32>, vector<4x48xf32> -> vector<4x48xf32>
    %998 = vector.extract_strided_slice %996 {offsets = [0, 0], sizes = [4, 16], strides = [1, 1]} : vector<4x48xf32> to vector<4x16xf32>
    %999 = vector.extract_strided_slice %997 {offsets = [0, 0], sizes = [4, 16], strides = [1, 1]} : vector<4x48xf32> to vector<4x16xf32>
    %1000 = arith.addf %998, %999 : vector<4x16xf32>
    %1001 = arith.negf %1000 : vector<4x16xf32>
    %1002 = math.exp %1001 : vector<4x16xf32>
    %cst_183 = arith.constant 1.000000e+00 : f32
    %1003 = vector.broadcast %cst_183 : f32 to vector<4x16xf32>
    %1004 = arith.addf %1003, %1002 : vector<4x16xf32>
    %1005 = arith.divf %1003, %1004 : vector<4x16xf32>
    %1006 = vector.extract_strided_slice %996 {offsets = [0, 16], sizes = [4, 16], strides = [1, 1]} : vector<4x48xf32> to vector<4x16xf32>
    %1007 = vector.extract_strided_slice %997 {offsets = [0, 16], sizes = [4, 16], strides = [1, 1]} : vector<4x48xf32> to vector<4x16xf32>
    %1008 = arith.addf %1006, %1007 : vector<4x16xf32>
    %1009 = arith.negf %1008 : vector<4x16xf32>
    %1010 = math.exp %1009 : vector<4x16xf32>
    %cst_184 = arith.constant 1.000000e+00 : f32
    %1011 = vector.broadcast %cst_184 : f32 to vector<4x16xf32>
    %1012 = arith.addf %1011, %1010 : vector<4x16xf32>
    %1013 = arith.divf %1011, %1012 : vector<4x16xf32>
    %1014 = vector.extract_strided_slice %996 {offsets = [0, 32], sizes = [4, 16], strides = [1, 1]} : vector<4x48xf32> to vector<4x16xf32>
    %1015 = vector.extract_strided_slice %997 {offsets = [0, 32], sizes = [4, 16], strides = [1, 1]} : vector<4x48xf32> to vector<4x16xf32>
    %1016 = vector.broadcast %780 : vector<1x16xf32> to vector<4x16xf32>
    %1017 = arith.addf %1015, %1016 : vector<4x16xf32>
    %1018 = arith.mulf %1005, %1017 : vector<4x16xf32>
    %1019 = arith.addf %1014, %1018 : vector<4x16xf32>
    %1020 = math.tanh %1019 : vector<4x16xf32>
    %cst_185 = arith.constant 1.000000e+00 : f32
    %1021 = vector.broadcast %cst_185 : f32 to vector<4x16xf32>
    %1022 = arith.subf %1021, %1013 : vector<4x16xf32>
    %1023 = arith.mulf %1022, %1020 : vector<4x16xf32>
    %1024 = arith.mulf %1013, %995 : vector<4x16xf32>
    %1025 = arith.addf %1023, %1024 : vector<4x16xf32>
    %1026 = tpu.concatenate %815, %845, %875, %905, %935, %965, %995, %1025 in 1 : vector<4x16xf32>, vector<4x16xf32>, vector<4x16xf32>, vector<4x16xf32>, vector<4x16xf32>, vector<4x16xf32>, vector<4x16xf32>, vector<4x16xf32> -> vector<4x128xf32>
    %1027 = arith.negf %1026 : vector<4x128xf32>
    %1028 = math.exp %1027 : vector<4x128xf32>
    %cst_186 = arith.constant 1.000000e+00 : f32
    %1029 = vector.broadcast %cst_186 : f32 to vector<4x128xf32>
    %1030 = arith.addf %1029, %1028 : vector<4x128xf32>
    %1031 = arith.divf %1029, %1030 : vector<4x128xf32>
    %c0_187 = arith.constant 0 : index
    %c0_188 = arith.constant 0 : index
    %1032 = vector.load %arg7[%c0_187, %c0_188] : memref<4x128xf32, #tpu.memory_space<vmem>>, vector<4x128xf32>
    tpu.vector_store %arg7[%c0_187, %c0_188], %1031 {strides = array<i32>} : memref<4x128xf32, #tpu.memory_space<vmem>>, vector<4x128xf32>,
    return
  }
}

</mosaic_0001>

<bundles_post_ra>
// kernel: decoder_forward.1
= control target key start
LH: loop header
LB: loop body
LE: loop exit
PB: predicated region body
PF: predicated region fallthrough
CT: control target
= control target key end

     0   :  { %12 = vsyncpa [#allocation3], 0  ;;  %s5800_s0 = inlined_call_operand.hbm [shape: f32[4,32], index: 0, kind: input, shape index: {}]   ;;  %s5801_s1 = inlined_call_operand.hbm [shape: f32[32,128], index: 1, kind: input, shape index: {}]   ;;  %s5802_s2 = inlined_call_operand.vmem [shape: f32[1,128], index: 2, kind: input, shape index: {}]   ;;  %s5803_s3 = inlined_call_operand.hbm [shape: f32[4,16,48], index: 3, kind: input, shape index: {}]   ;;  %s5804_s4 = inlined_call_operand.hbm [shape: f32[4,16,48], index: 4, kind: input, shape index: {}]   ;;  %s5805_s5 = inlined_call_operand.vmem [shape: f32[4,1,48], index: 5, kind: input, shape index: {}]   ;;  %s5806_s6 = inlined_call_operand.vmem [shape: f32[4,1,16], index: 6, kind: input, shape index: {}]   ;;  %s5807_s7 = inlined_call_operand.vmem [shape: f32[4,128], index: 7, kind: output, shape index: {}]  }
   0x1   :  { %13 = vsyncpa [#allocation5], 0 }
   0x2   :  { %14 = vsyncpa [#allocation8], 0  ;;  %s5041_s24 = smov [#allocation4]   ;;  %s4947_s28 = scalar_lea.hbm %s5801_s1, 512 }
   0x3   :  { %s30_s25 = sshll.u32 %s5041_s24, 4  ;;  %p4948_p0 = scmp.ne.s32.totalorder %s5801_s1, %s4947_s28  ;;  %s31_s25 = int_to_ptr.vmem [resolvable:$true] %s30_s25 }
   0x4   :  { %p4951_p1 = scmp.lt.u32.totalorder %s4947_s28, %s5801_s1 }
   0x6   :  { %p4953_p2 = pnand %p4951_p1, %p4948_p0 }
   0x8   :  { %4956 = shalt.err (!%p4953_p2)
}
   0x9   :  { %s4957_s10 = scalar_lea.vmem %s31_s25, 512  ;;  %p4962_p4 = scmp.lt.s32.totalorder %s31_s25, %s31_s25 }
   0xa   :  { %p4958_p3 = scmp.ne.s32.totalorder %s31_s25, %s4957_s10  ;;  %p4963_p5 = scmp.lt.s32.totalorder %s4957_s10, %s4957_s10 }
   0xc   :  { %p4964_p6 = por %p4963_p5, %p4962_p4 }
   0xe   :  { %p4965_p7 = pnand %p4964_p6, %p4958_p3 }
  0x10   :  { %4968 = shalt.err (!%p4965_p7)
}
  0x11   :  { %s5042_s11 = smov 128   ;;  %s5043_s12 = smov 8  }
  0x12   :  { %36 = dma.hbm_to_vmem [thread:$0]  %s5801_s1, 512, %s31_s25, [#allocation5], %s5042_s11, %s5042_s11, %s5043_s12  }
  0x13   :  { %s5044_s15 = smov [#allocation2]   ;;  %s5045_s17 = smov [#allocation6]  }
  0x14   :  { %s21_s16 = sshll.u32 %s5044_s15, 4  ;;  %s44_s18 = sshll.u32 %s5045_s17, 4  ;;  %s22_s16 = int_to_ptr.vmem [resolvable:$true] %s21_s16  ;;  %s45_s18 = int_to_ptr.vmem [resolvable:$true] %s44_s18 }
  0x15   :  { %s4969_s21 = scalar_lea.hbm %s5800_s0, 64 }
  0x16   :  { %p4970_p8 = scmp.ne.s32.totalorder %s5800_s0, %s4969_s21  ;;  %p4973_p9 = scmp.lt.u32.totalorder %s4969_s21, %s5800_s0 }
  0x18   :  { %p4975_p10 = pnand %p4973_p9, %p4970_p8 }
  0x1a   :  { %4978 = shalt.err (!%p4975_p10)
}
  0x1b   :  { %s4979_s1 = scalar_lea.vmem %s22_s16, 64  ;;  %p4984_p12 = scmp.lt.s32.totalorder %s22_s16, %s22_s16 }
  0x1c   :  { %p4980_p11 = scmp.ne.s32.totalorder %s22_s16, %s4979_s1  ;;  %p4985_p13 = scmp.lt.s32.totalorder %s4979_s1, %s4979_s1 }
  0x1e   :  { %p4986_p0 = por %p4985_p13, %p4984_p12 }
  0x20   :  { %p4987_p1 = pnand %p4986_p0, %p4980_p11 }
  0x22   :  { %4990 = shalt.err (!%p4987_p1)
}
  0x23   :  { %24 = dma.hbm_to_vmem [thread:$0]  %s5800_s0, 64, %s22_s16, [#allocation3]  }
  0x24   :  { %s4991_s30 = scalar_lea.hbm %s5803_s3, 1024 }
  0x25   :  { %p4992_p2 = scmp.ne.s32.totalorder %s5803_s3, %s4991_s30  ;;  %p4995_p3 = scmp.lt.u32.totalorder %s4991_s30, %s5803_s3 }
  0x27   :  { %p4997_p4 = pnand %p4995_p3, %p4992_p2 }
  0x29   :  { %5000 = shalt.err (!%p4997_p4)
}
  0x2a   :  { %s5001_s14 = scalar_lea.vmem %s45_s18, 1024  ;;  %p5006_p6 = scmp.lt.s32.totalorder %s45_s18, %s45_s18 }
  0x2b   :  { %p5002_p5 = scmp.ne.s32.totalorder %s45_s18, %s5001_s14  ;;  %p5007_p7 = scmp.lt.s32.totalorder %s5001_s14, %s5001_s14 }
  0x2d   :  { %p5008_p8 = por %p5007_p7, %p5006_p6 }
  0x2f   :  { %p5009_p9 = pnand %p5008_p8, %p5002_p5 }
  0x31   :  { %5012 = shalt.err (!%p5009_p9)
}
  0x32   :  { %50 = dma.hbm_to_vmem [thread:$0]  %s5803_s3, 1024, %s45_s18, [#allocation5], %s5042_s11, %s5042_s11, %s5043_s12  }
  0x33   :  { %s5046_s16 = smov [#allocation7]   ;;  %s5013_s21 = scalar_lea.hbm %s5804_s4, 1024 }
  0x34   :  { %s56_s17 = sshll.u32 %s5046_s16, 4  ;;  %p5014_p10 = scmp.ne.s32.totalorder %s5804_s4, %s5013_s21  ;;  %s57_s17 = int_to_ptr.vmem [resolvable:$true] %s56_s17 }
  0x35   :  { %p5017_p11 = scmp.lt.u32.totalorder %s5013_s21, %s5804_s4 }
  0x37   :  { %p5019_p12 = pnand %p5017_p11, %p5014_p10 }
  0x39   :  { %5022 = shalt.err (!%p5019_p12)
}
  0x3a   :  { %s5023_s1 = scalar_lea.vmem %s57_s17, 1024  ;;  %p5028_p0 = scmp.lt.s32.totalorder %s57_s17, %s57_s17 }
  0x3b   :  { %p5024_p13 = scmp.ne.s32.totalorder %s57_s17, %s5023_s1  ;;  %p5029_p1 = scmp.lt.s32.totalorder %s5023_s1, %s5023_s1 }
  0x3d   :  { %p5030_p2 = por %p5029_p1, %p5028_p0 }
  0x3f   :  { %p5031_p3 = pnand %p5030_p2, %p5024_p13 }
  0x41   :  { %5034 = shalt.err (!%p5031_p3)
}
  0x42   :  { %62 = dma.hbm_to_vmem [thread:$0]  %s5804_s4, 1024, %s57_s17, [#allocation8], %s5042_s11, %s5042_s11, %s5043_s12  }
  0x43   :  { %5035 = dma.done.wait [#allocation3], 64  }
  0x44   :  { %5036 = vsyncadd [#allocation3], 4294967232 }
  0x45   :  { %5037 = dma.done.wait [#allocation5], 1536  }
  0x46   :  { %5038 = vsyncadd [#allocation5], 4294965760 }
  0x47   :  { %5039 = dma.done.wait [#allocation8], 1024  }
  0x48   :  { %5040 = vsyncadd [#allocation8], 4294966272  ;;  %v5047_v0 = vmov 0.0|0.0   ;;  %vm5048_vm0 = vmmov 0   ;;  %v5049_v1 = vmov 0.0   ;;  %v80_v2 = vld [vmem:[#allocation4] sm:$0xff] }
  0x49   :  { %4617 = vmatprep.subr.bf16.mxu0 %v5047_v0  ;;  %4350 = vmatprep.mubr.msk.f32.mxu0 %vm5048_vm0, %v5049_v1  ;;  %v81_v3 = vld [vmem:[#allocation4 + $0x8] sm:$0xff]  ;;  %v82_v4 = vld [vmem:[#allocation4 + $0x10] sm:$0xff]  ;;  %v83_v6 = vld [vmem:[#allocation4 + $0x18] sm:$0xff]  ;;  %vm91_vm1 = vcmask 261120   ;;  %s5050_s12 = smov 80   ;;  %s5051_s25 = smov 112  }
  0x4a   :  { %v4618_v5 = vpack.c.bf16 %v81_v3, %v80_v2  ;;  %v4621_v7 = vpack.c.bf16 %v83_v6, %v82_v4  ;;  %v79_v8 = vld [vmem:[#allocation2] sm:$0xf]  ;;  %v167_v9 = vld [vmem:[#allocation7] sm:$0xff]  ;;  %v168_v10 = vld [vmem:[#allocation7 + $0x8] sm:$0xff]  ;;  %s5052_s29 = smov 96   ;;  %s5053_s30 = smov 32  }
  0x4b   :  { %v5162_v11 = vpack.c.bf16 %v168_v10, %v167_v9  ;;  %v165_v12 = vld [vmem:[#allocation6] sm:$0xff]  ;;  %v166_v13 = vld [vmem:[#allocation6 + $0x8] sm:$0xff]  ;;  %v4124_v15 = vld [vmem:[%s5802_s2] ss:$0 sm:$0xff]  ;;  %vm194_vm2 = vcmask 1043456   ;;  %vm205_vm3 = vcmask 130048  }
  0x4c   :  { %4619 = vmatpush3.bf16.msra.mxu0 %v4618_v5  ;;  %v4623_v14 = vpack.c.bf16 %v166_v13, %v165_v12  ;;  %v4132_v20 = vld [vmem:[%s5806_s6] ss:$0 sm:$0xff]  ;;  %s5054_s9 = smov 64   ;;  %s5055_s10 = smov 48   ;;  %vm4100_vm4 = vcmask 392192   ;;  %vm4102_vm5 = vcmask 523264  }
  0x4d   :  { %4620 = vmatprep.subr.bf16.mxu0 %v5047_v0  ;;  %v5195_v30 = vld [vmem:[%s5805_s5] ss:$0 sm:$0xff]  ;;  %s5056_s13 = smov 16   ;;  %vm4104_vm6 = vcmask 654336   ;;  %vm4106_vm7 = vcmask 785408   ;;  %vm4108_vm8 = vcmask 916480  }
  0x4e   :  { %4624 = vmatprep.subr.bf16.mxu1 %v4623_v14 }
  0x4f   :  { %4626 = vmatpush3.bf16.msra.mxu1 %v4623_v14 }
  0x50   :  { %4622 = vmatpush3.bf16.msra.mxu0 %v4621_v7  ;;  %4630 = vmatprep.subr.bf16.mxu1 %v5047_v0 }
  0x51   :  { %4627 = vmatprep.subr.bf16.mxu0 %v5047_v0 }
  0x53   :  { %4351 = vmatmul.mubr.msk.f32.vlgmr.msra.gmra.mrb[0].mxu0 %vm91_vm1, %v79_v8 }
  0x54   :  { %4367 = vmatprep.mubr.msk.f32.mxu0 %vm5048_vm0, %v5049_v1  ;;  %4629 = vmatpush3.bf16.msra.mxu0 %v5162_v11 }
  0x55   :  { %4633 = vmatprep.subr.bf16.mxu0 %v5047_v0 }
  0x57   :  { %4368 = vmatmul.mubr.f32.vlgmr.msra.gmra.mrb[2].mxu0 %v5049_v1 }
  0x58   :  { %4635 = vmatpush3.bf16.msra.mxu0 %v5162_v11  ;;  %4381 = vmatprep.mubr.msk.f32.mxu0 %vm5048_vm0, %v5049_v1 }
  0x59   :  { %4639 = vmatprep.subr.bf16.mxu0 %v5047_v0 }
 0x126   :  { %v161_v16 = vpop.f32.mrb[0].mxu0 }
 0x127   :  { %v162_v17 = vadd.f32 %v4124_v15, %v161_v16  ;;  %v4352_v18 = vpop.f32.mrb[1].mxu0 }
 0x129   :  { %v172_v19 = vrot.slane %v162_v17, 4 }
 0x12a   :  { %v372_v21 = vpop.f32.mrb[2].mxu0 }
 0x12b   :  { %179 = vrot.lane.b32.xlu1 %v172_v19, %s5050_s12  ;;  %173 = vrot.lane.b32.xlu0 %v172_v19, %s5051_s25  ;;  %v4369_v22 = vpop.f32.mrb[3].mxu0 }
 0x12f   :  { %176 = vrot.lane.b32.xlu0 %v162_v17, %s5052_s29  ;;  %388 = vrot.lane.b32.xlu1 %v4132_v20, %s5053_s30 }
 0x19d   :  { %v180_v23 = vpop.permute.xlu1 %179  ;;  %v174_v24 = vpop.permute.xlu0 %173 }
 0x19e   :  { %v195_v25 = vsel %vm194_vm2, %v162_v17, %v174_v24 }
 0x19f   :  { %4357 = vmatprep.mubr.msk.f32.mxu1 %vm205_vm3, %v195_v25 }
 0x1a1   :  { %v177_v26 = vpop.permute.xlu0 %176  ;;  %v5184_v27 = vpop.permute.xlu1 %388 }
 0x1a2   :  { %v196_v28 = vsel %vm194_vm2, %v177_v26, %v180_v23  ;;  %v391_v29 = vadd.f32 %v5184_v27, %v372_v21 }
 0x1a3   :  { %4358 = vmatmul.mubr.msk.f32.vlgmr.msra.gmra.mrb[0].mxu1 %vm205_vm3, %v196_v28 }
 0x1a4   :  { %393 = vrot.lane.b32.xlu0 %v391_v29, %s5052_s29  ;;  %4632 = vmatpush3.bf16.msra.mxu1 %v5162_v11 }
 0x1a5   :  { %4636 = vmatprep.subr.bf16.mxu1 %v5047_v0 }
 0x216   :  { %v394_v38 = vpop.permute.xlu0 %393 }
 0x276   :  { %v5197_v31 = vpop.f32.mrb[0].mxu1 }
 0x277   :  { %v284_v32 = vpop.f32.mrb[1].mxu1  ;;  %v290_v23 = vadd.f32 %v5197_v31, %v5195_v30 }
 0x278   :  { %v285_v33 = vadd.f32 %v5195_v30, %v284_v32 }
 0x27a   :  { %v376_v34 = vadd.f32 %v372_v21, %v285_v33 }
 0x27c   :  { %v4131_v35 = vmul.f32 -1.442695, %v376_v34 }
 0x27e   :  { %4751 = vpow2.f32 %v4131_v35 }
 0x288   :  { %v4752_v36 = vpop.eup %4751 }
 0x289   :  { %v380_v37 = vadd.f32 1.0, %v4752_v36 }
 0x28b   :  { %4753 = vrcp.f32 %v380_v37 }
 0x295   :  { %v4754_v39 = vpop.eup %4753 }
 0x296   :  { %v396_v40 = vmul.f32 %v4754_v39, %v394_v38  ;;  %v403_v44 = vsub.f32 1.0, %v4754_v39  ;;  %v409_v46 = vmul.f32 0.0, %v4754_v39 }
 0x298   :  { %398 = vrot.lane.b32.xlu1 %v396_v40, %s5053_s30 }
 0x29c   :  { %182 = vrot.lane.b32.xlu1 %v162_v17, %s5054_s9 }
 0x2a0   :  { %188 = vrot.lane.b32.xlu1 %v162_v17, %s5053_s30 }
 0x30a   :  { %v399_v41 = vpop.permute.xlu1 %398 }
 0x30b   :  { %v401_v42 = vadd.f32 %v399_v41, %v285_v33 }
 0x30d   :  { %4755 = vtanh.f32 %v401_v42 }
 0x30e   :  { %v183_v48 = vpop.permute.xlu1 %182 }
 0x312   :  { %v189_v52 = vpop.permute.xlu1 %188 }
 0x317   :  { %v4756_v43 = vpop.eup %4755 }
 0x318   :  { %405 = vrot.lane.b32.xlu0 %v4756_v43, %s5051_s25 }
 0x31c   :  { %185 = vrot.lane.b32.xlu0 %v172_v19, %s5055_s10 }
 0x320   :  { %191 = vrot.lane.b32.xlu0 %v172_v19, %s5056_s13 }
 0x38a   :  { %v406_v45 = vpop.permute.xlu0 %405 }
 0x38b   :  { %v408_v47 = vmul.f32 %v406_v45, %v403_v44 }
 0x38d   :  { %v5206_v49 = vadd.f32 %v409_v46, %v408_v47 }
 0x38e   :  { %v186_v50 = vpop.permute.xlu0 %185 }
 0x38f   :  { %v197_v51 = vsel %vm194_vm2, %v183_v48, %v186_v50  ;;  %412 = vrot.lane.b32.xlu1 %v5206_v49, %s5051_s25  ;;  %v515_v13 = vrot.slane %v5206_v49, 4 }
 0x390   :  { %4360 = vmatprep.mubr.msk.f32.mxu1 %vm205_vm3, %v197_v51 }
 0x392   :  { %v192_v53 = vpop.permute.xlu0 %191 }
 0x393   :  { %v198_v54 = vsel %vm194_vm2, %v189_v52, %v192_v53 }
 0x394   :  { %4361 = vmatmul.mubr.msk.f32.gmra.mrb[2].mxu1 %vm205_vm3, %v198_v54 }
 0x395   :  { %4374 = vmatprep.mubr.msk.f32.mxu1 %vm5048_vm0, %v5049_v1 }
 0x401   :  { %v413_v55 = vpop.permute.xlu1 %412 }
 0x402   :  { %4375 = vmatmul.mubr.msk.f32.vlgmr.msra.gmra.mrb[4].mxu1 %vm205_vm3, %v413_v55 }
 0x403   :  { %4638 = vmatpush3.bf16.msra.mxu1 %v5162_v11  ;;  %4388 = vmatprep.mubr.msk.f32.mxu1 %vm5048_vm0, %v5049_v1 }
 0x404   :  { %4642 = vmatprep.subr.bf16.mxu1 %v5047_v0 }
 0x467   :  { %v5221_v56 = vpop.f32.mrb[2].mxu1 }
 0x468   :  { %v5223_v57 = vpop.f32.mrb[3].mxu1 }
 0x4d5   :  { %v482_v58 = vpop.f32.mrb[4].mxu1 }
 0x4d6   :  { %v496_v59 = vadd.f32 %v482_v58, %v5184_v27  ;;  %v4376_v60 = vpop.f32.mrb[5].mxu1  ;;  %v487_v62 = vrot.slane %v482_v58, 4 }
 0x4d8   :  { %v498_v61 = vrot.slane %v496_v59, 4  ;;  %v489_v63 = vadd.f32 %v487_v62, %v285_v33 }
 0x4da   :  { %499 = vrot.lane.b32.xlu0 %v498_v61, %s5052_s29  ;;  %v4134_v2 = vmul.f32 -1.442695, %v489_v63 }
 0x4dc   :  { %4757 = vpow2.f32 %v4134_v2 }
 0x4e6   :  { %v4758_v3 = vpop.eup %4757 }
 0x4e7   :  { %v493_v4 = vadd.f32 1.0, %v4758_v3 }
 0x4e9   :  { %4759 = vrcp.f32 %v493_v4 }
 0x4f3   :  { %v4760_v5 = vpop.eup %4759 }
 0x4f4   :  { %v509_v12 = vsub.f32 1.0, %v4760_v5  ;;  %v517_v15 = vmul.f32 %v4760_v5, %v515_v13 }
 0x54c   :  { %v500_v6 = vpop.permute.xlu0 %499 }
 0x54d   :  { %v502_v7 = vmul.f32 %v4760_v5, %v500_v6 }
 0x54f   :  { %504 = vrot.lane.b32.xlu1 %v502_v7, %s5053_s30 }
 0x5c1   :  { %v505_v8 = vpop.permute.xlu1 %504 }
 0x5c2   :  { %v507_v9 = vadd.f32 %v505_v8, %v285_v33 }
 0x5c4   :  { %4761 = vtanh.f32 %v507_v9  ;;  %v295_v9 = vadd.f32 %v5195_v30, %v5223_v57 }
 0x5ce   :  { %v4762_v10 = vpop.eup %4761 }
 0x5cf   :  { %511 = vrot.lane.b32.xlu0 %v4762_v10, %s5051_s25 }
 0x641   :  { %v512_v14 = vpop.permute.xlu0 %511 }
 0x642   :  { %v514_v16 = vmul.f32 %v512_v14, %v509_v12 }
 0x644   :  { %v5230_v17 = vadd.f32 %v517_v15, %v514_v16 }
 0x646   :  { %v520_v18 = vrot.slane %v5230_v17, 4 }
 0x648   :  { %521 = vrot.lane.b32.xlu1 %v520_v18, %s5051_s25 }
 0x6ba   :  { %v522_v19 = vpop.permute.xlu1 %521 }
 0x6bb   :  { %4382 = vmatmul.mubr.msk.f32.vlgmr.msra.gmra.mrb[4].mxu0 %vm205_vm3, %v522_v19 }
 0x6bc   :  { %4641 = vmatpush3.bf16.msra.mxu0 %v5162_v11  ;;  %4395 = vmatprep.mubr.msk.f32.mxu0 %vm5048_vm0, %v5049_v1 }
 0x6bd   :  { %4645 = vmatprep.subr.bf16.mxu0 %v5047_v0 }
 0x78e   :  { %v591_v20 = vpop.f32.mrb[4].mxu0 }
 0x78f   :  { %v602_v21 = vadd.f32 %v591_v20, %v5184_v27  ;;  %v4383_v22 = vpop.f32.mrb[5].mxu0  ;;  %v595_v24 = vadd.f32 %v591_v20, %v290_v23 }
 0x791   :  { %604 = vrot.lane.b32.xlu0 %v602_v21, %s5052_s29  ;;  %v4136_v25 = vmul.f32 -1.442695, %v595_v24 }
 0x793   :  { %4763 = vpow2.f32 %v4136_v25 }
 0x79d   :  { %v4764_v26 = vpop.eup %4763 }
 0x79e   :  { %v599_v28 = vadd.f32 1.0, %v4764_v26 }
 0x7a0   :  { %4765 = vrcp.f32 %v599_v28 }
 0x7aa   :  { %v4766_v29 = vpop.eup %4765 }
 0x7ab   :  { %v614_v37 = vsub.f32 1.0, %v4766_v29  ;;  %v621_v31 = vmul.f32 %v4766_v29, %v520_v18 }
 0x803   :  { %v605_v32 = vpop.permute.xlu0 %604 }
 0x804   :  { %v607_v33 = vmul.f32 %v4766_v29, %v605_v32 }
 0x806   :  { %609 = vrot.lane.b32.xlu1 %v607_v33, %s5053_s30 }
 0x878   :  { %v610_v34 = vpop.permute.xlu1 %609 }
 0x879   :  { %v612_v35 = vadd.f32 %v610_v34, %v290_v23 }
 0x87b   :  { %4767 = vtanh.f32 %v612_v35 }
 0x885   :  { %v4768_v36 = vpop.eup %4767 }
 0x886   :  { %616 = vrot.lane.b32.xlu0 %v4768_v36, %s5051_s25 }
 0x8f8   :  { %v617_v38 = vpop.permute.xlu0 %616 }
 0x8f9   :  { %v619_v39 = vmul.f32 %v617_v38, %v614_v37 }
 0x8fb   :  { %v5245_v40 = vadd.f32 %v621_v31, %v619_v39 }
 0x8fd   :  { %624 = vrot.lane.b32.xlu1 %v5245_v40, %s5051_s25  ;;  %v727_v61 = vrot.slane %v5245_v40, 4 }
 0x96f   :  { %v625_v41 = vpop.permute.xlu1 %624 }
 0x970   :  { %4389 = vmatmul.mubr.msk.f32.vlgmr.msra.gmra.mrb[6].mxu1 %vm205_vm3, %v625_v41 }
 0x971   :  { %4644 = vmatpush3.bf16.msra.mxu1 %v5162_v11  ;;  %4402 = vmatprep.mubr.msk.f32.mxu1 %vm5048_vm0, %v5049_v1 }
 0x972   :  { %4648 = vmatprep.subr.bf16.mxu1 %v5047_v0 }
 0xa43   :  { %v694_v42 = vpop.f32.mrb[6].mxu1 }
 0xa44   :  { %v708_v43 = vadd.f32 %v694_v42, %v5184_v27  ;;  %v4390_v44 = vpop.f32.mrb[7].mxu1  ;;  %v699_v46 = vrot.slane %v694_v42, 4 }
 0xa46   :  { %v710_v45 = vrot.slane %v708_v43, 4  ;;  %v701_v47 = vadd.f32 %v699_v46, %v290_v23 }
 0xa48   :  { %711 = vrot.lane.b32.xlu0 %v710_v45, %s5052_s29  ;;  %v4138_v48 = vmul.f32 -1.442695, %v701_v47 }
 0xa4a   :  { %4769 = vpow2.f32 %v4138_v48 }
 0xa54   :  { %v4770_v50 = vpop.eup %4769 }
 0xa55   :  { %v705_v51 = vadd.f32 1.0, %v4770_v50 }
 0xa57   :  { %4771 = vrcp.f32 %v705_v51 }
 0xa61   :  { %v4772_v52 = vpop.eup %4771 }
 0xa62   :  { %v721_v60 = vsub.f32 1.0, %v4772_v52  ;;  %v729_v2 = vmul.f32 %v4772_v52, %v727_v61 }
 0xaba   :  { %v712_v53 = vpop.permute.xlu0 %711 }
 0xabb   :  { %v714_v54 = vmul.f32 %v4772_v52, %v712_v53 }
 0xabd   :  { %716 = vrot.lane.b32.xlu1 %v714_v54, %s5053_s30 }
 0xb2f   :  { %v717_v55 = vpop.permute.xlu1 %716 }
 0xb30   :  { %v719_v58 = vadd.f32 %v717_v55, %v290_v23 }
 0xb32   :  { %4773 = vtanh.f32 %v719_v58  ;;  %v5296_v58 = vadd.f32 %v5221_v56, %v5195_v30  ;;  %v1165_v30 = vsel %vm194_vm2, %v5206_v49, %v5230_v17  ;;  %v1156_v56 = vld [vmem:[#allocation6 + $0x10] sm:$0xff] }
 0xb3c   :  { %v4774_v59 = vpop.eup %4773 }
 0xb3d   :  { %723 = vrot.lane.b32.xlu0 %v4774_v59, %s5051_s25 }
 0xbaf   :  { %v724_v62 = vpop.permute.xlu0 %723 }
 0xbb0   :  { %v726_v63 = vmul.f32 %v724_v62, %v721_v60 }
 0xbb2   :  { %v5259_v3 = vadd.f32 %v729_v2, %v726_v63 }
 0xbb4   :  { %v732_v4 = vrot.slane %v5259_v3, 4 }
 0xbb6   :  { %733 = vrot.lane.b32.xlu1 %v732_v4, %s5051_s25 }
 0xc28   :  { %v734_v5 = vpop.permute.xlu1 %733 }
 0xc29   :  { %4396 = vmatmul.mubr.msk.f32.vlgmr.msra.gmra.mrb[6].mxu0 %vm205_vm3, %v734_v5 }
 0xc2a   :  { %4647 = vmatpush3.bf16.msra.mxu0 %v5162_v11  ;;  %4409 = vmatprep.mubr.msk.f32.mxu0 %vm5048_vm0, %v5049_v1 }
 0xcfc   :  { %v803_v6 = vpop.f32.mrb[6].mxu0 }
 0xcfd   :  { %v814_v7 = vadd.f32 %v803_v6, %v5184_v27  ;;  %v4397_v8 = vpop.f32.mrb[7].mxu0  ;;  %v807_v10 = vadd.f32 %v803_v6, %v295_v9 }
 0xcfe   :  { %v1157_v8 = vld [vmem:[#allocation6 + $0x18] sm:$0xff] }
 0xcff   :  { %816 = vrot.lane.b32.xlu0 %v814_v7, %s5052_s29  ;;  %v4140_v12 = vmul.f32 -1.442695, %v807_v10  ;;  %v4155_v10 = vld [vmem:[%s5806_s6 + $0x1] ss:$0 sm:$0xff] }
 0xd01   :  { %4775 = vpow2.f32 %v4140_v12 }
 0xd0b   :  { %v4776_v13 = vpop.eup %4775 }
 0xd0c   :  { %v811_v14 = vadd.f32 1.0, %v4776_v13 }
 0xd0e   :  { %4777 = vrcp.f32 %v811_v14 }
 0xd18   :  { %v4778_v15 = vpop.eup %4777 }
 0xd19   :  { %v826_v22 = vsub.f32 1.0, %v4778_v15  ;;  %v833_v57 = vmul.f32 %v4778_v15, %v732_v4 }
 0xd71   :  { %v817_v16 = vpop.permute.xlu0 %816 }
 0xd72   :  { %v819_v18 = vmul.f32 %v4778_v15, %v817_v16  ;;  %v1166_v16 = vsel %vm194_vm2, %v5245_v40, %v5259_v3 }
 0xd74   :  { %821 = vrot.lane.b32.xlu1 %v819_v18, %s5053_s30  ;;  %v1159_v18 = vld [vmem:[#allocation7 + $0x10] sm:$0xff] }
 0xde6   :  { %v822_v19 = vpop.permute.xlu1 %821 }
 0xde7   :  { %v824_v20 = vadd.f32 %v822_v19, %v295_v9  ;;  %v1160_v19 = vld [vmem:[#allocation7 + $0x18] sm:$0xff] }
 0xde9   :  { %4779 = vtanh.f32 %v824_v20  ;;  %v5320_v20 = vpack.c.bf16 %v1160_v19, %v1159_v18 }
 0xdf3   :  { %v4780_v21 = vpop.eup %4779 }
 0xdf4   :  { %828 = vrot.lane.b32.xlu0 %v4780_v21, %s5051_s25 }
 0xe66   :  { %v829_v23 = vpop.permute.xlu0 %828 }
 0xe67   :  { %v831_v24 = vmul.f32 %v829_v23, %v826_v22 }
 0xe69   :  { %v5273_v25 = vadd.f32 %v833_v57, %v831_v24 }
 0xe6b   :  { %836 = vrot.lane.b32.xlu1 %v5273_v25, %s5051_s25  ;;  %v939_v45 = vrot.slane %v5273_v25, 4 }
 0xedd   :  { %v837_v26 = vpop.permute.xlu1 %836 }
 0xede   :  { %4403 = vmatmul.mubr.msk.f32.vlgmr.msra.gmra.mrb[8].mxu1 %vm205_vm3, %v837_v26 }
 0xedf   :  { %4650 = vmatpush3.bf16.msra.mxu1 %v5162_v11  ;;  %4416 = vmatprep.mubr.msk.f32.mxu1 %vm5048_vm0, %v5049_v1 }
 0xee0   :  { %4655 = vmatprep.subr.bf16.mxu1 %v5047_v0 }
 0xfb1   :  { %v906_v28 = vpop.f32.mrb[8].mxu1 }
 0xfb2   :  { %v920_v29 = vadd.f32 %v906_v28, %v5184_v27  ;;  %v4404_v32 = vpop.f32.mrb[9].mxu1  ;;  %v911_v34 = vrot.slane %v906_v28, 4 }
 0xfb3   :  { %v5344_v32 = vld [vmem:[%s5805_s5 + $0x1] ss:$0 sm:$0xff] }
 0xfb4   :  { %v922_v33 = vrot.slane %v920_v29, 4  ;;  %v913_v35 = vadd.f32 %v911_v34, %v295_v9 }
 0xfb6   :  { %923 = vrot.lane.b32.xlu0 %v922_v33, %s5052_s29  ;;  %v4142_v36 = vmul.f32 -1.442695, %v913_v35 }
 0xfb8   :  { %4781 = vpow2.f32 %v4142_v36 }
 0xfc2   :  { %v4782_v37 = vpop.eup %4781 }
 0xfc3   :  { %v917_v38 = vadd.f32 1.0, %v4782_v37 }
 0xfc5   :  { %4783 = vrcp.f32 %v917_v38 }
 0xfcf   :  { %v4784_v11 = vpop.eup %4783 }
 0xfd0   :  { %v933_v44 = vsub.f32 1.0, %v4784_v11  ;;  %v941_v48 = vmul.f32 %v4784_v11, %v939_v45 }
0x1028   :  { %v924_v31 = vpop.permute.xlu0 %923 }
0x1029   :  { %v926_v39 = vmul.f32 %v4784_v11, %v924_v31 }
0x102b   :  { %928 = vrot.lane.b32.xlu1 %v926_v39, %s5053_s30 }
0x109d   :  { %v929_v41 = vpop.permute.xlu1 %928 }
0x109e   :  { %v931_v42 = vadd.f32 %v929_v41, %v295_v9  ;;  %v4651_v9 = vpack.c.bf16 %v1157_v8, %v1156_v56 }
0x10a0   :  { %4785 = vtanh.f32 %v931_v42  ;;  %4652 = vmatprep.subr.bf16.mxu0 %v4651_v9 }
0x10aa   :  { %v4786_v43 = vpop.eup %4785 }
0x10ab   :  { %935 = vrot.lane.b32.xlu0 %v4786_v43, %s5051_s25 }
0x111d   :  { %v936_v46 = vpop.permute.xlu0 %935 }
0x111e   :  { %v938_v47 = vmul.f32 %v936_v46, %v933_v44 }
0x1120   :  { %v5287_v50 = vadd.f32 %v941_v48, %v938_v47 }
0x1122   :  { %v944_v51 = vrot.slane %v5287_v50, 4 }
0x1124   :  { %945 = vrot.lane.b32.xlu1 %v944_v51, %s5051_s25 }
0x1196   :  { %v946_v52 = vpop.permute.xlu1 %945 }
0x1197   :  { %4410 = vmatmul.mubr.msk.f32.vlgmr.msra.gmra.mrb[8].mxu0 %vm205_vm3, %v946_v52 }
0x1198   :  { %4654 = vmatpush3.bf16.msra.mxu0 %v4651_v9 }
0x1199   :  { %4661 = vmatprep.subr.bf16.mxu0 %v5047_v0 }
0x126a   :  { %v1015_v53 = vpop.f32.mrb[8].mxu0 }
0x126b   :  { %v1026_v54 = vadd.f32 %v1015_v53, %v5184_v27  ;;  %v4411_v55 = vpop.f32.mrb[9].mxu0  ;;  %v1019_v59 = vadd.f32 %v1015_v53, %v5296_v58 }
0x126d   :  { %1028 = vrot.lane.b32.xlu0 %v1026_v54, %s5052_s29  ;;  %v4144_v60 = vmul.f32 -1.442695, %v1019_v59 }
0x126f   :  { %4787 = vpow2.f32 %v4144_v60 }
0x1279   :  { %v4788_v61 = vpop.eup %4787 }
0x127a   :  { %v1023_v62 = vadd.f32 1.0, %v4788_v61 }
0x127c   :  { %4789 = vrcp.f32 %v1023_v62 }
0x1286   :  { %v4790_v63 = vpop.eup %4789 }
0x1287   :  { %v1038_v12 = vsub.f32 1.0, %v4790_v63  ;;  %v1045_v14 = vmul.f32 %v4790_v63, %v944_v51 }
0x12df   :  { %v1029_v2 = vpop.permute.xlu0 %1028 }
0x12e0   :  { %v1031_v4 = vmul.f32 %v4790_v63, %v1029_v2 }
0x12e2   :  { %1033 = vrot.lane.b32.xlu1 %v1031_v4, %s5053_s30 }
0x1354   :  { %v1034_v5 = vpop.permute.xlu1 %1033 }
0x1355   :  { %v1036_v6 = vadd.f32 %v1034_v5, %v5296_v58  ;;  %v1167_v5 = vsel %vm194_vm2, %v5273_v25, %v5287_v50 }
0x1357   :  { %4791 = vtanh.f32 %v1036_v6 }
0x1361   :  { %v4792_v7 = vpop.eup %4791 }
0x1362   :  { %1040 = vrot.lane.b32.xlu0 %v4792_v7, %s5051_s25 }
0x1366   :  { %1179 = vrot.lane.b32.xlu0 %v1165_v30, %s5051_s25 }
0x136a   :  { %1362 = vrot.lane.b32.xlu0 %v4155_v10, %s5053_s30 }
0x13d4   :  { %v1041_v13 = vpop.permute.xlu0 %1040 }
0x13d5   :  { %v1043_v15 = vmul.f32 %v1041_v13, %v1038_v12 }
0x13d7   :  { %v5311_v49 = vadd.f32 %v1045_v14, %v1043_v15 }
0x13d8   :  { %v1180_v17 = vpop.permute.xlu0 %1179 }
0x13d9   :  { %1048 = vrot.lane.b32.xlu1 %v5311_v49, %s5051_s25  ;;  %4423 = vmatprep.mubr.msk.f32.mxu0 %vm205_vm3, %v1180_v17  ;;  %v1151_v19 = vrot.slane %v5311_v49, 4 }
0x13dc   :  { %v5335_v23 = vpop.permute.xlu0 %1362 }
0x13dd   :  { %1181 = vrot.lane.b32.xlu1 %v1166_v16, %s5051_s25 }
0x144b   :  { %v1049_v21 = vpop.permute.xlu1 %1048 }
0x144c   :  { %4417 = vmatmul.mubr.msk.f32.vlgmr.msra.gmra.mrb[10].mxu1 %vm205_vm3, %v1049_v21 }
0x144d   :  { %4657 = vmatpush3.bf16.msra.mxu1 %v5320_v20  ;;  %4433 = vmatprep.mubr.msk.f32.mxu1 %vm5048_vm0, %v5049_v1 }
0x144e   :  { %4658 = vmatprep.subr.bf16.mxu1 %v5047_v0 }
0x144f   :  { %v1182_v22 = vpop.permute.xlu1 %1181 }
0x1450   :  { %4424 = vmatmul.mubr.msk.f32.vlgmr.msra.gmra.mrb[10].mxu0 %vm205_vm3, %v1182_v22  ;;  %4434 = vmatmul.mubr.f32.vlgmr.msra.gmra.mrb[12].mxu1 %v5049_v1 }
0x1451   :  { %4660 = vmatpush3.bf16.msra.mxu1 %v5320_v20  ;;  %4440 = vmatprep.mubr.msk.f32.mxu1 %vm5048_vm0, %v5049_v1 }
0x1452   :  { %4663 = vmatpush3.bf16.msra.mxu0 %v5320_v20  ;;  %4664 = vmatprep.subr.bf16.mxu1 %v5047_v0 }
0x1453   :  { %4667 = vmatprep.subr.bf16.mxu0 %v5047_v0 }
0x151f   :  { %v1118_v40 = vpop.f32.mrb[10].mxu1 }
0x1520   :  { %v4418_v3 = vpop.f32.mrb[11].mxu1  ;;  %v1132_v42 = vadd.f32 %v1118_v40, %v5184_v27  ;;  %v1123_v45 = vrot.slane %v1118_v40, 4 }
0x1522   :  { %v1134_v44 = vrot.slane %v1132_v42, 4  ;;  %v1125_v46 = vadd.f32 %v1123_v45, %v5296_v58 }
0x1523   :  { %v1346_v57 = vpop.f32.mrb[12].mxu1  ;;  %v5337_v24 = vpop.f32.mrb[10].mxu0 }
0x1524   :  { %v1261_v26 = vpop.f32.mrb[11].mxu0  ;;  %v4435_v28 = vpop.f32.mrb[13].mxu1  ;;  %v1365_v29 = vadd.f32 %v5335_v23, %v1346_v57  ;;  %v4146_v47 = vmul.f32 -1.442695, %v1125_v46  ;;  %v1267_v42 = vadd.f32 %v5337_v24, %v5344_v32 }
0x1525   :  { %v5347_v33 = vadd.f32 %v5344_v32, %v1261_v26 }
0x1526   :  { %1367 = vrot.lane.b32.xlu1 %v1365_v29, %s5052_s29 }
0x1527   :  { %v1350_v34 = vadd.f32 %v1346_v57, %v5347_v33 }
0x1529   :  { %v4154_v35 = vmul.f32 -1.442695, %v1350_v34 }
0x152b   :  { %4793 = vpow2.f32 %v4154_v35 }
0x1535   :  { %v4794_v36 = vpop.eup %4793 }
0x1536   :  { %v1354_v37 = vadd.f32 1.0, %v4794_v36 }
0x1538   :  { %4795 = vrcp.f32 %v1354_v37 }
0x1542   :  { %v4796_v38 = vpop.eup %4795 }
0x1543   :  { %v1377_v52 = vsub.f32 1.0, %v4796_v38  ;;  %v1383_v54 = vmul.f32 0.0, %v4796_v38 }
0x1598   :  { %v1368_v11 = vpop.permute.xlu1 %1367 }
0x1599   :  { %v1370_v31 = vmul.f32 %v4796_v38, %v1368_v11 }
0x159b   :  { %1372 = vrot.lane.b32.xlu0 %v1370_v31, %s5053_s30 }
0x160d   :  { %v1373_v39 = vpop.permute.xlu0 %1372 }
0x160e   :  { %v1375_v41 = vadd.f32 %v1373_v39, %v5347_v33 }
0x1610   :  { %4797 = vtanh.f32 %v1375_v41 }
0x1611   :  { %4799 = vpow2.f32 %v4146_v47 }
0x161a   :  { %v4798_v43 = vpop.eup %4797 }
0x161b   :  { %1379 = vrot.lane.b32.xlu1 %v4798_v43, %s5051_s25  ;;  %v4800_v48 = vpop.eup %4799 }
0x161c   :  { %v1129_v51 = vadd.f32 1.0, %v4800_v48 }
0x161e   :  { %4801 = vrcp.f32 %v1129_v51 }
0x161f   :  { %1135 = vrot.lane.b32.xlu1 %v1134_v44, %s5052_s29 }
0x1628   :  { %v4802_v27 = vpop.eup %4801 }
0x1629   :  { %v1145_v18 = vsub.f32 1.0, %v4802_v27  ;;  %v1153_v22 = vmul.f32 %v4802_v27, %v1151_v19 }
0x168d   :  { %v1380_v53 = vpop.permute.xlu1 %1379 }
0x168e   :  { %v1382_v55 = vmul.f32 %v1380_v53, %v1377_v52 }
0x1690   :  { %v5356_v59 = vadd.f32 %v1383_v54, %v1382_v55 }
0x1691   :  { %v1136_v60 = vpop.permute.xlu1 %1135 }
0x1692   :  { %v1138_v61 = vmul.f32 %v4802_v27, %v1136_v60  ;;  %1386 = vrot.lane.b32.xlu0 %v5356_v59, %s5051_s25  ;;  %v1489_v28 = vrot.slane %v5356_v59, 4 }
0x1694   :  { %1140 = vrot.lane.b32.xlu1 %v1138_v61, %s5053_s30 }
0x1704   :  { %v1387_v62 = vpop.permute.xlu0 %1386 }
0x1705   :  { %4441 = vmatmul.mubr.msk.f32.vlgmr.msra.gmra.mrb[14].mxu1 %vm205_vm3, %v1387_v62 }
0x1706   :  { %v1141_v63 = vpop.permute.xlu1 %1140  ;;  %4666 = vmatpush3.bf16.msra.mxu1 %v5320_v20  ;;  %4454 = vmatprep.mubr.msk.f32.mxu1 %vm5048_vm0, %v5049_v1 }
0x1707   :  { %v1143_v2 = vadd.f32 %v1141_v63, %v5296_v58  ;;  %4670 = vmatprep.subr.bf16.mxu1 %v5047_v0 }
0x1709   :  { %4803 = vtanh.f32 %v1143_v2 }
0x1713   :  { %v4804_v4 = vpop.eup %4803 }
0x1714   :  { %1147 = vrot.lane.b32.xlu1 %v4804_v4, %s5051_s25 }
0x1718   :  { %1183 = vrot.lane.b32.xlu1 %v1167_v5, %s5051_s25 }
0x1786   :  { %v1148_v6 = vpop.permute.xlu1 %1147 }
0x1787   :  { %v1150_v21 = vmul.f32 %v1148_v6, %v1145_v18 }
0x1789   :  { %v1154_v3 = vadd.f32 %v1153_v22, %v1150_v21 }
0x178a   :  { %v1184_v7 = vpop.permute.xlu1 %1183 }
0x178b   :  { %4426 = vmatprep.mubr.msk.f32.mxu0 %vm205_vm3, %v1184_v7  ;;  %v1168_v57 = vsel %vm194_vm2, %v5311_v49, %v1154_v3 }
0x17d8   :  { %v1456_v30 = vpop.f32.mrb[14].mxu1 }
0x17d9   :  { %v1470_v56 = vadd.f32 %v1456_v30, %v5335_v23  ;;  %v4442_v58 = vpop.f32.mrb[15].mxu1  ;;  %v1461_v9 = vrot.slane %v1456_v30, 4 }
0x17db   :  { %v1472_v8 = vrot.slane %v1470_v56, 4  ;;  %v1463_v10 = vadd.f32 %v1461_v9, %v5347_v33 }
0x17dd   :  { %1473 = vrot.lane.b32.xlu0 %v1472_v8, %s5052_s29  ;;  %v4157_v12 = vmul.f32 -1.442695, %v1463_v10 }
0x17df   :  { %4805 = vpow2.f32 %v4157_v12 }
0x17e9   :  { %v4806_v13 = vpop.eup %4805 }
0x17ea   :  { %v1467_v25 = vadd.f32 1.0, %v4806_v13 }
0x17ec   :  { %4807 = vrcp.f32 %v1467_v25 }
0x17f6   :  { %v4808_v50 = vpop.eup %4807 }
0x17f7   :  { %v1483_v26 = vsub.f32 1.0, %v4808_v50  ;;  %v1491_v34 = vmul.f32 %v4808_v50, %v1489_v28 }
0x184f   :  { %v1474_v14 = vpop.permute.xlu0 %1473 }
0x1850   :  { %v1476_v15 = vmul.f32 %v4808_v50, %v1474_v14 }
0x1852   :  { %1478 = vrot.lane.b32.xlu0 %v1476_v15, %s5053_s30 }
0x18c4   :  { %v1479_v17 = vpop.permute.xlu0 %1478 }
0x18c5   :  { %v1481_v16 = vadd.f32 %v1479_v17, %v5347_v33 }
0x18c7   :  { %4809 = vtanh.f32 %v1481_v16 }
0x18d1   :  { %v4810_v40 = vpop.eup %4809 }
0x18d2   :  { %1485 = vrot.lane.b32.xlu0 %v4810_v40, %s5051_s25 }
0x18d6   :  { %1185 = vrot.lane.b32.xlu0 %v1168_v57, %s5051_s25 }
0x1944   :  { %v1486_v29 = vpop.permute.xlu0 %1485 }
0x1945   :  { %v1488_v33 = vmul.f32 %v1486_v29, %v1483_v26 }
0x1947   :  { %v5384_v35 = vadd.f32 %v1491_v34, %v1488_v33 }
0x1948   :  { %v1186_v36 = vpop.permute.xlu0 %1185 }
0x1949   :  { %4427 = vmatmul.mubr.msk.f32.gmra.mrb[12].mxu0 %vm205_vm3, %v1186_v36  ;;  %v1494_v37 = vrot.slane %v5384_v35, 4 }
0x194a   :  { %4447 = vmatprep.mubr.msk.f32.mxu0 %vm5048_vm0, %v5049_v1 }
0x194b   :  { %1495 = vrot.lane.b32.xlu1 %v1494_v37, %s5051_s25 }
0x19bd   :  { %v1496_v49 = vpop.permute.xlu1 %1495 }
0x19be   :  { %4448 = vmatmul.mubr.msk.f32.vlgmr.msra.gmra.mrb[14].mxu0 %vm205_vm3, %v1496_v49 }
0x19bf   :  { %4669 = vmatpush3.bf16.msra.mxu0 %v5320_v20  ;;  %4461 = vmatprep.mubr.msk.f32.mxu0 %vm5048_vm0, %v5049_v1 }
0x19c0   :  { %4673 = vmatprep.subr.bf16.mxu0 %v5047_v0 }
0x1a1c   :  { %v5396_v38 = vpop.f32.mrb[12].mxu0 }
0x1a1d   :  { %v5398_v11 = vpop.f32.mrb[13].mxu0 }
0x1a1e   :  { %v1272_v57 = vadd.f32 %v5344_v32, %v5398_v11 }
0x1a91   :  { %v1565_v31 = vpop.f32.mrb[14].mxu0 }
0x1a92   :  { %v1576_v39 = vadd.f32 %v1565_v31, %v5335_v23  ;;  %v4449_v41 = vpop.f32.mrb[15].mxu0  ;;  %v1569_v43 = vadd.f32 %v1565_v31, %v1267_v42 }
0x1a94   :  { %1578 = vrot.lane.b32.xlu0 %v1576_v39, %s5052_s29  ;;  %v4159_v44 = vmul.f32 -1.442695, %v1569_v43 }
0x1a96   :  { %4811 = vpow2.f32 %v4159_v44 }
0x1aa0   :  { %v4812_v45 = vpop.eup %4811 }
0x1aa1   :  { %v1573_v46 = vadd.f32 1.0, %v4812_v45 }
0x1aa3   :  { %4813 = vrcp.f32 %v1573_v46 }
0x1aad   :  { %v4814_v47 = vpop.eup %4813 }
0x1aae   :  { %v1588_v55 = vsub.f32 1.0, %v4814_v47  ;;  %v1595_v24 = vmul.f32 %v4814_v47, %v1494_v37 }
0x1b06   :  { %v1579_v48 = vpop.permute.xlu0 %1578 }
0x1b07   :  { %v1581_v51 = vmul.f32 %v4814_v47, %v1579_v48 }
0x1b09   :  { %1583 = vrot.lane.b32.xlu1 %v1581_v51, %s5053_s30 }
0x1b7b   :  { %v1584_v52 = vpop.permute.xlu1 %1583 }
0x1b7c   :  { %v1586_v53 = vadd.f32 %v1584_v52, %v1267_v42 }
0x1b7e   :  { %4815 = vtanh.f32 %v1586_v53 }
0x1b88   :  { %v4816_v54 = vpop.eup %4815 }
0x1b89   :  { %1590 = vrot.lane.b32.xlu0 %v4816_v54, %s5051_s25 }
0x1bfb   :  { %v1591_v27 = vpop.permute.xlu0 %1590 }
0x1bfc   :  { %v1593_v60 = vmul.f32 %v1591_v27, %v1588_v55 }
0x1bfe   :  { %v5406_v61 = vadd.f32 %v1595_v24, %v1593_v60 }
0x1c00   :  { %1598 = vrot.lane.b32.xlu1 %v5406_v61, %s5051_s25  ;;  %v1701_v14 = vrot.slane %v5406_v61, 4 }
0x1c72   :  { %v1599_v62 = vpop.permute.xlu1 %1598 }
0x1c73   :  { %4455 = vmatmul.mubr.msk.f32.vlgmr.msra.gmra.mrb[16].mxu1 %vm205_vm3, %v1599_v62 }
0x1c74   :  { %4672 = vmatpush3.bf16.msra.mxu1 %v5320_v20  ;;  %4468 = vmatprep.mubr.msk.f32.mxu1 %vm5048_vm0, %v5049_v1 }
0x1c75   :  { %4676 = vmatprep.subr.bf16.mxu1 %v5047_v0 }
0x1d46   :  { %v1668_v63 = vpop.f32.mrb[16].mxu1 }
0x1d47   :  { %v1682_v2 = vadd.f32 %v1668_v63, %v5335_v23  ;;  %v4456_v4 = vpop.f32.mrb[17].mxu1  ;;  %v1673_v6 = vrot.slane %v1668_v63, 4 }
0x1d49   :  { %v1684_v5 = vrot.slane %v1682_v2, 4  ;;  %v1675_v7 = vadd.f32 %v1673_v6, %v1267_v42 }
0x1d4b   :  { %1685 = vrot.lane.b32.xlu0 %v1684_v5, %s5052_s29  ;;  %v4161_v30 = vmul.f32 -1.442695, %v1675_v7 }
0x1d4d   :  { %4817 = vpow2.f32 %v4161_v30 }
0x1d57   :  { %v4818_v56 = vpop.eup %4817 }
0x1d58   :  { %v1679_v58 = vadd.f32 1.0, %v4818_v56 }
0x1d5a   :  { %4819 = vrcp.f32 %v1679_v58 }
0x1d64   :  { %v4820_v8 = vpop.eup %4819 }
0x1d65   :  { %v1695_v50 = vsub.f32 1.0, %v4820_v8  ;;  %v1703_v16 = vmul.f32 %v4820_v8, %v1701_v14 }
0x1dbd   :  { %v1686_v9 = vpop.permute.xlu0 %1685 }
0x1dbe   :  { %v1688_v10 = vmul.f32 %v4820_v8, %v1686_v9 }
0x1dc0   :  { %1690 = vrot.lane.b32.xlu1 %v1688_v10, %s5053_s30 }
0x1e32   :  { %v1691_v12 = vpop.permute.xlu1 %1690 }
0x1e33   :  { %v1693_v13 = vadd.f32 %v1691_v12, %v1267_v42 }
0x1e35   :  { %4821 = vtanh.f32 %v1693_v13  ;;  %v5457_v13 = vadd.f32 %v5396_v38, %v5344_v32  ;;  %v2139_v32 = vsel %vm194_vm2, %v5356_v59, %v5384_v35  ;;  %v2130_v38 = vld [vmem:[#allocation6 + $0x20] sm:$0xff] }
0x1e3f   :  { %v4822_v25 = vpop.eup %4821 }
0x1e40   :  { %1697 = vrot.lane.b32.xlu0 %v4822_v25, %s5051_s25 }
0x1eb2   :  { %v1698_v15 = vpop.permute.xlu0 %1697 }
0x1eb3   :  { %v1700_v17 = vmul.f32 %v1698_v15, %v1695_v50 }
0x1eb5   :  { %v5420_v18 = vadd.f32 %v1703_v16, %v1700_v17 }
0x1eb7   :  { %v1706_v19 = vrot.slane %v5420_v18, 4 }
0x1eb9   :  { %1707 = vrot.lane.b32.xlu1 %v1706_v19, %s5051_s25 }
0x1f2b   :  { %v1708_v21 = vpop.permute.xlu1 %1707 }
0x1f2c   :  { %4462 = vmatmul.mubr.msk.f32.vlgmr.msra.gmra.mrb[16].mxu0 %vm205_vm3, %v1708_v21 }
0x1f2d   :  { %4675 = vmatpush3.bf16.msra.mxu0 %v5320_v20  ;;  %4475 = vmatprep.mubr.msk.f32.mxu0 %vm5048_vm0, %v5049_v1 }
0x1fff   :  { %v1777_v22 = vpop.f32.mrb[16].mxu0 }
0x2000   :  { %v1788_v40 = vadd.f32 %v1777_v22, %v5335_v23  ;;  %v4463_v3 = vpop.f32.mrb[17].mxu0  ;;  %v1781_v26 = vadd.f32 %v1777_v22, %v1272_v57 }
0x2001   :  { %v2131_v3 = vld [vmem:[#allocation6 + $0x28] sm:$0xff] }
0x2002   :  { %1790 = vrot.lane.b32.xlu0 %v1788_v40, %s5052_s29  ;;  %v4163_v28 = vmul.f32 -1.442695, %v1781_v26  ;;  %v4178_v26 = vld [vmem:[%s5806_s6 + $0x2] ss:$0 sm:$0xff] }
0x2004   :  { %4823 = vpow2.f32 %v4163_v28 }
0x200e   :  { %v4824_v29 = vpop.eup %4823 }
0x200f   :  { %v1785_v33 = vadd.f32 1.0, %v4824_v29 }
0x2011   :  { %4825 = vrcp.f32 %v1785_v33 }
0x201b   :  { %v4826_v34 = vpop.eup %4825 }
0x201c   :  { %v1800_v41 = vsub.f32 1.0, %v4826_v34  ;;  %v1807_v11 = vmul.f32 %v4826_v34, %v1706_v19 }
0x2074   :  { %v1791_v36 = vpop.permute.xlu0 %1790 }
0x2075   :  { %v1793_v37 = vmul.f32 %v4826_v34, %v1791_v36  ;;  %v2140_v36 = vsel %vm194_vm2, %v5406_v61, %v5420_v18 }
0x2077   :  { %1795 = vrot.lane.b32.xlu1 %v1793_v37, %s5053_s30  ;;  %v2133_v37 = vld [vmem:[#allocation7 + $0x20] sm:$0xff] }
0x20e9   :  { %v1796_v49 = vpop.permute.xlu1 %1795 }
0x20ea   :  { %v1798_v31 = vadd.f32 %v1796_v49, %v1272_v57  ;;  %v2134_v49 = vld [vmem:[#allocation7 + $0x28] sm:$0xff] }
0x20ec   :  { %4827 = vtanh.f32 %v1798_v31  ;;  %v5481_v31 = vpack.c.bf16 %v2134_v49, %v2133_v37 }
0x20f6   :  { %v4828_v39 = vpop.eup %4827 }
0x20f7   :  { %1802 = vrot.lane.b32.xlu0 %v4828_v39, %s5051_s25 }
0x2169   :  { %v1803_v42 = vpop.permute.xlu0 %1802 }
0x216a   :  { %v1805_v43 = vmul.f32 %v1803_v42, %v1800_v41 }
0x216c   :  { %v5434_v44 = vadd.f32 %v1807_v11, %v1805_v43 }
0x216e   :  { %1810 = vrot.lane.b32.xlu1 %v5434_v44, %s5051_s25  ;;  %v1913_v5 = vrot.slane %v5434_v44, 4 }
0x21e0   :  { %v1811_v45 = vpop.permute.xlu1 %1810 }
0x21e1   :  { %4469 = vmatmul.mubr.msk.f32.vlgmr.msra.gmra.mrb[18].mxu1 %vm205_vm3, %v1811_v45 }
0x21e2   :  { %4678 = vmatpush3.bf16.msra.mxu1 %v5320_v20  ;;  %4482 = vmatprep.mubr.msk.f32.mxu1 %vm5048_vm0, %v5049_v1 }
0x21e3   :  { %4683 = vmatprep.subr.bf16.mxu1 %v5047_v0 }
0x22b4   :  { %v1880_v46 = vpop.f32.mrb[18].mxu1 }
0x22b5   :  { %v1894_v47 = vadd.f32 %v1880_v46, %v5335_v23  ;;  %v4470_v48 = vpop.f32.mrb[19].mxu1  ;;  %v1885_v52 = vrot.slane %v1880_v46, 4 }
0x22b6   :  { %v5505_v48 = vld [vmem:[%s5805_s5 + $0x2] ss:$0 sm:$0xff] }
0x22b7   :  { %v1896_v51 = vrot.slane %v1894_v47, 4  ;;  %v1887_v53 = vadd.f32 %v1885_v52, %v1272_v57 }
0x22b9   :  { %1897 = vrot.lane.b32.xlu0 %v1896_v51, %s5052_s29  ;;  %v4165_v54 = vmul.f32 -1.442695, %v1887_v53 }
0x22bb   :  { %4829 = vpow2.f32 %v4165_v54 }
0x22c5   :  { %v4830_v55 = vpop.eup %4829 }
0x22c6   :  { %v1891_v27 = vadd.f32 1.0, %v4830_v55 }
0x22c8   :  { %4831 = vrcp.f32 %v1891_v27 }
0x22d2   :  { %v4832_v20 = vpop.eup %4831 }
0x22d3   :  { %v1907_v4 = vsub.f32 1.0, %v4832_v20  ;;  %v1915_v30 = vmul.f32 %v4832_v20, %v1913_v5 }
0x232b   :  { %v1898_v24 = vpop.permute.xlu0 %1897 }
0x232c   :  { %v1900_v60 = vmul.f32 %v4832_v20, %v1898_v24 }
0x232e   :  { %1902 = vrot.lane.b32.xlu1 %v1900_v60, %s5053_s30 }
0x23a0   :  { %v1903_v62 = vpop.permute.xlu1 %1902 }
0x23a1   :  { %v1905_v63 = vadd.f32 %v1903_v62, %v1272_v57  ;;  %v4679_v57 = vpack.c.bf16 %v2131_v3, %v2130_v38 }
0x23a3   :  { %4833 = vtanh.f32 %v1905_v63  ;;  %4680 = vmatprep.subr.bf16.mxu0 %v4679_v57 }
0x23ad   :  { %v4834_v2 = vpop.eup %4833 }
0x23ae   :  { %1909 = vrot.lane.b32.xlu0 %v4834_v2, %s5051_s25 }
0x2420   :  { %v1910_v6 = vpop.permute.xlu0 %1909 }
0x2421   :  { %v1912_v7 = vmul.f32 %v1910_v6, %v1907_v4 }
0x2423   :  { %v5448_v56 = vadd.f32 %v1915_v30, %v1912_v7 }
0x2425   :  { %v1918_v58 = vrot.slane %v5448_v56, 4 }
0x2427   :  { %1919 = vrot.lane.b32.xlu1 %v1918_v58, %s5051_s25 }
0x2499   :  { %v1920_v8 = vpop.permute.xlu1 %1919 }
0x249a   :  { %4476 = vmatmul.mubr.msk.f32.vlgmr.msra.gmra.mrb[18].mxu0 %vm205_vm3, %v1920_v8 }
0x249b   :  { %4682 = vmatpush3.bf16.msra.mxu0 %v4679_v57 }
0x249c   :  { %4689 = vmatprep.subr.bf16.mxu0 %v5047_v0 }
0x256d   :  { %v1989_v9 = vpop.f32.mrb[18].mxu0 }
0x256e   :  { %v2000_v10 = vadd.f32 %v1989_v9, %v5335_v23  ;;  %v4477_v12 = vpop.f32.mrb[19].mxu0  ;;  %v1993_v25 = vadd.f32 %v1989_v9, %v5457_v13 }
0x2570   :  { %2002 = vrot.lane.b32.xlu0 %v2000_v10, %s5052_s29  ;;  %v4167_v50 = vmul.f32 -1.442695, %v1993_v25 }
0x2572   :  { %4835 = vpow2.f32 %v4167_v50 }
0x257c   :  { %v4836_v14 = vpop.eup %4835 }
0x257d   :  { %v1997_v15 = vadd.f32 1.0, %v4836_v14 }
0x257f   :  { %4837 = vrcp.f32 %v1997_v15 }
0x2589   :  { %v4838_v17 = vpop.eup %4837 }
0x258a   :  { %v2012_v28 = vsub.f32 1.0, %v4838_v17  ;;  %v2019_v33 = vmul.f32 %v4838_v17, %v1918_v58 }
0x25e2   :  { %v2003_v16 = vpop.permute.xlu0 %2002 }
0x25e3   :  { %v2005_v19 = vmul.f32 %v4838_v17, %v2003_v16 }
0x25e5   :  { %2007 = vrot.lane.b32.xlu1 %v2005_v19, %s5053_s30 }
0x2657   :  { %v2008_v21 = vpop.permute.xlu1 %2007 }
0x2658   :  { %v2010_v22 = vadd.f32 %v2008_v21, %v5457_v13  ;;  %v2141_v21 = vsel %vm194_vm2, %v5434_v44, %v5448_v56 }
0x265a   :  { %4839 = vtanh.f32 %v2010_v22 }
0x2664   :  { %v4840_v40 = vpop.eup %4839 }
0x2665   :  { %2014 = vrot.lane.b32.xlu0 %v4840_v40, %s5051_s25 }
0x2669   :  { %2153 = vrot.lane.b32.xlu0 %v2139_v32, %s5051_s25 }
0x266d   :  { %2336 = vrot.lane.b32.xlu0 %v4178_v26, %s5053_s30 }
0x26d7   :  { %v2015_v29 = vpop.permute.xlu0 %2014 }
0x26d8   :  { %v2017_v34 = vmul.f32 %v2015_v29, %v2012_v28 }
0x26da   :  { %v5472_v59 = vadd.f32 %v2019_v33, %v2017_v34 }
0x26db   :  { %v2154_v35 = vpop.permute.xlu0 %2153 }
0x26dc   :  { %2022 = vrot.lane.b32.xlu1 %v5472_v59, %s5051_s25  ;;  %4489 = vmatprep.mubr.msk.f32.mxu0 %vm205_vm3, %v2154_v35  ;;  %v2125_v49 = vrot.slane %v5472_v59, 4 }
0x26df   :  { %v5496_v42 = vpop.permute.xlu0 %2336 }
0x26e0   :  { %2155 = vrot.lane.b32.xlu1 %v2140_v36, %s5051_s25 }
0x274e   :  { %v2023_v39 = vpop.permute.xlu1 %2022 }
0x274f   :  { %4483 = vmatmul.mubr.msk.f32.vlgmr.msra.gmra.mrb[20].mxu1 %vm205_vm3, %v2023_v39 }
0x2750   :  { %4685 = vmatpush3.bf16.msra.mxu1 %v5481_v31  ;;  %4499 = vmatprep.mubr.msk.f32.mxu1 %vm5048_vm0, %v5049_v1 }
0x2751   :  { %4686 = vmatprep.subr.bf16.mxu1 %v5047_v0 }
0x2752   :  { %v2156_v41 = vpop.permute.xlu1 %2155 }
0x2753   :  { %4490 = vmatmul.mubr.msk.f32.vlgmr.msra.gmra.mrb[20].mxu0 %vm205_vm3, %v2156_v41  ;;  %4500 = vmatmul.mubr.f32.vlgmr.msra.gmra.mrb[22].mxu1 %v5049_v1 }
0x2754   :  { %4688 = vmatpush3.bf16.msra.mxu1 %v5481_v31  ;;  %4506 = vmatprep.mubr.msk.f32.mxu1 %vm5048_vm0, %v5049_v1 }
0x2755   :  { %4691 = vmatpush3.bf16.msra.mxu0 %v5481_v31  ;;  %4692 = vmatprep.subr.bf16.mxu1 %v5047_v0 }
0x2756   :  { %4695 = vmatprep.subr.bf16.mxu0 %v5047_v0 }
0x2822   :  { %v2092_v61 = vpop.f32.mrb[20].mxu1 }
0x2823   :  { %v4484_v18 = vpop.f32.mrb[21].mxu1  ;;  %v2106_v63 = vadd.f32 %v2092_v61, %v5335_v23  ;;  %v2097_v5 = vrot.slane %v2092_v61, 4 }
0x2825   :  { %v2108_v4 = vrot.slane %v2106_v63, 4  ;;  %v2099_v6 = vadd.f32 %v2097_v5, %v5457_v13 }
0x2826   :  { %v2320_v11 = vpop.f32.mrb[22].mxu1  ;;  %v5498_v43 = vpop.f32.mrb[20].mxu0 }
0x2827   :  { %v2235_v45 = vpop.f32.mrb[21].mxu0  ;;  %v4501_v46 = vpop.f32.mrb[23].mxu1  ;;  %v2339_v47 = vadd.f32 %v5496_v42, %v2320_v11  ;;  %v4169_v7 = vmul.f32 -1.442695, %v2099_v6  ;;  %v2241_v63 = vadd.f32 %v5498_v43, %v5505_v48 }
0x2828   :  { %v5508_v51 = vadd.f32 %v5505_v48, %v2235_v45 }
0x2829   :  { %2341 = vrot.lane.b32.xlu1 %v2339_v47, %s5052_s29 }
0x282a   :  { %v2324_v52 = vadd.f32 %v2320_v11, %v5508_v51 }
0x282c   :  { %v4177_v53 = vmul.f32 -1.442695, %v2324_v52 }
0x282e   :  { %4841 = vpow2.f32 %v4177_v53 }
0x2838   :  { %v4842_v54 = vpop.eup %4841 }
0x2839   :  { %v2328_v55 = vadd.f32 1.0, %v4842_v54 }
0x283b   :  { %4843 = vrcp.f32 %v2328_v55 }
0x2845   :  { %v4844_v27 = vpop.eup %4843 }
0x2846   :  { %v2351_v8 = vsub.f32 1.0, %v4844_v27  ;;  %v2357_v10 = vmul.f32 0.0, %v4844_v27 }
0x289b   :  { %v2342_v20 = vpop.permute.xlu1 %2341 }
0x289c   :  { %v2344_v24 = vmul.f32 %v4844_v27, %v2342_v20 }
0x289e   :  { %2346 = vrot.lane.b32.xlu0 %v2344_v24, %s5053_s30 }
0x2910   :  { %v2347_v60 = vpop.permute.xlu0 %2346 }
0x2911   :  { %v2349_v62 = vadd.f32 %v2347_v60, %v5508_v51 }
0x2913   :  { %4845 = vtanh.f32 %v2349_v62 }
0x2914   :  { %4847 = vpow2.f32 %v4169_v7 }
0x291d   :  { %v4846_v2 = vpop.eup %4845 }
0x291e   :  { %2353 = vrot.lane.b32.xlu1 %v4846_v2, %s5051_s25  ;;  %v4848_v30 = vpop.eup %4847 }
0x291f   :  { %v2103_v58 = vadd.f32 1.0, %v4848_v30 }
0x2921   :  { %4849 = vrcp.f32 %v2103_v58 }
0x2922   :  { %2109 = vrot.lane.b32.xlu1 %v2108_v4, %s5052_s29 }
0x292b   :  { %v4850_v23 = vpop.eup %4849 }
0x292c   :  { %v2119_v37 = vsub.f32 1.0, %v4850_v23  ;;  %v2127_v41 = vmul.f32 %v4850_v23, %v2125_v49 }
0x2990   :  { %v2354_v9 = vpop.permute.xlu1 %2353 }
0x2991   :  { %v2356_v12 = vmul.f32 %v2354_v9, %v2351_v8 }
0x2993   :  { %v5517_v25 = vadd.f32 %v2357_v10, %v2356_v12 }
0x2994   :  { %v2110_v50 = vpop.permute.xlu1 %2109 }
0x2995   :  { %v2112_v14 = vmul.f32 %v4850_v23, %v2110_v50  ;;  %2360 = vrot.lane.b32.xlu0 %v5517_v25, %s5051_s25  ;;  %v2463_v46 = vrot.slane %v5517_v25, 4 }
0x2997   :  { %2114 = vrot.lane.b32.xlu1 %v2112_v14, %s5053_s30 }
0x2a07   :  { %v2361_v15 = vpop.permute.xlu0 %2360 }
0x2a08   :  { %4507 = vmatmul.mubr.msk.f32.vlgmr.msra.gmra.mrb[24].mxu1 %vm205_vm3, %v2361_v15 }
0x2a09   :  { %v2115_v17 = vpop.permute.xlu1 %2114  ;;  %4694 = vmatpush3.bf16.msra.mxu1 %v5481_v31  ;;  %4520 = vmatprep.mubr.msk.f32.mxu1 %vm5048_vm0, %v5049_v1 }
0x2a0a   :  { %v2117_v16 = vadd.f32 %v2115_v17, %v5457_v13  ;;  %4698 = vmatprep.subr.bf16.mxu1 %v5047_v0 }
0x2a0c   :  { %4851 = vtanh.f32 %v2117_v16 }
0x2a16   :  { %v4852_v19 = vpop.eup %4851 }
0x2a17   :  { %2121 = vrot.lane.b32.xlu1 %v4852_v19, %s5051_s25 }
0x2a1b   :  { %2157 = vrot.lane.b32.xlu1 %v2141_v21, %s5051_s25 }
0x2a89   :  { %v2122_v22 = vpop.permute.xlu1 %2121 }
0x2a8a   :  { %v2124_v39 = vmul.f32 %v2122_v22, %v2119_v37 }
0x2a8c   :  { %v2128_v18 = vadd.f32 %v2127_v41, %v2124_v39 }
0x2a8d   :  { %v2158_v40 = vpop.permute.xlu1 %2157 }
0x2a8e   :  { %4492 = vmatprep.mubr.msk.f32.mxu0 %vm205_vm3, %v2158_v40  ;;  %v2142_v11 = vsel %vm194_vm2, %v5472_v59, %v2128_v18 }
0x2adb   :  { %v2430_v32 = vpop.f32.mrb[24].mxu1 }
0x2adc   :  { %v2444_v38 = vadd.f32 %v2430_v32, %v5496_v42  ;;  %v4508_v13 = vpop.f32.mrb[25].mxu1  ;;  %v2435_v57 = vrot.slane %v2430_v32, 4 }
0x2ade   :  { %v2446_v3 = vrot.slane %v2444_v38, 4  ;;  %v2437_v26 = vadd.f32 %v2435_v57, %v5508_v51 }
0x2ae0   :  { %2447 = vrot.lane.b32.xlu0 %v2446_v3, %s5052_s29  ;;  %v4180_v28 = vmul.f32 -1.442695, %v2437_v26 }
0x2ae2   :  { %4853 = vpow2.f32 %v4180_v28 }
0x2aec   :  { %v4854_v29 = vpop.eup %4853 }
0x2aed   :  { %v2441_v44 = vadd.f32 1.0, %v4854_v29 }
0x2aef   :  { %4855 = vrcp.f32 %v2441_v44 }
0x2af9   :  { %v4856_v56 = vpop.eup %4855 }
0x2afa   :  { %v2457_v45 = vsub.f32 1.0, %v4856_v56  ;;  %v2465_v52 = vmul.f32 %v4856_v56, %v2463_v46 }
0x2b52   :  { %v2448_v33 = vpop.permute.xlu0 %2447 }
0x2b53   :  { %v2450_v34 = vmul.f32 %v4856_v56, %v2448_v33 }
0x2b55   :  { %2452 = vrot.lane.b32.xlu0 %v2450_v34, %s5053_s30 }
0x2bc7   :  { %v2453_v35 = vpop.permute.xlu0 %2452 }
0x2bc8   :  { %v2455_v36 = vadd.f32 %v2453_v35, %v5508_v51 }
0x2bca   :  { %4857 = vtanh.f32 %v2455_v36 }
0x2bd4   :  { %v4858_v61 = vpop.eup %4857 }
0x2bd5   :  { %2459 = vrot.lane.b32.xlu0 %v4858_v61, %s5051_s25 }
0x2bd9   :  { %2159 = vrot.lane.b32.xlu0 %v2142_v11, %s5051_s25 }
0x2c47   :  { %v2460_v47 = vpop.permute.xlu0 %2459 }
0x2c48   :  { %v2462_v51 = vmul.f32 %v2460_v47, %v2457_v45 }
0x2c4a   :  { %v5545_v53 = vadd.f32 %v2465_v52, %v2462_v51 }
0x2c4b   :  { %v2160_v54 = vpop.permute.xlu0 %2159 }
0x2c4c   :  { %4493 = vmatmul.mubr.msk.f32.gmra.mrb[22].mxu0 %vm205_vm3, %v2160_v54  ;;  %v2468_v55 = vrot.slane %v5545_v53, 4 }
0x2c4d   :  { %4513 = vmatprep.mubr.msk.f32.mxu0 %vm5048_vm0, %v5049_v1 }
0x2c4e   :  { %2469 = vrot.lane.b32.xlu1 %v2468_v55, %s5051_s25 }
0x2cc0   :  { %v2470_v59 = vpop.permute.xlu1 %2469 }
0x2cc1   :  { %4514 = vmatmul.mubr.msk.f32.vlgmr.msra.gmra.mrb[24].mxu0 %vm205_vm3, %v2470_v59 }
0x2cc2   :  { %4697 = vmatpush3.bf16.msra.mxu0 %v5481_v31  ;;  %4527 = vmatprep.mubr.msk.f32.mxu0 %vm5048_vm0, %v5049_v1 }
0x2cc3   :  { %4701 = vmatprep.subr.bf16.mxu0 %v5047_v0 }
0x2d1f   :  { %v5557_v27 = vpop.f32.mrb[22].mxu0 }
0x2d20   :  { %v5559_v20 = vpop.f32.mrb[23].mxu0 }
0x2d21   :  { %v2246_v11 = vadd.f32 %v5505_v48, %v5559_v20 }
0x2d94   :  { %v2539_v24 = vpop.f32.mrb[24].mxu0 }
0x2d95   :  { %v2550_v60 = vadd.f32 %v2539_v24, %v5496_v42  ;;  %v4515_v62 = vpop.f32.mrb[25].mxu0  ;;  %v2543_v2 = vadd.f32 %v2539_v24, %v2241_v63 }
0x2d97   :  { %2552 = vrot.lane.b32.xlu0 %v2550_v60, %s5052_s29  ;;  %v4182_v4 = vmul.f32 -1.442695, %v2543_v2 }
0x2d99   :  { %4859 = vpow2.f32 %v4182_v4 }
0x2da3   :  { %v4860_v5 = vpop.eup %4859 }
0x2da4   :  { %v2547_v6 = vadd.f32 1.0, %v4860_v5 }
0x2da6   :  { %4861 = vrcp.f32 %v2547_v6 }
0x2db0   :  { %v4862_v7 = vpop.eup %4861 }
0x2db1   :  { %v2562_v12 = vsub.f32 1.0, %v4862_v7  ;;  %v2569_v43 = vmul.f32 %v4862_v7, %v2468_v55 }
0x2e09   :  { %v2553_v30 = vpop.permute.xlu0 %2552 }
0x2e0a   :  { %v2555_v58 = vmul.f32 %v4862_v7, %v2553_v30 }
0x2e0c   :  { %2557 = vrot.lane.b32.xlu1 %v2555_v58, %s5053_s30 }
0x2e7e   :  { %v2558_v8 = vpop.permute.xlu1 %2557 }
0x2e7f   :  { %v2560_v9 = vadd.f32 %v2558_v8, %v2241_v63 }
0x2e81   :  { %4863 = vtanh.f32 %v2560_v9 }
0x2e8b   :  { %v4864_v10 = vpop.eup %4863 }
0x2e8c   :  { %2564 = vrot.lane.b32.xlu0 %v4864_v10, %s5051_s25 }
0x2efe   :  { %v2565_v23 = vpop.permute.xlu0 %2564 }
0x2eff   :  { %v2567_v50 = vmul.f32 %v2565_v23, %v2562_v12 }
0x2f01   :  { %v5567_v14 = vadd.f32 %v2569_v43, %v2567_v50 }
0x2f03   :  { %2572 = vrot.lane.b32.xlu1 %v5567_v14, %s5051_s25  ;;  %v2675_v33 = vrot.slane %v5567_v14, 4 }
0x2f75   :  { %v2573_v15 = vpop.permute.xlu1 %2572 }
0x2f76   :  { %4521 = vmatmul.mubr.msk.f32.vlgmr.msra.gmra.mrb[26].mxu1 %vm205_vm3, %v2573_v15 }
0x2f77   :  { %4700 = vmatpush3.bf16.msra.mxu1 %v5481_v31  ;;  %4534 = vmatprep.mubr.msk.f32.mxu1 %vm5048_vm0, %v5049_v1 }
0x2f78   :  { %4704 = vmatprep.subr.bf16.mxu1 %v5047_v0 }
0x3049   :  { %v2642_v17 = vpop.f32.mrb[26].mxu1 }
0x304a   :  { %v2656_v16 = vadd.f32 %v2642_v17, %v5496_v42  ;;  %v4522_v19 = vpop.f32.mrb[27].mxu1  ;;  %v2647_v22 = vrot.slane %v2642_v17, 4 }
0x304c   :  { %v2658_v21 = vrot.slane %v2656_v16, 4  ;;  %v2649_v40 = vadd.f32 %v2647_v22, %v2241_v63 }
0x304e   :  { %2659 = vrot.lane.b32.xlu0 %v2658_v21, %s5052_s29  ;;  %v4184_v32 = vmul.f32 -1.442695, %v2649_v40 }
0x3050   :  { %4865 = vpow2.f32 %v4184_v32 }
0x305a   :  { %v4866_v38 = vpop.eup %4865 }
0x305b   :  { %v2653_v13 = vadd.f32 1.0, %v4866_v38 }
0x305d   :  { %4867 = vrcp.f32 %v2653_v13 }
0x3067   :  { %v4868_v3 = vpop.eup %4867 }
0x3068   :  { %v2669_v56 = vsub.f32 1.0, %v4868_v3  ;;  %v2677_v36 = vmul.f32 %v4868_v3, %v2675_v33 }
0x30c0   :  { %v2660_v57 = vpop.permute.xlu0 %2659 }
0x30c1   :  { %v2662_v26 = vmul.f32 %v4868_v3, %v2660_v57 }
0x30c3   :  { %2664 = vrot.lane.b32.xlu1 %v2662_v26, %s5053_s30 }
0x3135   :  { %v2665_v28 = vpop.permute.xlu1 %2664 }
0x3136   :  { %v2667_v29 = vadd.f32 %v2665_v28, %v2241_v63 }
0x3138   :  { %4869 = vtanh.f32 %v2667_v29  ;;  %v5618_v29 = vadd.f32 %v5557_v27, %v5505_v48  ;;  %v3113_v48 = vsel %vm194_vm2, %v5517_v25, %v5545_v53  ;;  %v3104_v27 = vld [vmem:[#allocation6 + $0x30] sm:$0xff] }
0x3142   :  { %v4870_v44 = vpop.eup %4869 }
0x3143   :  { %2671 = vrot.lane.b32.xlu0 %v4870_v44, %s5051_s25 }
0x31b5   :  { %v2672_v34 = vpop.permute.xlu0 %2671 }
0x31b6   :  { %v2674_v35 = vmul.f32 %v2672_v34, %v2669_v56 }
0x31b8   :  { %v5581_v37 = vadd.f32 %v2677_v36, %v2674_v35 }
0x31ba   :  { %v2680_v49 = vrot.slane %v5581_v37, 4 }
0x31bc   :  { %2681 = vrot.lane.b32.xlu1 %v2680_v49, %s5051_s25 }
0x322e   :  { %v2682_v39 = vpop.permute.xlu1 %2681 }
0x322f   :  { %4528 = vmatmul.mubr.msk.f32.vlgmr.msra.gmra.mrb[26].mxu0 %vm205_vm3, %v2682_v39 }
0x3230   :  { %4703 = vmatpush3.bf16.msra.mxu0 %v5481_v31  ;;  %4541 = vmatprep.mubr.msk.f32.mxu0 %vm5048_vm0, %v5049_v1 }
0x3302   :  { %v2751_v41 = vpop.f32.mrb[26].mxu0 }
0x3303   :  { %v2762_v61 = vadd.f32 %v2751_v41, %v5496_v42  ;;  %v4529_v18 = vpop.f32.mrb[27].mxu0  ;;  %v2755_v45 = vadd.f32 %v2751_v41, %v2246_v11 }
0x3304   :  { %v3105_v18 = vld [vmem:[#allocation6 + $0x38] sm:$0xff] }
0x3305   :  { %2764 = vrot.lane.b32.xlu0 %v2762_v61, %s5052_s29  ;;  %v4186_v46 = vmul.f32 -1.442695, %v2755_v45  ;;  %v4201_v45 = vld [vmem:[%s5806_s6 + $0x3] ss:$0 sm:$0xff] }
0x3307   :  { %4871 = vpow2.f32 %v4186_v46 }
0x3311   :  { %v4872_v47 = vpop.eup %4871 }
0x3312   :  { %v2759_v51 = vadd.f32 1.0, %v4872_v47 }
0x3314   :  { %4873 = vrcp.f32 %v2759_v51 }
0x331e   :  { %v4874_v52 = vpop.eup %4873 }
0x331f   :  { %v2774_v62 = vsub.f32 1.0, %v4874_v52  ;;  %v2781_v20 = vmul.f32 %v4874_v52, %v2680_v49 }
0x3377   :  { %v2765_v54 = vpop.permute.xlu0 %2764 }
0x3378   :  { %v2767_v55 = vmul.f32 %v4874_v52, %v2765_v54  ;;  %v3114_v54 = vsel %vm194_vm2, %v5567_v14, %v5581_v37 }
0x337a   :  { %2769 = vrot.lane.b32.xlu1 %v2767_v55, %s5053_s30  ;;  %v3107_v55 = vld [vmem:[#allocation7 + $0x30] sm:$0xff] }
0x33ec   :  { %v2770_v59 = vpop.permute.xlu1 %2769 }
0x33ed   :  { %v2772_v24 = vadd.f32 %v2770_v59, %v2246_v11  ;;  %v3108_v59 = vld [vmem:[#allocation7 + $0x38] sm:$0xff] }
0x33ef   :  { %4875 = vtanh.f32 %v2772_v24  ;;  %v5642_v24 = vpack.c.bf16 %v3108_v59, %v3107_v55 }
0x33f9   :  { %v4876_v60 = vpop.eup %4875 }
0x33fa   :  { %2776 = vrot.lane.b32.xlu0 %v4876_v60, %s5051_s25 }
0x346c   :  { %v2777_v63 = vpop.permute.xlu0 %2776 }
0x346d   :  { %v2779_v2 = vmul.f32 %v2777_v63, %v2774_v62 }
0x346f   :  { %v5595_v4 = vadd.f32 %v2781_v20, %v2779_v2 }
0x3471   :  { %2784 = vrot.lane.b32.xlu1 %v5595_v4, %s5051_s25  ;;  %v2887_v21 = vrot.slane %v5595_v4, 4 }
0x34e3   :  { %v2785_v5 = vpop.permute.xlu1 %2784 }
0x34e4   :  { %4535 = vmatmul.mubr.msk.f32.vlgmr.msra.gmra.mrb[28].mxu1 %vm205_vm3, %v2785_v5 }
0x34e5   :  { %4706 = vmatpush3.bf16.msra.mxu1 %v5481_v31  ;;  %4548 = vmatprep.mubr.msk.f32.mxu1 %vm5048_vm0, %v5049_v1 }
0x34e6   :  { %4711 = vmatprep.subr.bf16.mxu1 %v5047_v0 }
0x35b7   :  { %v2854_v6 = vpop.f32.mrb[28].mxu1 }
0x35b8   :  { %v2868_v7 = vadd.f32 %v2854_v6, %v5496_v42  ;;  %v4536_v30 = vpop.f32.mrb[29].mxu1  ;;  %v2859_v8 = vrot.slane %v2854_v6, 4 }
0x35b9   :  { %v5666_v30 = vld [vmem:[%s5805_s5 + $0x3] ss:$0 sm:$0xff] }
0x35ba   :  { %v2870_v58 = vrot.slane %v2868_v7, 4  ;;  %v2861_v9 = vadd.f32 %v2859_v8, %v2246_v11 }
0x35bc   :  { %2871 = vrot.lane.b32.xlu0 %v2870_v58, %s5052_s29  ;;  %v4188_v10 = vmul.f32 -1.442695, %v2861_v9 }
0x35be   :  { %4877 = vpow2.f32 %v4188_v10 }
0x35c8   :  { %v4878_v12 = vpop.eup %4877 }
0x35c9   :  { %v2865_v23 = vadd.f32 1.0, %v4878_v12 }
0x35cb   :  { %4879 = vrcp.f32 %v2865_v23 }
0x35d5   :  { %v4880_v31 = vpop.eup %4879 }
0x35d6   :  { %v2881_v19 = vsub.f32 1.0, %v4880_v31  ;;  %v2889_v32 = vmul.f32 %v4880_v31, %v2887_v21 }
0x362e   :  { %v2872_v43 = vpop.permute.xlu0 %2871 }
0x362f   :  { %v2874_v50 = vmul.f32 %v4880_v31, %v2872_v43 }
0x3631   :  { %2876 = vrot.lane.b32.xlu1 %v2874_v50, %s5053_s30 }
0x36a3   :  { %v2877_v15 = vpop.permute.xlu1 %2876 }
0x36a4   :  { %v2879_v17 = vadd.f32 %v2877_v15, %v2246_v11  ;;  %v4707_v11 = vpack.c.bf16 %v3105_v18, %v3104_v27 }
0x36a6   :  { %4881 = vtanh.f32 %v2879_v17  ;;  %4708 = vmatprep.subr.bf16.mxu0 %v4707_v11 }
0x36b0   :  { %v4882_v16 = vpop.eup %4881 }
0x36b1   :  { %2883 = vrot.lane.b32.xlu0 %v4882_v16, %s5051_s25 }
0x3723   :  { %v2884_v22 = vpop.permute.xlu0 %2883 }
0x3724   :  { %v2886_v40 = vmul.f32 %v2884_v22, %v2881_v19 }
0x3726   :  { %v5609_v38 = vadd.f32 %v2889_v32, %v2886_v40 }
0x3728   :  { %v2892_v13 = vrot.slane %v5609_v38, 4 }
0x372a   :  { %2893 = vrot.lane.b32.xlu1 %v2892_v13, %s5051_s25 }
0x379c   :  { %v2894_v3 = vpop.permute.xlu1 %2893 }
0x379d   :  { %4542 = vmatmul.mubr.msk.f32.vlgmr.msra.gmra.mrb[28].mxu0 %vm205_vm3, %v2894_v3 }
0x379e   :  { %4710 = vmatpush3.bf16.msra.mxu0 %v4707_v11 }
0x379f   :  { %4717 = vmatprep.subr.bf16.mxu0 %v5047_v0 }
0x3870   :  { %v2963_v57 = vpop.f32.mrb[28].mxu0 }
0x3871   :  { %v2974_v26 = vadd.f32 %v2963_v57, %v5496_v42  ;;  %v4543_v28 = vpop.f32.mrb[29].mxu0  ;;  %v2967_v44 = vadd.f32 %v2963_v57, %v5618_v29 }
0x3873   :  { %2976 = vrot.lane.b32.xlu0 %v2974_v26, %s5052_s29  ;;  %v4190_v56 = vmul.f32 -1.442695, %v2967_v44 }
0x3875   :  { %4883 = vpow2.f32 %v4190_v56 }
0x387f   :  { %v4884_v33 = vpop.eup %4883 }
0x3880   :  { %v2971_v34 = vadd.f32 1.0, %v4884_v33 }
0x3882   :  { %4885 = vrcp.f32 %v2971_v34 }
0x388c   :  { %v4886_v35 = vpop.eup %4885 }
0x388d   :  { %v2986_v46 = vsub.f32 1.0, %v4886_v35  ;;  %v2993_v51 = vmul.f32 %v4886_v35, %v2892_v13 }
0x38e5   :  { %v2977_v36 = vpop.permute.xlu0 %2976 }
0x38e6   :  { %v2979_v49 = vmul.f32 %v4886_v35, %v2977_v36 }
0x38e8   :  { %2981 = vrot.lane.b32.xlu1 %v2979_v49, %s5053_s30 }
0x395a   :  { %v2982_v39 = vpop.permute.xlu1 %2981 }
0x395b   :  { %v2984_v41 = vadd.f32 %v2982_v39, %v5618_v29  ;;  %v3115_v39 = vsel %vm194_vm2, %v5595_v4, %v5609_v38 }
0x395d   :  { %4887 = vtanh.f32 %v2984_v41 }
0x3967   :  { %v4888_v61 = vpop.eup %4887 }
0x3968   :  { %2988 = vrot.lane.b32.xlu0 %v4888_v61, %s5051_s25 }
0x396c   :  { %3127 = vrot.lane.b32.xlu0 %v3113_v48, %s5051_s25 }
0x3970   :  { %3310 = vrot.lane.b32.xlu0 %v4201_v45, %s5053_s30 }
0x39da   :  { %v2989_v47 = vpop.permute.xlu0 %2988 }
0x39db   :  { %v2991_v52 = vmul.f32 %v2989_v47, %v2986_v46 }
0x39dd   :  { %v5633_v25 = vadd.f32 %v2993_v51, %v2991_v52 }
0x39de   :  { %v3128_v53 = vpop.permute.xlu0 %3127 }
0x39df   :  { %2996 = vrot.lane.b32.xlu1 %v5633_v25, %s5051_s25  ;;  %4555 = vmatprep.mubr.msk.f32.mxu0 %vm205_vm3, %v3128_v53  ;;  %v3099_v59 = vrot.slane %v5633_v25, 4 }
0x39e2   :  { %v5657_v63 = vpop.permute.xlu0 %3310 }
0x39e3   :  { %3129 = vrot.lane.b32.xlu1 %v3114_v54, %s5051_s25 }
0x3a51   :  { %v2997_v60 = vpop.permute.xlu1 %2996 }
0x3a52   :  { %4549 = vmatmul.mubr.msk.f32.vlgmr.msra.gmra.mrb[30].mxu1 %vm205_vm3, %v2997_v60 }
0x3a53   :  { %4713 = vmatpush3.bf16.msra.mxu1 %v5642_v24  ;;  %4565 = vmatprep.mubr.msk.f32.mxu1 %vm5048_vm0, %v5049_v1 }
0x3a54   :  { %4714 = vmatprep.subr.bf16.mxu1 %v5047_v0 }
0x3a55   :  { %v3130_v62 = vpop.permute.xlu1 %3129 }
0x3a56   :  { %4556 = vmatmul.mubr.msk.f32.vlgmr.msra.gmra.mrb[30].mxu0 %vm205_vm3, %v3130_v62  ;;  %4566 = vmatmul.mubr.f32.vlgmr.msra.gmra.mrb[32].mxu1 %v5049_v1 }
0x3a57   :  { %4716 = vmatpush3.bf16.msra.mxu1 %v5642_v24  ;;  %4572 = vmatprep.mubr.msk.f32.mxu1 %vm5048_vm0, %v5049_v1 }
0x3a58   :  { %4719 = vmatpush3.bf16.msra.mxu0 %v5642_v24  ;;  %4720 = vmatprep.subr.bf16.mxu1 %v5047_v0 }
0x3a59   :  { %4723 = vmatprep.subr.bf16.mxu0 %v5047_v0 }
0x3b25   :  { %v3066_v14 = vpop.f32.mrb[30].mxu1 }
0x3b26   :  { %v4550_v37 = vpop.f32.mrb[31].mxu1  ;;  %v3080_v17 = vadd.f32 %v3066_v14, %v5496_v42  ;;  %v3071_v21 = vrot.slane %v3066_v14, 4 }
0x3b28   :  { %v3082_v19 = vrot.slane %v3080_v17, 4  ;;  %v3073_v22 = vadd.f32 %v3071_v21, %v5618_v29 }
0x3b29   :  { %v3294_v20 = vpop.f32.mrb[32].mxu1  ;;  %v5659_v2 = vpop.f32.mrb[30].mxu0 }
0x3b2a   :  { %v3209_v5 = vpop.f32.mrb[31].mxu0  ;;  %v4567_v6 = vpop.f32.mrb[33].mxu1  ;;  %v3313_v7 = vadd.f32 %v5657_v63, %v3294_v20  ;;  %v4192_v40 = vmul.f32 -1.442695, %v3073_v22  ;;  %v3215_v17 = vadd.f32 %v5659_v2, %v5666_v30 }
0x3b2b   :  { %v5669_v58 = vadd.f32 %v5666_v30, %v3209_v5 }
0x3b2c   :  { %3315 = vrot.lane.b32.xlu1 %v3313_v7, %s5052_s29 }
0x3b2d   :  { %v3298_v8 = vadd.f32 %v3294_v20, %v5669_v58 }
0x3b2f   :  { %v4200_v9 = vmul.f32 -1.442695, %v3298_v8 }
0x3b31   :  { %4889 = vpow2.f32 %v4200_v9 }
0x3b3b   :  { %v4890_v10 = vpop.eup %4889 }
0x3b3c   :  { %v3302_v12 = vadd.f32 1.0, %v4890_v10 }
0x3b3e   :  { %4891 = vrcp.f32 %v3302_v12 }
0x3b48   :  { %v4892_v23 = vpop.eup %4891 }
0x3b49   :  { %v3325_v3 = vsub.f32 1.0, %v4892_v23  ;;  %v3331_v26 = vmul.f32 0.0, %v4892_v23 }
0x3b9e   :  { %v3316_v31 = vpop.permute.xlu1 %3315 }
0x3b9f   :  { %v3318_v43 = vmul.f32 %v4892_v23, %v3316_v31 }
0x3ba1   :  { %3320 = vrot.lane.b32.xlu0 %v3318_v43, %s5053_s30 }
0x3c13   :  { %v3321_v50 = vpop.permute.xlu0 %3320 }
0x3c14   :  { %v3323_v15 = vadd.f32 %v3321_v50, %v5669_v58 }
0x3c16   :  { %4893 = vtanh.f32 %v3323_v15 }
0x3c17   :  { %4895 = vpow2.f32 %v4192_v40 }
0x3c20   :  { %v4894_v16 = vpop.eup %4893 }
0x3c21   :  { %3327 = vrot.lane.b32.xlu1 %v4894_v16, %s5051_s25  ;;  %v4896_v32 = vpop.eup %4895 }
0x3c22   :  { %v3077_v13 = vadd.f32 1.0, %v4896_v32 }
0x3c24   :  { %4897 = vrcp.f32 %v3077_v13 }
0x3c25   :  { %3083 = vrot.lane.b32.xlu1 %v3082_v19, %s5052_s29 }
0x3c2e   :  { %v4898_v42 = vpop.eup %4897 }
0x3c2f   :  { %v3093_v55 = vsub.f32 1.0, %v4898_v42  ;;  %v3101_v62 = vmul.f32 %v4898_v42, %v3099_v59 }
0x3c93   :  { %v3328_v57 = vpop.permute.xlu1 %3327 }
0x3c94   :  { %v3330_v28 = vmul.f32 %v3328_v57, %v3325_v3 }
0x3c96   :  { %v3332_v44 = vadd.f32 %v3331_v26, %v3330_v28 }
0x3c97   :  { %v3084_v56 = vpop.permute.xlu1 %3083 }
0x3c98   :  { %v3086_v33 = vmul.f32 %v4898_v42, %v3084_v56  ;;  %3334 = vrot.lane.b32.xlu0 %v3332_v44, %s5051_s25  ;;  %v3437_v5 = vrot.slane %v3332_v44, 4 }
0x3c9a   :  { %3088 = vrot.lane.b32.xlu1 %v3086_v33, %s5053_s30 }
0x3d0a   :  { %v5680_v34 = vpop.permute.xlu0 %3334 }
0x3d0b   :  { %4573 = vmatmul.mubr.msk.f32.vlgmr.msra.gmra.mrb[34].mxu1 %vm205_vm3, %v5680_v34 }
0x3d0c   :  { %v3089_v35 = vpop.permute.xlu1 %3088  ;;  %4722 = vmatpush3.bf16.msra.mxu1 %v5642_v24  ;;  %4586 = vmatprep.mubr.msk.f32.mxu1 %vm5048_vm0, %v5049_v1 }
0x3d0d   :  { %v3091_v36 = vadd.f32 %v3089_v35, %v5618_v29  ;;  %4726 = vmatprep.subr.bf16.mxu1 %v5047_v0 }
0x3d0f   :  { %4899 = vtanh.f32 %v3091_v36 }
0x3d19   :  { %v4900_v49 = vpop.eup %4899 }
0x3d1a   :  { %3095 = vrot.lane.b32.xlu1 %v4900_v49, %s5051_s25 }
0x3d1e   :  { %3131 = vrot.lane.b32.xlu1 %v3115_v39, %s5051_s25 }
0x3d8c   :  { %v3096_v41 = vpop.permute.xlu1 %3095 }
0x3d8d   :  { %v3098_v60 = vmul.f32 %v3096_v41, %v3093_v55 }
0x3d8f   :  { %v3102_v37 = vadd.f32 %v3101_v62, %v3098_v60 }
0x3d90   :  { %v3132_v61 = vpop.permute.xlu1 %3131 }
0x3d91   :  { %4558 = vmatprep.mubr.msk.f32.mxu0 %vm205_vm3, %v3132_v61  ;;  %v3116_v20 = vsel %vm194_vm2, %v5633_v25, %v3102_v37 }
0x3dde   :  { %v3404_v48 = vpop.f32.mrb[34].mxu1 }
0x3ddf   :  { %v3418_v27 = vadd.f32 %v3404_v48, %v5657_v63  ;;  %v4574_v29 = vpop.f32.mrb[35].mxu1  ;;  %v3409_v11 = vrot.slane %v3404_v48, 4 }
0x3de1   :  { %v3420_v18 = vrot.slane %v3418_v27, 4  ;;  %v3411_v45 = vadd.f32 %v3409_v11, %v5669_v58 }
0x3de3   :  { %3421 = vrot.lane.b32.xlu0 %v3420_v18, %s5052_s29  ;;  %v4203_v46 = vmul.f32 -1.442695, %v3411_v45 }
0x3de5   :  { %4901 = vpow2.f32 %v4203_v46 }
0x3def   :  { %v4902_v47 = vpop.eup %4901 }
0x3df0   :  { %v3415_v4 = vadd.f32 1.0, %v4902_v47 }
0x3df2   :  { %4903 = vrcp.f32 %v3415_v4 }
0x3dfc   :  { %v4904_v38 = vpop.eup %4903 }
0x3dfd   :  { %v3431_v6 = vsub.f32 1.0, %v4904_v38 }
0x3e55   :  { %v3422_v51 = vpop.permute.xlu0 %3421 }
0x3e56   :  { %v3424_v52 = vmul.f32 %v4904_v38, %v3422_v51 }
0x3e58   :  { %3426 = vrot.lane.b32.xlu0 %v3424_v52, %s5053_s30 }
0x3eca   :  { %v3427_v53 = vpop.permute.xlu0 %3426 }
0x3ecb   :  { %v3429_v54 = vadd.f32 %v3427_v53, %v5669_v58  ;;  %v3439_v58 = vmul.f32 %v4904_v38, %v3437_v5 }
0x3ecd   :  { %4905 = vtanh.f32 %v3429_v54 }
0x3ed7   :  { %v4906_v14 = vpop.eup %4905 }
0x3ed8   :  { %3433 = vrot.lane.b32.xlu0 %v4906_v14, %s5051_s25 }
0x3edc   :  { %3133 = vrot.lane.b32.xlu0 %v3116_v20, %s5051_s25 }
0x3f4a   :  { %v3434_v7 = vpop.permute.xlu0 %3433 }
0x3f4b   :  { %v3436_v8 = vmul.f32 %v3434_v7, %v3431_v6 }
0x3f4d   :  { %v3440_v9 = vadd.f32 %v3439_v58, %v3436_v8 }
0x3f4e   :  { %v3134_v10 = vpop.permute.xlu0 %3133 }
0x3f4f   :  { %v5705_v12 = vrot.slane %v3440_v9, 4  ;;  %4559 = vmatmul.mubr.msk.f32.gmra.mrb[32].mxu0 %vm205_vm3, %v3134_v10 }
0x3f50   :  { %4579 = vmatprep.mubr.msk.f32.mxu0 %vm5048_vm0, %v5049_v1 }
0x3f51   :  { %3443 = vrot.lane.b32.xlu1 %v5705_v12, %s5051_s25 }
0x3fc3   :  { %v3444_v25 = vpop.permute.xlu1 %3443 }
0x3fc4   :  { %4580 = vmatmul.mubr.msk.f32.vlgmr.msra.gmra.mrb[34].mxu0 %vm205_vm3, %v3444_v25 }
0x3fc5   :  { %4725 = vmatpush3.bf16.msra.mxu0 %v5642_v24  ;;  %4593 = vmatprep.mubr.msk.f32.mxu0 %vm5048_vm0, %v5049_v1 }
0x3fc6   :  { %4729 = vmatprep.subr.bf16.mxu0 %v5047_v0 }
0x4022   :  { %v5717_v23 = vpop.f32.mrb[32].mxu0 }
0x4023   :  { %v5719_v31 = vpop.f32.mrb[33].mxu0 }
0x4024   :  { %v3220_v37 = vadd.f32 %v5666_v30, %v5719_v31 }
0x4097   :  { %v3513_v43 = vpop.f32.mrb[34].mxu0 }
0x4098   :  { %v3524_v50 = vadd.f32 %v3513_v43, %v5657_v63  ;;  %v4581_v15 = vpop.f32.mrb[35].mxu0  ;;  %v3517_v16 = vadd.f32 %v3513_v43, %v3215_v17 }
0x409a   :  { %3526 = vrot.lane.b32.xlu0 %v3524_v50, %s5052_s29  ;;  %v4205_v19 = vmul.f32 -1.442695, %v3517_v16 }
0x409c   :  { %4907 = vpow2.f32 %v4205_v19 }
0x40a6   :  { %v4908_v21 = vpop.eup %4907 }
0x40a7   :  { %v3521_v22 = vadd.f32 1.0, %v4908_v21 }
0x40a9   :  { %4909 = vrcp.f32 %v3521_v22 }
0x40b3   :  { %v4910_v40 = vpop.eup %4909 }
0x40b4   :  { %v3536_v28 = vsub.f32 1.0, %v4910_v40  ;;  %v3543_v2 = vmul.f32 %v4910_v40, %v5705_v12 }
0x410c   :  { %v3527_v32 = vpop.permute.xlu0 %3526 }
0x410d   :  { %v3529_v13 = vmul.f32 %v4910_v40, %v3527_v32 }
0x410f   :  { %3531 = vrot.lane.b32.xlu1 %v3529_v13, %s5053_s30 }
0x4181   :  { %v3532_v3 = vpop.permute.xlu1 %3531 }
0x4182   :  { %v3534_v57 = vadd.f32 %v3532_v3, %v3215_v17 }
0x4184   :  { %4911 = vtanh.f32 %v3534_v57 }
0x418e   :  { %v4912_v26 = vpop.eup %4911 }
0x418f   :  { %3538 = vrot.lane.b32.xlu0 %v4912_v26, %s5051_s25 }
0x4201   :  { %v3539_v44 = vpop.permute.xlu0 %3538 }
0x4202   :  { %v3541_v42 = vmul.f32 %v3539_v44, %v3536_v28 }
0x4204   :  { %v5728_v56 = vadd.f32 %v3543_v2, %v3541_v42 }
0x4206   :  { %3546 = vrot.lane.b32.xlu1 %v5728_v56, %s5051_s25  ;;  %v3649_v38 = vrot.slane %v5728_v56, 4 }
0x4278   :  { %v3547_v33 = vpop.permute.xlu1 %3546 }
0x4279   :  { %4587 = vmatmul.mubr.msk.f32.vlgmr.msra.gmra.mrb[36].mxu1 %vm205_vm3, %v3547_v33 }
0x427a   :  { %4728 = vmatpush3.bf16.msra.mxu1 %v5642_v24  ;;  %4600 = vmatprep.mubr.msk.f32.mxu1 %vm5048_vm0, %v5049_v1 }
0x427b   :  { %4732 = vmatprep.subr.bf16.mxu1 %v5047_v0 }
0x434c   :  { %v3616_v35 = vpop.f32.mrb[36].mxu1 }
0x434d   :  { %v3630_v36 = vadd.f32 %v3616_v35, %v5657_v63  ;;  %v4588_v49 = vpop.f32.mrb[37].mxu1  ;;  %v3621_v41 = vrot.slane %v3616_v35, 4 }
0x434f   :  { %v3632_v39 = vrot.slane %v3630_v36, 4  ;;  %v3623_v61 = vadd.f32 %v3621_v41, %v3215_v17 }
0x4351   :  { %3633 = vrot.lane.b32.xlu0 %v3632_v39, %s5052_s29  ;;  %v4207_v48 = vmul.f32 -1.442695, %v3623_v61 }
0x4353   :  { %4913 = vpow2.f32 %v4207_v48 }
0x435d   :  { %v4914_v27 = vpop.eup %4913 }
0x435e   :  { %v3627_v29 = vadd.f32 1.0, %v4914_v27 }
0x4360   :  { %4915 = vrcp.f32 %v3627_v29 }
0x436a   :  { %v4916_v18 = vpop.eup %4915 }
0x436b   :  { %v3643_v4 = vsub.f32 1.0, %v4916_v18  ;;  %v3651_v53 = vmul.f32 %v4916_v18, %v3649_v38 }
0x43c3   :  { %v3634_v11 = vpop.permute.xlu0 %3633 }
0x43c4   :  { %v3636_v45 = vmul.f32 %v4916_v18, %v3634_v11 }
0x43c6   :  { %3638 = vrot.lane.b32.xlu1 %v3636_v45, %s5053_s30  ;;  %v3225_v45 = vadd.f32 %v5717_v23, %v5666_v30 }
0x4438   :  { %v3639_v0 = vpop.permute.xlu1 %3638 }
0x4439   :  { %v3641_v46 = vadd.f32 %v3639_v0, %v3215_v17 }
0x443b   :  { %4917 = vtanh.f32 %v3641_v46 }
0x4445   :  { %v4918_v47 = vpop.eup %4917 }
0x4446   :  { %3645 = vrot.lane.b32.xlu0 %v4918_v47, %s5051_s25 }
0x44b8   :  { %v3646_v51 = vpop.permute.xlu0 %3645 }
0x44b9   :  { %v3648_v52 = vmul.f32 %v3646_v51, %v3643_v4 }
0x44bb   :  { %v3652_v54 = vadd.f32 %v3651_v53, %v3648_v52 }
0x44bd   :  { %v5742_v55 = vrot.slane %v3652_v54, 4 }
0x44bf   :  { %3655 = vrot.lane.b32.xlu1 %v5742_v55, %s5051_s25 }
0x4531   :  { %v3656_v59 = vpop.permute.xlu1 %3655 }
0x4532   :  { %4594 = vmatmul.mubr.msk.f32.vlgmr.msra.gmra.mrb[36].mxu0 %vm205_vm3, %v3656_v59 }
0x4533   :  { %4731 = vmatpush3.bf16.msra.mxu0 %v5642_v24  ;;  %4607 = vmatprep.mubr.msk.f32.mxu0 %vm5048_vm0, %v5049_v1 }
0x4605   :  { %v3725_v60 = vpop.f32.mrb[36].mxu0 }
0x4606   :  { %v3736_v62 = vadd.f32 %v3725_v60, %v5657_v63  ;;  %v4595_v14 = vpop.f32.mrb[37].mxu0  ;;  %v3729_v20 = vadd.f32 %v3725_v60, %v3220_v37 }
0x4608   :  { %3738 = vrot.lane.b32.xlu0 %v3736_v62, %s5052_s29  ;;  %v4209_v5 = vmul.f32 -1.442695, %v3729_v20 }
0x460a   :  { %4919 = vpow2.f32 %v4209_v5 }
0x4614   :  { %v4920_v6 = vpop.eup %4919 }
0x4615   :  { %v3733_v7 = vadd.f32 1.0, %v4920_v6 }
0x4617   :  { %4921 = vrcp.f32 %v3733_v7 }
0x4621   :  { %v4922_v8 = vpop.eup %4921 }
0x4622   :  { %v3748_v50 = vsub.f32 1.0, %v4922_v8  ;;  %v3755_v31 = vmul.f32 %v4922_v8, %v5742_v55 }
0x467a   :  { %v3739_v58 = vpop.permute.xlu0 %3738 }
0x467b   :  { %v3741_v9 = vmul.f32 %v4922_v8, %v3739_v58 }
0x467d   :  { %3743 = vrot.lane.b32.xlu1 %v3741_v9, %s5053_s30 }
0x46ef   :  { %v3744_v10 = vpop.permute.xlu1 %3743 }
0x46f0   :  { %v3746_v25 = vadd.f32 %v3744_v10, %v3220_v37 }
0x46f2   :  { %4923 = vtanh.f32 %v3746_v25 }
0x46fc   :  { %v4924_v43 = vpop.eup %4923 }
0x46fd   :  { %3750 = vrot.lane.b32.xlu0 %v4924_v43, %s5051_s25 }
0x476f   :  { %v3751_v15 = vpop.permute.xlu0 %3750 }
0x4770   :  { %v3753_v17 = vmul.f32 %v3751_v15, %v3748_v50 }
0x4772   :  { %v5757_v16 = vadd.f32 %v3755_v31, %v3753_v17 }
0x4774   :  { %3758 = vrot.lane.b32.xlu1 %v5757_v16, %s5051_s25  ;;  %v3861_v36 = vrot.slane %v5757_v16, 4 }
0x47e6   :  { %v3759_v19 = vpop.permute.xlu1 %3758 }
0x47e7   :  { %4601 = vmatmul.mubr.msk.f32.vlgmr.msra.gmra.mrb[38].mxu1 %vm205_vm3, %v3759_v19 }
0x47e8   :  { %4734 = vmatpush3.bf16.msra.mxu1 %v5642_v24  ;;  %4614 = vmatprep.mubr.msk.f32.mxu1 %vm5048_vm0, %v5049_v1 }
0x48ba   :  { %v3828_v21 = vpop.f32.mrb[38].mxu1 }
0x48bb   :  { %v3842_v22 = vadd.f32 %v3828_v21, %v5657_v63  ;;  %v4602_v40 = vpop.f32.mrb[39].mxu1  ;;  %v3833_v13 = vrot.slane %v3828_v21, 4 }
0x48bd   :  { %v3844_v32 = vrot.slane %v3842_v22, 4  ;;  %v3835_v3 = vadd.f32 %v3833_v13, %v3220_v37 }
0x48bf   :  { %3845 = vrot.lane.b32.xlu0 %v3844_v32, %s5052_s29  ;;  %v4211_v57 = vmul.f32 -1.442695, %v3835_v3 }
0x48c1   :  { %4925 = vpow2.f32 %v4211_v57  ;;  %v4098_v57 = vsel %vm205_vm3, %v5680_v34, %v5705_v12 }
0x48cb   :  { %v4926_v26 = vpop.eup %4925 }
0x48cc   :  { %v3839_v28 = vadd.f32 1.0, %v4926_v26 }
0x48ce   :  { %4927 = vrcp.f32 %v3839_v28 }
0x48d8   :  { %v4928_v44 = vpop.eup %4927 }
0x48d9   :  { %v3855_v35 = vsub.f32 1.0, %v4928_v44  ;;  %v3863_v41 = vmul.f32 %v4928_v44, %v3861_v36 }
0x4931   :  { %v3846_v2 = vpop.permute.xlu0 %3845 }
0x4932   :  { %v3848_v24 = vmul.f32 %v4928_v44, %v3846_v2 }
0x4934   :  { %3850 = vrot.lane.b32.xlu1 %v3848_v24, %s5053_s30 }
0x49a6   :  { %v3851_v1 = vpop.permute.xlu1 %3850 }
0x49a7   :  { %v3853_v42 = vadd.f32 %v3851_v1, %v3220_v37 }
0x49a9   :  { %4929 = vtanh.f32 %v3853_v42 }
0x49b3   :  { %v4930_v33 = vpop.eup %4929 }
0x49b4   :  { %3857 = vrot.lane.b32.xlu0 %v4930_v33, %s5051_s25 }
0x4a26   :  { %v3858_v49 = vpop.permute.xlu0 %3857 }
0x4a27   :  { %v3860_v39 = vmul.f32 %v3858_v49, %v3855_v35 }
0x4a29   :  { %v3864_v61 = vadd.f32 %v3863_v41, %v3860_v39 }
0x4a2b   :  { %v3866_v48 = vrot.slane %v3864_v61, 4 }
0x4a2d   :  { %3867 = vrot.lane.b32.xlu1 %v3866_v48, %s5051_s25 }
0x4a9f   :  { %v3868_v27 = vpop.permute.xlu1 %3867 }
0x4aa0   :  { %4608 = vmatmul.mubr.msk.f32.vlgmr.msra.gmra.mrb[38].mxu0 %vm205_vm3, %v3868_v27 }
0x4b73   :  { %v3937_v29 = vpop.f32.mrb[38].mxu0 }
0x4b74   :  { %v3948_v18 = vadd.f32 %v3937_v29, %v5657_v63  ;;  %v4609_v11 = vpop.f32.mrb[39].mxu0  ;;  %v3941_v0 = vadd.f32 %v3937_v29, %v3225_v45 }
0x4b76   :  { %3950 = vrot.lane.b32.xlu0 %v3948_v18, %s5052_s29  ;;  %v4213_v46 = vmul.f32 -1.442695, %v3941_v0 }
0x4b78   :  { %4931 = vpow2.f32 %v4213_v46 }
0x4b82   :  { %v4932_v47 = vpop.eup %4931 }
0x4b83   :  { %v3945_v4 = vadd.f32 1.0, %v4932_v47 }
0x4b85   :  { %4933 = vrcp.f32 %v3945_v4 }
0x4b8f   :  { %v4934_v38 = vpop.eup %4933 }
0x4b90   :  { %v3960_v60 = vsub.f32 1.0, %v4934_v38  ;;  %v3967_v30 = vmul.f32 %v4934_v38, %v3866_v48 }
0x4be8   :  { %v3951_v51 = vpop.permute.xlu0 %3950 }
0x4be9   :  { %v3953_v52 = vmul.f32 %v4934_v38, %v3951_v51 }
0x4beb   :  { %3955 = vrot.lane.b32.xlu1 %v3953_v52, %s5053_s30 }
0x4c5d   :  { %v3956_v53 = vpop.permute.xlu1 %3955 }
0x4c5e   :  { %v3958_v54 = vadd.f32 %v3956_v53, %v3225_v45 }
0x4c60   :  { %4935 = vtanh.f32 %v3958_v54 }
0x4c6a   :  { %v4936_v59 = vpop.eup %4935 }
0x4c6b   :  { %3962 = vrot.lane.b32.xlu0 %v4936_v59, %s5051_s25 }
0x4cdd   :  { %v3963_v62 = vpop.permute.xlu0 %3962 }
0x4cde   :  { %v3965_v23 = vmul.f32 %v3963_v62, %v3960_v60 }
0x4ce0   :  { %v3968_v14 = vadd.f32 %v3967_v30, %v3965_v23 }
0x4ce2   :  { %3970 = vrot.lane.b32.xlu1 %v3968_v14, %s5051_s25  ;;  %v4073_v21 = vrot.slane %v3968_v14, 4 }
0x4d54   :  { %v3971_v37 = vpop.permute.xlu1 %3970 }
0x4d55   :  { %4615 = vmatmul.mubr.msk.f32.vlgmr.msra.gmra.mrb[40].mxu1 %vm205_vm3, %v3971_v37 }
0x4e28   :  { %v4040_v20 = vpop.f32.mrb[40].mxu1 }
0x4e29   :  { %v4054_v5 = vadd.f32 %v4040_v20, %v5657_v63  ;;  %v4616_v6 = vpop.f32.mrb[41].mxu1  ;;  %v4045_v8 = vrot.slane %v4040_v20, 4 }
0x4e2b   :  { %v4056_v7 = vrot.slane %v4054_v5, 4  ;;  %v4047_v58 = vadd.f32 %v4045_v8, %v3225_v45 }
0x4e2d   :  { %4057 = vrot.lane.b32.xlu0 %v4056_v7, %s5052_s29  ;;  %v4215_v9 = vmul.f32 -1.442695, %v4047_v58 }
0x4e2f   :  { %4937 = vpow2.f32 %v4215_v9 }
0x4e39   :  { %v4938_v10 = vpop.eup %4937 }
0x4e3a   :  { %v4051_v25 = vadd.f32 1.0, %v4938_v10 }
0x4e3c   :  { %4939 = vrcp.f32 %v4051_v25 }
0x4e46   :  { %v4940_v43 = vpop.eup %4939 }
0x4e47   :  { %v4067_v19 = vsub.f32 1.0, %v4940_v43  ;;  %v4075_v40 = vmul.f32 %v4940_v43, %v4073_v21 }
0x4e9f   :  { %v4058_v50 = vpop.permute.xlu0 %4057 }
0x4ea0   :  { %v4060_v15 = vmul.f32 %v4940_v43, %v4058_v50 }
0x4ea2   :  { %4062 = vrot.lane.b32.xlu1 %v4060_v15, %s5053_s30 }
0x4ea6   :  { %4078 = vrot.lane.b32.xlu1 %v5728_v56, %s5056_s13 }
0x4eaa   :  { %4084 = vrot.lane.b32.xlu1 %v5757_v16, %s5055_s10 }
0x4eae   :  { %4090 = vrot.lane.b32.xlu1 %v3968_v14, %s5050_s12 }
0x4f14   :  { %v4063_v63 = vpop.permute.xlu1 %4062 }
0x4f15   :  { %v4065_v31 = vadd.f32 %v4063_v63, %v3225_v45 }
0x4f17   :  { %4941 = vtanh.f32 %v4065_v31 }
0x4f18   :  { %v4079_v13 = vpop.permute.xlu1 %4078 }
0x4f1c   :  { %v4085_v26 = vpop.permute.xlu1 %4084 }
0x4f20   :  { %v4091_v1 = vpop.permute.xlu1 %4090 }
0x4f21   :  { %v4942_v17 = vpop.eup %4941 }
0x4f22   :  { %4069 = vrot.lane.b32.xlu0 %v4942_v17, %s5051_s25 }
0x4f26   :  { %4081 = vrot.lane.b32.xlu0 %v5742_v55, %s5053_s30  ;;  %v4099_v55 = vsel %vm91_vm1, %v4098_v57, %v4079_v13 }
0x4f2a   :  { %4087 = vrot.lane.b32.xlu0 %v3866_v48, %s5054_s9 }
0x4f94   :  { %v4070_v22 = vpop.permute.xlu0 %4069 }
0x4f95   :  { %v4072_v56 = vmul.f32 %v4070_v22, %v4067_v19 }
0x4f97   :  { %v4076_v32 = vadd.f32 %v4075_v40, %v4072_v56 }
0x4f98   :  { %v4082_v3 = vpop.permute.xlu0 %4081 }
0x4f99   :  { %v4094_v16 = vrot.slane %v4076_v32, 4  ;;  %v4101_v28 = vsel %vm4100_vm4, %v4099_v55, %v4082_v3 }
0x4f9a   :  { %v4103_v2 = vsel %vm4102_vm5, %v4101_v28, %v4085_v26 }
0x4f9b   :  { %4095 = vrot.lane.b32.xlu0 %v4094_v16, %s5052_s29 }
0x4f9c   :  { %v4088_v44 = vpop.permute.xlu0 %4087 }
0x4f9d   :  { %v4105_v24 = vsel %vm4104_vm6, %v4103_v2, %v4088_v44 }
0x4f9e   :  { %v4107_v42 = vsel %vm4106_vm7, %v4105_v24, %v4091_v1 }
0x500d   :  { %v4096_v33 = vpop.permute.xlu0 %4095 }
0x500e   :  { %v4109_v35 = vsel %vm4108_vm8, %v4107_v42, %v4096_v33 }
0x500f   :  { %v4216_v36 = vmul.f32 -1.442695, %v4109_v35 }
0x5011   :  { %4943 = vpow2.f32 %v4216_v36 }
0x501b   :  { %v4944_v49 = vpop.eup %4943 }
0x501c   :  { %v4113_v39 = vadd.f32 1.0, %v4944_v49 }
0x501e   :  { %4945 = vrcp.f32 %v4113_v39 }
0x5028   :  { %v4946_v34 = vpop.eup %4945 }
0x5029   :  { %4116 = vst [vmem:[%s5807_s7] sm:$0xf] %v4946_v34 }
0x502a   :  { %4121 = vsyncpa [#allocation3], 1 }
0x502b   :  { %4122 = vsyncpa [#allocation5], 1 }
0x502c   :  { %4123 = vsyncpa [#allocation8], 1 }

</bundles_post_ra>
